<compile_context>
chip_gen: v6e
topology: v6e:2x2x1
jax: 0.10.0
libtpu: 0.0.40
codegen_flags: <defaults>
</compile_context>

<pallas_src>
import math

import jax
import jax.numpy as jnp
from jax import lax
from jax.experimental import pallas as pl
from jax.experimental.pallas import tpu as pltpu

# ---- scaled-down ToMTrainer config (original: n_layer=4, n_head=4,
#      n_embd=512, vocab=31000, block_size=32) ----
N_LAYER = 2
N_HEAD = 4
N_EMBD = 128
VOCAB = 512
BLOCK_SIZE = 16
LN_EPS = 1e-5
INIT_STD = 0.02


def _layer_norm(x, w, b):
    mu = jnp.mean(x, axis=-1, keepdims=True)
    var = jnp.mean((x - mu) ** 2, axis=-1, keepdims=True)
    return (x - mu) * lax.rsqrt(var + LN_EPS) * w + b


def _new_gelu(x):
    return 0.5 * x * (1.0 + jnp.tanh(math.sqrt(2.0 / math.pi) * (x + 0.044715 * x ** 3)))


def _bf16_matmul(x, w):
    # bf16 MXU operands, f32 accumulation.
    return jnp.dot(x.astype(jnp.bfloat16), w, preferred_element_type=jnp.float32)


# ----------------------------------------------------------------------------
# Fused Pallas kernel: grid iterates over layers; step 0 also does the fused
# embedding lookup + mask build, the last step does ln_f + lm_head.  The
# residual stream lives in a VMEM scratch across the whole grid.
# ----------------------------------------------------------------------------
def gpt_kernel(idx_ref, wte, wpe,
               ln1_w, ln1_b, wqkv, bqkv, wproj, bproj,
               ln2_w, ln2_b, wfc, bfc, wfc2, bfc2,
               lnf_w, lnf_b, wlm,
               logits_ref, x_res, mask_sc):
    B, T, V = logits_ref.shape
    BT, C = x_res.shape
    H = N_HEAD
    Dh = C // H
    l = pl.program_id(0)

    @pl.when(l == 0)
    def _():
        # ---- fused embedding lookup: x = wte[idx] + wpe[pos] (drop -> id) ----
        # Exact one-hot gather on the MXU: each output element is one wte value
        # plus exact zeros; fully vectorized, no dynamic sublane slices.
        vocab = wte.shape[0]
        iota_v = lax.broadcasted_iota(jnp.int32, (BT, vocab), 1)
        onehot = (idx_ref[...] == iota_v).astype(jnp.float32)          # (BT, V)
        tok_emb = jnp.dot(onehot, wte[...], preferred_element_type=jnp.float32)
        pos_emb = wpe[pl.ds(0, T), :]                                   # (T, C)
        x_res[...] = tok_emb + jnp.concatenate([pos_emb] * B, axis=0)
        # ---- additive causal mask, built once and reused by every layer ----
        row = lax.broadcasted_iota(jnp.int32, (T, T), 0)
        col = lax.broadcasted_iota(jnp.int32, (T, T), 1)
        mask_sc[...] = jnp.where(col <= row, 0.0, -1e30).astype(jnp.float32)

    x = x_res[...]                     # (BT, C) f32 residual stream
    add_mask = mask_sc[...]            # (T, T)

    def split_heads(t2d):              # (BT, C) -> (H*B, T, Dh), one transpose
        return t2d.reshape(B, T, H, Dh).transpose(2, 0, 1, 3).reshape(H * B, T, Dh)

    # ---- causal self-attention ----
    xn = _layer_norm(x, ln1_w[...], ln1_b[...])
    qkv = _bf16_matmul(xn, wqkv[...]) + bqkv[...]        # (BT, 3C), f32 acc
    q3 = split_heads(qkv[:, 0 * C:1 * C])                # lane-aligned 128-wide slices
    k3 = split_heads(qkv[:, 1 * C:2 * C])
    v3 = split_heads(qkv[:, 2 * C:3 * C])

    att = jnp.einsum('zqd,zkd->zqk',
                     q3.astype(jnp.bfloat16), k3.astype(jnp.bfloat16),
                     preferred_element_type=jnp.float32) * (1.0 / math.sqrt(Dh))
    att = att + add_mask[None, :, :]                     # mask/softmax stay f32
    att = att - jnp.max(att, axis=-1, keepdims=True)
    p = jnp.exp(att)
    p = p * pl.reciprocal(jnp.sum(p, axis=-1, keepdims=True), approx=True)
    y3 = jnp.einsum('zqk,zkd->zqd',
                    p.astype(jnp.bfloat16), v3.astype(jnp.bfloat16),
                    preferred_element_type=jnp.float32)  # (H*B, T, Dh)

    # merge heads back into a lane-dense (BT, C) slab with one transpose
    y = y3.reshape(H, B, T, Dh).transpose(1, 2, 0, 3).reshape(BT, C)
    y = _bf16_matmul(y, wproj[...]) + bproj[...]
    x = x + y                                            # resid dropout -> identity

    # ---- MLP ----
    xn2 = _layer_norm(x, ln2_w[...], ln2_b[...])
    h1 = _new_gelu(_bf16_matmul(xn2, wfc[...]) + bfc[...])
    h2 = _bf16_matmul(h1, wfc2[...]) + bfc2[...]
    x = x + h2
    x_res[...] = x

    # ---- final LayerNorm + lm_head on the last layer step ----
    # NOTE: relies on the constant out index_map deferring the logits writeback
    # until the grid ends; keep the layer axis as the only/last grid axis if
    # this kernel ever grows more grid axes.
    @pl.when(l == pl.num_programs(0) - 1)
    def _():
        xf = _layer_norm(x, lnf_w[...], lnf_b[...])
        logits_ref[...] = _bf16_matmul(xf, wlm[...]).reshape(B, T, V)


def _layer_spec(shape):
    # stacked per-layer array (leading L axis squeezed out inside the kernel)
    zeros = (0,) * len(shape)
    return pl.BlockSpec((None,) + tuple(shape), lambda l, zeros=zeros: (l,) + zeros)


def _const_spec(shape):
    # layer-invariant array, resident across the whole grid
    zeros = (0,) * len(shape)
    return pl.BlockSpec(tuple(shape), lambda l, zeros=zeros: zeros)


def tom_forward(idx, params):
    B, T = idx.shape
    assert T <= BLOCK_SIZE, f'Cannot forward sequence of length {T}, block size is only {BLOCK_SIZE}'
    C, V = N_EMBD, VOCAB

    in_specs = [
        _const_spec((B * T, 1)),                                   # idx (int32 column)
        _const_spec((VOCAB, C)),                                   # wte
        _const_spec((BLOCK_SIZE, C)),                              # wpe
        _layer_spec((1, C)), _layer_spec((1, C)),                  # ln_1 w/b
        _layer_spec((C, 3 * C)), _layer_spec((1, 3 * C)),          # attn.c_attn
        _layer_spec((C, C)), _layer_spec((1, C)),                  # attn.c_proj
        _layer_spec((1, C)), _layer_spec((1, C)),                  # ln_2 w/b
        _layer_spec((C, 4 * C)), _layer_spec((1, 4 * C)),          # mlp.c_fc
        _layer_spec((4 * C, C)), _layer_spec((1, C)),              # mlp.c_proj
        _const_spec((1, C)), _const_spec((1, C)),                  # ln_f w/b
        _const_spec((C, V)),                                       # lm_head
    ]

    return pl.pallas_call(
        gpt_kernel,
        grid=(N_LAYER,),
        in_specs=in_specs,
        out_specs=_const_spec((B, T, V)),
        out_shape=jax.ShapeDtypeStruct((B, T, V), jnp.float32),
        scratch_shapes=[pltpu.VMEM((B * T, C), jnp.float32),       # residual stream
                        pltpu.VMEM((T, T), jnp.float32)],          # causal mask
        compiler_params=pltpu.CompilerParams(
            dimension_semantics=("arbitrary",),
            vmem_limit_bytes=32 * 1024 * 1024),
    )(idx.reshape(B * T, 1).astype(jnp.int32),
      params['wte'], params['wpe'],
      params['ln1_w'], params['ln1_b'], params['wqkv'], params['bqkv'],
      params['wproj'], params['bproj'], params['ln2_w'], params['ln2_b'],
      params['wfc'], params['bfc'], params['wfc2'], params['bfc2'],
      params['lnf_w'], params['lnf_b'], params['wlm'])


# ----------------------------------------------------------------------------
# Parameter init (mirrors ToMTrainer._init_weights, deterministic).
# Matmul weights are stored bf16 and stacked per layer with a leading L axis.
# ----------------------------------------------------------------------------
def init_params(key):
    C, V, L = N_EMBD, VOCAB, N_LAYER
    k = jax.random.split(key, 8)
    nrm = lambda kk, shape, std: std * jax.random.normal(kk, shape, jnp.float32)
    proj_std = INIT_STD / math.sqrt(2 * L)   # c_proj.weight special init
    return {
        'wte': nrm(k[0], (V, C), INIT_STD),
        'wpe': nrm(k[1], (BLOCK_SIZE, C), INIT_STD),
        'lnf_w': jnp.ones((1, C), jnp.float32),
        'lnf_b': jnp.zeros((1, C), jnp.float32),
        'wlm': nrm(k[2], (C, V), INIT_STD).astype(jnp.bfloat16),        # lm_head, no bias
        'ln1_w': jnp.ones((L, 1, C), jnp.float32),
        'ln1_b': jnp.zeros((L, 1, C), jnp.float32),
        'ln2_w': jnp.ones((L, 1, C), jnp.float32),
        'ln2_b': jnp.zeros((L, 1, C), jnp.float32),
        'wqkv': nrm(k[3], (L, C, 3 * C), INIT_STD).astype(jnp.bfloat16),
        'bqkv': jnp.zeros((L, 1, 3 * C), jnp.float32),
        'wproj': nrm(k[4], (L, C, C), proj_std).astype(jnp.bfloat16),
        'bproj': jnp.zeros((L, 1, C), jnp.float32),
        'wfc': nrm(k[5], (L, C, 4 * C), INIT_STD).astype(jnp.bfloat16),
        'bfc': jnp.zeros((L, 1, 4 * C), jnp.float32),
        'wfc2': nrm(k[6], (L, 4 * C, C), proj_std).astype(jnp.bfloat16),
        'bfc2': jnp.zeros((L, 1, C), jnp.float32),
    }


# ----------------------------------------------------------------------------
# Pure-JAX reference (same math, same bf16 matmul weights, f32 attention /
# exact softmax / exact embedding gather) for correctness.
# ----------------------------------------------------------------------------
def tom_forward_ref(idx, params):
    B, T = idx.shape
    C, H, L = N_EMBD, N_HEAD, N_LAYER
    Dh = C // H
    x = (params['wte'][idx] + params['wpe'][:T][None, :, :]).astype(jnp.float32)
    mask = jnp.tril(jnp.ones((T, T), bool))[None, None]
    for l in range(L):
        xn = _layer_norm(x, params['ln1_w'][l], params['ln1_b'][l])
        qkv = _bf16_matmul(xn.reshape(B * T, C), params['wqkv'][l]) + params['bqkv'][l]
        q, k, v = jnp.split(qkv.reshape(B, T, 3 * C), 3, axis=-1)
        q = q.reshape(B, T, H, Dh).transpose(0, 2, 1, 3)
        k = k.reshape(B, T, H, Dh).transpose(0, 2, 1, 3)
        v = v.reshape(B, T, H, Dh).transpose(0, 2, 1, 3)
        att = (q @ k.transpose(0, 1, 3, 2)) / math.sqrt(Dh)
        att = jnp.where(mask, att, -jnp.inf)
        att = jax.nn.softmax(att, axis=-1)
        y = (att @ v).transpose(0, 2, 1, 3).reshape(B, T, C)
        x = x + (_bf16_matmul(y.reshape(B * T, C), params['wproj'][l])
                 + params['bproj'][l]).reshape(B, T, C)
        xn2 = _layer_norm(x, params['ln2_w'][l], params['ln2_b'][l])
        h1 = _new_gelu(_bf16_matmul(xn2.reshape(B * T, C), params['wfc'][l]) + params['bfc'][l])
        h2 = _bf16_matmul(h1, params['wfc2'][l]) + params['bfc2'][l]
        x = x + h2.reshape(B, T, C)
    xf = _layer_norm(x, params['lnf_w'], params['lnf_b'])
    return _bf16_matmul(xf.reshape(B * T, C), params['wlm']).reshape(B, T, VOCAB)


if __name__ == "__main__":
    key = jax.random.PRNGKey(0)
    pkey, ikey = jax.random.split(key)
    params = init_params(pkey)

    B, T = 2, 8
    idx = jax.random.randint(ikey, (B, T), 0, VOCAB, dtype=jnp.int32)

    logits = jax.block_until_ready(tom_forward(idx, params))
    assert logits.shape == (B, T, VOCAB)

    ref = tom_forward_ref(idx, params)
    max_err = float(jnp.max(jnp.abs(logits - ref)))
    # tolerance covers the EUP approx-reciprocal softmax, bf16 attention
    # operands, and accumulation-order differences
    assert jnp.allclose(logits, ref, atol=1e-2, rtol=1e-2), max_err

    print("KERNEL_OK")
</pallas_src>

<mosaic_0001>
module attributes {stable_mosaic.version = 11 : i64} {
  func.func @gpt_kernel(%arg0: i32, %arg1: memref<16x1xi32, #tpu.memory_space<vmem>>, %arg2: memref<512x128xf32, #tpu.memory_space<vmem>>, %arg3: memref<16x128xf32, #tpu.memory_space<vmem>>, %arg4: memref<1x1x128xf32, #tpu.memory_space<vmem>>, %arg5: memref<1x1x128xf32, #tpu.memory_space<vmem>>, %arg6: memref<1x128x384xbf16, #tpu.memory_space<vmem>>, %arg7: memref<1x1x384xf32, #tpu.memory_space<vmem>>, %arg8: memref<1x128x128xbf16, #tpu.memory_space<vmem>>, %arg9: memref<1x1x128xf32, #tpu.memory_space<vmem>>, %arg10: memref<1x1x128xf32, #tpu.memory_space<vmem>>, %arg11: memref<1x1x128xf32, #tpu.memory_space<vmem>>, %arg12: memref<1x128x512xbf16, #tpu.memory_space<vmem>>, %arg13: memref<1x1x512xf32, #tpu.memory_space<vmem>>, %arg14: memref<1x512x128xbf16, #tpu.memory_space<vmem>>, %arg15: memref<1x1x128xf32, #tpu.memory_space<vmem>>, %arg16: memref<1x128xf32, #tpu.memory_space<vmem>>, %arg17: memref<1x128xf32, #tpu.memory_space<vmem>>, %arg18: memref<128x512xbf16, #tpu.memory_space<vmem>>, %arg19: memref<2x8x512xf32, #tpu.memory_space<vmem>>, %arg20: memref<16x128xf32, #tpu.memory_space<vmem>>, %arg21: memref<8x8xf32, #tpu.memory_space<vmem>>) attributes {dimension_semantics = [#tpu.dimension_semantics<arbitrary>], iteration_bounds = array<i64: 2>, scalar_prefetch = 0 : i64, scratch_operands = 2 : i64, tpu.core_type = #tpu.core_type<tc>, window_params = [{pipeline_mode = #tpu.pipeline_mode<synchronous>, transform_indices = @transform_0, window_bounds = array<i64: 16, 1>}, {pipeline_mode = #tpu.pipeline_mode<synchronous>, transform_indices = @transform_1, window_bounds = array<i64: 512, 128>}, {pipeline_mode = #tpu.pipeline_mode<synchronous>, transform_indices = @transform_2, window_bounds = array<i64: 16, 128>}, {transform_indices = @transform_3, window_bounds = array<i64: 1, 1, 128>}, {transform_indices = @transform_4, window_bounds = array<i64: 1, 1, 128>}, {transform_indices = @transform_5, window_bounds = array<i64: 1, 128, 384>}, {transform_indices = @transform_6, window_bounds = array<i64: 1, 1, 384>}, {transform_indices = @transform_7, window_bounds = array<i64: 1, 128, 128>}, {transform_indices = @transform_8, window_bounds = array<i64: 1, 1, 128>}, {transform_indices = @transform_9, window_bounds = array<i64: 1, 1, 128>}, {transform_indices = @transform_10, window_bounds = array<i64: 1, 1, 128>}, {transform_indices = @transform_11, window_bounds = array<i64: 1, 128, 512>}, {transform_indices = @transform_12, window_bounds = array<i64: 1, 1, 512>}, {transform_indices = @transform_13, window_bounds = array<i64: 1, 512, 128>}, {transform_indices = @transform_14, window_bounds = array<i64: 1, 1, 128>}, {pipeline_mode = #tpu.pipeline_mode<synchronous>, transform_indices = @transform_15, window_bounds = array<i64: 1, 128>}, {pipeline_mode = #tpu.pipeline_mode<synchronous>, transform_indices = @transform_16, window_bounds = array<i64: 1, 128>}, {pipeline_mode = #tpu.pipeline_mode<synchronous>, transform_indices = @transform_17, window_bounds = array<i64: 128, 512>}, {pipeline_mode = #tpu.pipeline_mode<synchronous>, transform_indices = @transform_18, window_bounds = array<i64: 2, 8, 512>}]} {
    %c0_i32 = arith.constant 0 : i32
    %0 = arith.cmpi eq, %arg0, %c0_i32 : i32
    %1 = arith.extui %0 : i1 to i32
    %c0_i32_0 = arith.constant 0 : i32
    %2 = arith.cmpi ne, %1, %c0_i32_0 : i32
    scf.if %2 {
      %144 = tpu.iota {dimensions = array<i32: 1>} : vector<16x512xi32>
      %c0_65 = arith.constant 0 : index
      %c0_66 = arith.constant 0 : index
      %145 = vector.load %arg1[%c0_65, %c0_66] : memref<16x1xi32, #tpu.memory_space<vmem>>, vector<16x1xi32>
      %146 = vector.broadcast %145 : vector<16x1xi32> to vector<16x512xi32>
      %147 = arith.cmpi eq, %146, %144 : vector<16x512xi32>
      %148 = arith.extui %147 : vector<16x512xi1> to vector<16x512xi32>
      %149 = arith.sitofp %148 : vector<16x512xi32> to vector<16x512xf32>
      %c0_67 = arith.constant 0 : index
      %c0_68 = arith.constant 0 : index
      %150 = vector.load %arg2[%c0_67, %c0_68] : memref<512x128xf32, #tpu.memory_space<vmem>>, vector<512x128xf32>
      %cst_69 = arith.constant dense<0.000000e+00> : vector<16x128xf32>
      %151 = tpu.matmul %149, %150, %cst_69 {dimension_numbers = #tpu.dot_dimension_numbers<[1], [0], [0], [1], [0, 0, 1, 1], [], []>} : vector<16x512xf32>, vector<512x128xf32>, vector<16x128xf32> -> vector<16x128xf32>
      %c0_70 = arith.constant 0 : index
      %c0_71 = arith.constant 0 : index
      %152 = vector.load %arg3[%c0_70, %c0_71] : memref<16x128xf32, #tpu.memory_space<vmem>>, vector<8x128xf32>
      %153 = tpu.concatenate %152, %152 in 0 : vector<8x128xf32>, vector<8x128xf32> -> vector<16x128xf32>
      %154 = arith.addf %151, %153 : vector<16x128xf32>
      %c0_72 = arith.constant 0 : index
      %c0_73 = arith.constant 0 : index
      %155 = vector.load %arg20[%c0_72, %c0_73] : memref<16x128xf32, #tpu.memory_space<vmem>>, vector<16x128xf32>
      tpu.vector_store %arg20[%c0_72, %c0_73], %154 {strides = array<i32>} : memref<16x128xf32, #tpu.memory_space<vmem>>, vector<16x128xf32>,
      %156 = tpu.iota {dimensions = array<i32: 0>} : vector<8x8xi32>
      %157 = tpu.iota {dimensions = array<i32: 1>} : vector<8x8xi32>
      %158 = arith.cmpi sle, %157, %156 : vector<8x8xi32>
      %cst_74 = arith.constant 0.000000e+00 : f32
      %cst_75 = arith.constant -1.000000e+30 : f32
      %159 = vector.broadcast %cst_74 : f32 to vector<8x8xf32>
      %160 = vector.broadcast %cst_75 : f32 to vector<8x8xf32>
      %161 = arith.select %158, %159, %160 : vector<8x8xi1>, vector<8x8xf32>
      %c0_76 = arith.constant 0 : index
      %c0_77 = arith.constant 0 : index
      %162 = vector.load %arg21[%c0_76, %c0_77] : memref<8x8xf32, #tpu.memory_space<vmem>>, vector<8x8xf32>
      tpu.vector_store %arg21[%c0_76, %c0_77], %161 {strides = array<i32>} : memref<8x8xf32, #tpu.memory_space<vmem>>, vector<8x8xf32>,
    } else {
    }
    %c0 = arith.constant 0 : index
    %c0_1 = arith.constant 0 : index
    %3 = vector.load %arg20[%c0, %c0_1] : memref<16x128xf32, #tpu.memory_space<vmem>>, vector<16x128xf32>
    %c0_2 = arith.constant 0 : index
    %c0_3 = arith.constant 0 : index
    %4 = vector.load %arg21[%c0_2, %c0_3] : memref<8x8xf32, #tpu.memory_space<vmem>>, vector<8x8xf32>
    %c0_4 = arith.constant 0 : index
    %c0_5 = arith.constant 0 : index
    %c0_6 = arith.constant 0 : index
    %5 = vector.load %arg4[%c0_4, %c0_5, %c0_6] : memref<1x1x128xf32, #tpu.memory_space<vmem>>, vector<1x1x128xf32>
    %6 = vector.shape_cast %5 : vector<1x1x128xf32> to vector<1x128xf32>
    %c0_7 = arith.constant 0 : index
    %c0_8 = arith.constant 0 : index
    %c0_9 = arith.constant 0 : index
    %7 = vector.load %arg5[%c0_7, %c0_8, %c0_9] : memref<1x1x128xf32, #tpu.memory_space<vmem>>, vector<1x1x128xf32>
    %8 = vector.shape_cast %7 : vector<1x1x128xf32> to vector<1x128xf32>
    %cst = arith.constant dense<0.000000e+00> : vector<16xf32>
    %9 = vector.multi_reduction <add>, %3, %cst [1] : vector<16x128xf32> to vector<16xf32>
    %10 = vector.shape_cast %9 : vector<16xf32> to vector<16x1xf32>
    %cst_10 = arith.constant 1.280000e+02 : f32
    %11 = vector.broadcast %cst_10 : f32 to vector<16x1xf32>
    %12 = arith.divf %10, %11 : vector<16x1xf32>
    %13 = vector.broadcast %12 : vector<16x1xf32> to vector<16x128xf32>
    %14 = arith.subf %3, %13 : vector<16x128xf32>
    %15 = arith.mulf %14, %14 : vector<16x128xf32>
    %cst_11 = arith.constant dense<0.000000e+00> : vector<16xf32>
    %16 = vector.multi_reduction <add>, %15, %cst_11 [1] : vector<16x128xf32> to vector<16xf32>
    %17 = vector.shape_cast %16 : vector<16xf32> to vector<16x1xf32>
    %cst_12 = arith.constant 1.280000e+02 : f32
    %18 = vector.broadcast %cst_12 : f32 to vector<16x1xf32>
    %19 = arith.divf %17, %18 : vector<16x1xf32>
    %20 = vector.broadcast %12 : vector<16x1xf32> to vector<16x128xf32>
    %21 = arith.subf %3, %20 : vector<16x128xf32>
    %cst_13 = arith.constant 9.99999974E-6 : f32
    %22 = vector.broadcast %cst_13 : f32 to vector<16x1xf32>
    %23 = arith.addf %19, %22 : vector<16x1xf32>
    %24 = math.rsqrt %23 : vector<16x1xf32>
    %25 = vector.broadcast %24 : vector<16x1xf32> to vector<16x128xf32>
    %26 = arith.mulf %21, %25 : vector<16x128xf32>
    %27 = vector.broadcast %6 : vector<1x128xf32> to vector<16x128xf32>
    %28 = arith.mulf %26, %27 : vector<16x128xf32>
    %29 = vector.broadcast %8 : vector<1x128xf32> to vector<16x128xf32>
    %30 = arith.addf %28, %29 : vector<16x128xf32>
    %c0_14 = arith.constant 0 : index
    %c0_15 = arith.constant 0 : index
    %c0_16 = arith.constant 0 : index
    %31 = vector.load %arg6[%c0_14, %c0_15, %c0_16] : memref<1x128x384xbf16, #tpu.memory_space<vmem>>, vector<1x128x384xbf16>
    %32 = vector.shape_cast %31 : vector<1x128x384xbf16> to vector<128x384xbf16>
    %33 = arith.truncf %30 : vector<16x128xf32> to vector<16x128xbf16>
    %cst_17 = arith.constant dense<0.000000e+00> : vector<16x384xf32>
    %34 = tpu.matmul %33, %32, %cst_17 {dimension_numbers = #tpu.dot_dimension_numbers<[1], [0], [0], [1], [0, 0, 1, 1], [], []>} : vector<16x128xbf16>, vector<128x384xbf16>, vector<16x384xf32> -> vector<16x384xf32>
    %c0_18 = arith.constant 0 : index
    %c0_19 = arith.constant 0 : index
    %c0_20 = arith.constant 0 : index
    %35 = vector.load %arg7[%c0_18, %c0_19, %c0_20] : memref<1x1x384xf32, #tpu.memory_space<vmem>>, vector<1x1x384xf32>
    %36 = vector.shape_cast %35 : vector<1x1x384xf32> to vector<1x384xf32>
    %37 = vector.broadcast %36 : vector<1x384xf32> to vector<16x384xf32>
    %38 = arith.addf %34, %37 : vector<16x384xf32>
    %39 = vector.extract_strided_slice %38 {offsets = [0, 0], sizes = [16, 128], strides = [1, 1]} : vector<16x384xf32> to vector<16x128xf32>
    %40 = vector.shape_cast %39 : vector<16x128xf32> to vector<2x8x4x32xf32>
    %41 = tpu.transpose %40, [2, 0, 1, 3] : vector<2x8x4x32xf32> -> vector<4x2x8x32xf32>
    %42 = vector.shape_cast %41 : vector<4x2x8x32xf32> to vector<8x8x32xf32>
    %43 = vector.extract_strided_slice %38 {offsets = [0, 128], sizes = [16, 128], strides = [1, 1]} : vector<16x384xf32> to vector<16x128xf32>
    %44 = vector.shape_cast %43 : vector<16x128xf32> to vector<2x8x4x32xf32>
    %45 = tpu.transpose %44, [2, 0, 1, 3] : vector<2x8x4x32xf32> -> vector<4x2x8x32xf32>
    %46 = vector.shape_cast %45 : vector<4x2x8x32xf32> to vector<8x8x32xf32>
    %47 = vector.extract_strided_slice %38 {offsets = [0, 256], sizes = [16, 128], strides = [1, 1]} : vector<16x384xf32> to vector<16x128xf32>
    %48 = vector.shape_cast %47 : vector<16x128xf32> to vector<2x8x4x32xf32>
    %49 = tpu.transpose %48, [2, 0, 1, 3] : vector<2x8x4x32xf32> -> vector<4x2x8x32xf32>
    %50 = vector.shape_cast %49 : vector<4x2x8x32xf32> to vector<8x8x32xf32>
    %51 = arith.truncf %42 : vector<8x8x32xf32> to vector<8x8x32xbf16>
    %52 = arith.truncf %46 : vector<8x8x32xf32> to vector<8x8x32xbf16>
    "tpu.trace_start"() <{level = 10 : i32, message = "zqd,zkd->zqk"}> : () -> ()
    %cst_21 = arith.constant dense<0.000000e+00> : vector<8x8x8xf32>
    %53 = tpu.matmul %51, %52, %cst_21 {dimension_numbers = #tpu.dot_dimension_numbers<[2], [2], [1], [1], [0, 0, 0, 1, 1, 1], [0], [0]>} : vector<8x8x32xbf16>, vector<8x8x32xbf16>, vector<8x8x8xf32> -> vector<8x8x8xf32>
    "tpu.trace_stop"() : () -> ()
    %cst_22 = arith.constant 0.176776692 : f32
    %54 = vector.broadcast %cst_22 : f32 to vector<8x8x8xf32>
    %55 = arith.mulf %53, %54 : vector<8x8x8xf32>
    %56 = vector.shape_cast %4 : vector<8x8xf32> to vector<1x8x8xf32>
    %57 = vector.broadcast %56 : vector<1x8x8xf32> to vector<8x8x8xf32>
    %58 = arith.addf %55, %57 : vector<8x8x8xf32>
    %cst_23 = arith.constant dense<0xFF800000> : vector<8x8xf32>
    %59 = vector.multi_reduction <maximumf>, %58, %cst_23 [2] : vector<8x8x8xf32> to vector<8x8xf32>
    %60 = vector.shape_cast %59 : vector<8x8xf32> to vector<8x8x1xf32>
    %61 = vector.broadcast %60 : vector<8x8x1xf32> to vector<8x8x8xf32>
    %62 = arith.subf %58, %61 : vector<8x8x8xf32>
    %63 = math.exp %62 : vector<8x8x8xf32>
    %cst_24 = arith.constant dense<0.000000e+00> : vector<8x8xf32>
    %64 = vector.multi_reduction <add>, %63, %cst_24 [2] : vector<8x8x8xf32> to vector<8x8xf32>
    %65 = vector.shape_cast %64 : vector<8x8xf32> to vector<8x8x1xf32>
    %66 = tpu.reciprocal %65 {approx = true} : vector<8x8x1xf32> -> vector<8x8x1xf32>
    %67 = vector.broadcast %66 : vector<8x8x1xf32> to vector<8x8x8xf32>
    %68 = arith.mulf %63, %67 : vector<8x8x8xf32>
    %69 = arith.truncf %68 : vector<8x8x8xf32> to vector<8x8x8xbf16>
    %70 = arith.truncf %50 : vector<8x8x32xf32> to vector<8x8x32xbf16>
    "tpu.trace_start"() <{level = 10 : i32, message = "zqk,zkd->zqd"}> : () -> ()
    %cst_25 = arith.constant dense<0.000000e+00> : vector<8x8x32xf32>
    %71 = tpu.matmul %69, %70, %cst_25 {dimension_numbers = #tpu.dot_dimension_numbers<[2], [1], [1], [2], [0, 0, 0, 1, 1, 2], [0], [0]>} : vector<8x8x8xbf16>, vector<8x8x32xbf16>, vector<8x8x32xf32> -> vector<8x8x32xf32>
    "tpu.trace_stop"() : () -> ()
    %72 = vector.shape_cast %71 : vector<8x8x32xf32> to vector<4x2x8x32xf32>
    %73 = tpu.transpose %72, [1, 2, 0, 3] : vector<4x2x8x32xf32> -> vector<2x8x4x32xf32>
    %74 = vector.shape_cast %73 : vector<2x8x4x32xf32> to vector<16x128xf32>
    %c0_26 = arith.constant 0 : index
    %c0_27 = arith.constant 0 : index
    %c0_28 = arith.constant 0 : index
    %75 = vector.load %arg8[%c0_26, %c0_27, %c0_28] : memref<1x128x128xbf16, #tpu.memory_space<vmem>>, vector<1x128x128xbf16>
    %76 = vector.shape_cast %75 : vector<1x128x128xbf16> to vector<128x128xbf16>
    %77 = arith.truncf %74 : vector<16x128xf32> to vector<16x128xbf16>
    %cst_29 = arith.constant dense<0.000000e+00> : vector<16x128xf32>
    %78 = tpu.matmul %77, %76, %cst_29 {dimension_numbers = #tpu.dot_dimension_numbers<[1], [0], [0], [1], [0, 0, 1, 1], [], []>} : vector<16x128xbf16>, vector<128x128xbf16>, vector<16x128xf32> -> vector<16x128xf32>
    %c0_30 = arith.constant 0 : index
    %c0_31 = arith.constant 0 : index
    %c0_32 = arith.constant 0 : index
    %79 = vector.load %arg9[%c0_30, %c0_31, %c0_32] : memref<1x1x128xf32, #tpu.memory_space<vmem>>, vector<1x1x128xf32>
    %80 = vector.shape_cast %79 : vector<1x1x128xf32> to vector<1x128xf32>
    %81 = vector.broadcast %80 : vector<1x128xf32> to vector<16x128xf32>
    %82 = arith.addf %78, %81 : vector<16x128xf32>
    %83 = arith.addf %3, %82 : vector<16x128xf32>
    %c0_33 = arith.constant 0 : index
    %c0_34 = arith.constant 0 : index
    %c0_35 = arith.constant 0 : index
    %84 = vector.load %arg10[%c0_33, %c0_34, %c0_35] : memref<1x1x128xf32, #tpu.memory_space<vmem>>, vector<1x1x128xf32>
    %85 = vector.shape_cast %84 : vector<1x1x128xf32> to vector<1x128xf32>
    %c0_36 = arith.constant 0 : index
    %c0_37 = arith.constant 0 : index
    %c0_38 = arith.constant 0 : index
    %86 = vector.load %arg11[%c0_36, %c0_37, %c0_38] : memref<1x1x128xf32, #tpu.memory_space<vmem>>, vector<1x1x128xf32>
    %87 = vector.shape_cast %86 : vector<1x1x128xf32> to vector<1x128xf32>
    %cst_39 = arith.constant dense<0.000000e+00> : vector<16xf32>
    %88 = vector.multi_reduction <add>, %83, %cst_39 [1] : vector<16x128xf32> to vector<16xf32>
    %89 = vector.shape_cast %88 : vector<16xf32> to vector<16x1xf32>
    %cst_40 = arith.constant 1.280000e+02 : f32
    %90 = vector.broadcast %cst_40 : f32 to vector<16x1xf32>
    %91 = arith.divf %89, %90 : vector<16x1xf32>
    %92 = vector.broadcast %91 : vector<16x1xf32> to vector<16x128xf32>
    %93 = arith.subf %83, %92 : vector<16x128xf32>
    %94 = arith.mulf %93, %93 : vector<16x128xf32>
    %cst_41 = arith.constant dense<0.000000e+00> : vector<16xf32>
    %95 = vector.multi_reduction <add>, %94, %cst_41 [1] : vector<16x128xf32> to vector<16xf32>
    %96 = vector.shape_cast %95 : vector<16xf32> to vector<16x1xf32>
    %cst_42 = arith.constant 1.280000e+02 : f32
    %97 = vector.broadcast %cst_42 : f32 to vector<16x1xf32>
    %98 = arith.divf %96, %97 : vector<16x1xf32>
    %99 = vector.broadcast %91 : vector<16x1xf32> to vector<16x128xf32>
    %100 = arith.subf %83, %99 : vector<16x128xf32>
    %cst_43 = arith.constant 9.99999974E-6 : f32
    %101 = vector.broadcast %cst_43 : f32 to vector<16x1xf32>
    %102 = arith.addf %98, %101 : vector<16x1xf32>
    %103 = math.rsqrt %102 : vector<16x1xf32>
    %104 = vector.broadcast %103 : vector<16x1xf32> to vector<16x128xf32>
    %105 = arith.mulf %100, %104 : vector<16x128xf32>
    %106 = vector.broadcast %85 : vector<1x128xf32> to vector<16x128xf32>
    %107 = arith.mulf %105, %106 : vector<16x128xf32>
    %108 = vector.broadcast %87 : vector<1x128xf32> to vector<16x128xf32>
    %109 = arith.addf %107, %108 : vector<16x128xf32>
    %c0_44 = arith.constant 0 : index
    %c0_45 = arith.constant 0 : index
    %c0_46 = arith.constant 0 : index
    %110 = vector.load %arg12[%c0_44, %c0_45, %c0_46] : memref<1x128x512xbf16, #tpu.memory_space<vmem>>, vector<1x128x512xbf16>
    %111 = vector.shape_cast %110 : vector<1x128x512xbf16> to vector<128x512xbf16>
    %112 = arith.truncf %109 : vector<16x128xf32> to vector<16x128xbf16>
    %cst_47 = arith.constant dense<0.000000e+00> : vector<16x512xf32>
    %113 = tpu.matmul %112, %111, %cst_47 {dimension_numbers = #tpu.dot_dimension_numbers<[1], [0], [0], [1], [0, 0, 1, 1], [], []>} : vector<16x128xbf16>, vector<128x512xbf16>, vector<16x512xf32> -> vector<16x512xf32>
    %c0_48 = arith.constant 0 : index
    %c0_49 = arith.constant 0 : index
    %c0_50 = arith.constant 0 : index
    %114 = vector.load %arg13[%c0_48, %c0_49, %c0_50] : memref<1x1x512xf32, #tpu.memory_space<vmem>>, vector<1x1x512xf32>
    %115 = vector.shape_cast %114 : vector<1x1x512xf32> to vector<1x512xf32>
    %116 = vector.broadcast %115 : vector<1x512xf32> to vector<16x512xf32>
    %117 = arith.addf %113, %116 : vector<16x512xf32>
    %cst_51 = arith.constant 5.000000e-01 : f32
    %118 = vector.broadcast %cst_51 : f32 to vector<16x512xf32>
    %119 = arith.mulf %118, %117 : vector<16x512xf32>
    %120 = arith.mulf %117, %117 : vector<16x512xf32>
    %121 = arith.mulf %117, %120 : vector<16x512xf32>
    %cst_52 = arith.constant 4.471500e-02 : f32
    %122 = vector.broadcast %cst_52 : f32 to vector<16x512xf32>
    %123 = arith.mulf %122, %121 : vector<16x512xf32>
    %124 = arith.addf %117, %123 : vector<16x512xf32>
    %cst_53 = arith.constant 0.797884583 : f32
    %125 = vector.broadcast %cst_53 : f32 to vector<16x512xf32>
    %126 = arith.mulf %125, %124 : vector<16x512xf32>
    %127 = math.tanh %126 : vector<16x512xf32>
    %cst_54 = arith.constant 1.000000e+00 : f32
    %128 = vector.broadcast %cst_54 : f32 to vector<16x512xf32>
    %129 = arith.addf %128, %127 : vector<16x512xf32>
    %130 = arith.mulf %119, %129 : vector<16x512xf32>
    %c0_55 = arith.constant 0 : index
    %c0_56 = arith.constant 0 : index
    %c0_57 = arith.constant 0 : index
    %131 = vector.load %arg14[%c0_55, %c0_56, %c0_57] : memref<1x512x128xbf16, #tpu.memory_space<vmem>>, vector<1x512x128xbf16>
    %132 = vector.shape_cast %131 : vector<1x512x128xbf16> to vector<512x128xbf16>
    %133 = arith.truncf %130 : vector<16x512xf32> to vector<16x512xbf16>
    %cst_58 = arith.constant dense<0.000000e+00> : vector<16x128xf32>
    %134 = tpu.matmul %133, %132, %cst_58 {dimension_numbers = #tpu.dot_dimension_numbers<[1], [0], [0], [1], [0, 0, 1, 1], [], []>} : vector<16x512xbf16>, vector<512x128xbf16>, vector<16x128xf32> -> vector<16x128xf32>
    %c0_59 = arith.constant 0 : index
    %c0_60 = arith.constant 0 : index
    %c0_61 = arith.constant 0 : index
    %135 = vector.load %arg15[%c0_59, %c0_60, %c0_61] : memref<1x1x128xf32, #tpu.memory_space<vmem>>, vector<1x1x128xf32>
    %136 = vector.shape_cast %135 : vector<1x1x128xf32> to vector<1x128xf32>
    %137 = vector.broadcast %136 : vector<1x128xf32> to vector<16x128xf32>
    %138 = arith.addf %134, %137 : vector<16x128xf32>
    %139 = arith.addf %83, %138 : vector<16x128xf32>
    %c0_62 = arith.constant 0 : index
    %c0_63 = arith.constant 0 : index
    %140 = vector.load %arg20[%c0_62, %c0_63] : memref<16x128xf32, #tpu.memory_space<vmem>>, vector<16x128xf32>
    tpu.vector_store %arg20[%c0_62, %c0_63], %139 {strides = array<i32>} : memref<16x128xf32, #tpu.memory_space<vmem>>, vector<16x128xf32>,
    %c1_i32 = arith.constant 1 : i32
    %141 = arith.cmpi eq, %arg0, %c1_i32 : i32
    %142 = arith.extui %141 : i1 to i32
    %c0_i32_64 = arith.constant 0 : i32
    %143 = arith.cmpi ne, %142, %c0_i32_64 : i32
    scf.if %143 {
      %c0_65 = arith.constant 0 : index
      %c0_66 = arith.constant 0 : index
      %144 = vector.load %arg16[%c0_65, %c0_66] : memref<1x128xf32, #tpu.memory_space<vmem>>, vector<1x128xf32>
      %c0_67 = arith.constant 0 : index
      %c0_68 = arith.constant 0 : index
      %145 = vector.load %arg17[%c0_67, %c0_68] : memref<1x128xf32, #tpu.memory_space<vmem>>, vector<1x128xf32>
      %cst_69 = arith.constant dense<0.000000e+00> : vector<16xf32>
      %146 = vector.multi_reduction <add>, %139, %cst_69 [1] : vector<16x128xf32> to vector<16xf32>
      %147 = vector.shape_cast %146 : vector<16xf32> to vector<16x1xf32>
      %cst_70 = arith.constant 1.280000e+02 : f32
      %148 = vector.broadcast %cst_70 : f32 to vector<16x1xf32>
      %149 = arith.divf %147, %148 : vector<16x1xf32>
      %150 = vector.broadcast %149 : vector<16x1xf32> to vector<16x128xf32>
      %151 = arith.subf %139, %150 : vector<16x128xf32>
      %152 = arith.mulf %151, %151 : vector<16x128xf32>
      %cst_71 = arith.constant dense<0.000000e+00> : vector<16xf32>
      %153 = vector.multi_reduction <add>, %152, %cst_71 [1] : vector<16x128xf32> to vector<16xf32>
      %154 = vector.shape_cast %153 : vector<16xf32> to vector<16x1xf32>
      %cst_72 = arith.constant 1.280000e+02 : f32
      %155 = vector.broadcast %cst_72 : f32 to vector<16x1xf32>
      %156 = arith.divf %154, %155 : vector<16x1xf32>
      %157 = vector.broadcast %149 : vector<16x1xf32> to vector<16x128xf32>
      %158 = arith.subf %139, %157 : vector<16x128xf32>
      %cst_73 = arith.constant 9.99999974E-6 : f32
      %159 = vector.broadcast %cst_73 : f32 to vector<16x1xf32>
      %160 = arith.addf %156, %159 : vector<16x1xf32>
      %161 = math.rsqrt %160 : vector<16x1xf32>
      %162 = vector.broadcast %161 : vector<16x1xf32> to vector<16x128xf32>
      %163 = arith.mulf %158, %162 : vector<16x128xf32>
      %164 = vector.broadcast %144 : vector<1x128xf32> to vector<16x128xf32>
      %165 = arith.mulf %163, %164 : vector<16x128xf32>
      %166 = vector.broadcast %145 : vector<1x128xf32> to vector<16x128xf32>
      %167 = arith.addf %165, %166 : vector<16x128xf32>
      %c0_74 = arith.constant 0 : index
      %c0_75 = arith.constant 0 : index
      %168 = vector.load %arg18[%c0_74, %c0_75] : memref<128x512xbf16, #tpu.memory_space<vmem>>, vector<128x512xbf16>
      %169 = arith.truncf %167 : vector<16x128xf32> to vector<16x128xbf16>
      %cst_76 = arith.constant dense<0.000000e+00> : vector<16x512xf32>
      %170 = tpu.matmul %169, %168, %cst_76 {dimension_numbers = #tpu.dot_dimension_numbers<[1], [0], [0], [1], [0, 0, 1, 1], [], []>} : vector<16x128xbf16>, vector<128x512xbf16>, vector<16x512xf32> -> vector<16x512xf32>
      %171 = vector.shape_cast %170 : vector<16x512xf32> to vector<2x8x512xf32>
      %c0_77 = arith.constant 0 : index
      %c0_78 = arith.constant 0 : index
      %c0_79 = arith.constant 0 : index
      %172 = vector.load %arg19[%c0_77, %c0_78, %c0_79] : memref<2x8x512xf32, #tpu.memory_space<vmem>>, vector<2x8x512xf32>
      tpu.vector_store %arg19[%c0_77, %c0_78, %c0_79], %171 {strides = array<i32>} : memref<2x8x512xf32, #tpu.memory_space<vmem>>, vector<2x8x512xf32>,
    } else {
    }
    return
  }
  func.func @transform_0(%arg0: i32) -> (i32, i32) {
    %c0_i32 = arith.constant 0 : i32
    %c0_i32_0 = arith.constant 0 : i32
    %c0_i32_1 = arith.constant 0 : i32
    return %c0_i32, %c0_i32_0 : i32, i32
  }
  func.func @transform_1(%arg0: i32) -> (i32, i32) {
    %c0_i32 = arith.constant 0 : i32
    %c0_i32_0 = arith.constant 0 : i32
    %c0_i32_1 = arith.constant 0 : i32
    return %c0_i32, %c0_i32_0 : i32, i32
  }
  func.func @transform_2(%arg0: i32) -> (i32, i32) {
    %c0_i32 = arith.constant 0 : i32
    %c0_i32_0 = arith.constant 0 : i32
    %c0_i32_1 = arith.constant 0 : i32
    return %c0_i32, %c0_i32_0 : i32, i32
  }
  func.func @transform_3(%arg0: i32) -> (i32, i32, i32) {
    %c0_i32 = arith.constant 0 : i32
    %c0_i32_0 = arith.constant 0 : i32
    %c0_i32_1 = arith.constant 0 : i32
    return %arg0, %c0_i32, %c0_i32_0 : i32, i32, i32
  }
  func.func @transform_4(%arg0: i32) -> (i32, i32, i32) {
    %c0_i32 = arith.constant 0 : i32
    %c0_i32_0 = arith.constant 0 : i32
    %c0_i32_1 = arith.constant 0 : i32
    return %arg0, %c0_i32, %c0_i32_0 : i32, i32, i32
  }
  func.func @transform_5(%arg0: i32) -> (i32, i32, i32) {
    %c0_i32 = arith.constant 0 : i32
    %c0_i32_0 = arith.constant 0 : i32
    %c0_i32_1 = arith.constant 0 : i32
    return %arg0, %c0_i32, %c0_i32_0 : i32, i32, i32
  }
  func.func @transform_6(%arg0: i32) -> (i32, i32, i32) {
    %c0_i32 = arith.constant 0 : i32
    %c0_i32_0 = arith.constant 0 : i32
    %c0_i32_1 = arith.constant 0 : i32
    return %arg0, %c0_i32, %c0_i32_0 : i32, i32, i32
  }
  func.func @transform_7(%arg0: i32) -> (i32, i32, i32) {
    %c0_i32 = arith.constant 0 : i32
    %c0_i32_0 = arith.constant 0 : i32
    %c0_i32_1 = arith.constant 0 : i32
    return %arg0, %c0_i32, %c0_i32_0 : i32, i32, i32
  }
  func.func @transform_8(%arg0: i32) -> (i32, i32, i32) {
    %c0_i32 = arith.constant 0 : i32
    %c0_i32_0 = arith.constant 0 : i32
    %c0_i32_1 = arith.constant 0 : i32
    return %arg0, %c0_i32, %c0_i32_0 : i32, i32, i32
  }
  func.func @transform_9(%arg0: i32) -> (i32, i32, i32) {
    %c0_i32 = arith.constant 0 : i32
    %c0_i32_0 = arith.constant 0 : i32
    %c0_i32_1 = arith.constant 0 : i32
    return %arg0, %c0_i32, %c0_i32_0 : i32, i32, i32
  }
  func.func @transform_10(%arg0: i32) -> (i32, i32, i32) {
    %c0_i32 = arith.constant 0 : i32
    %c0_i32_0 = arith.constant 0 : i32
    %c0_i32_1 = arith.constant 0 : i32
    return %arg0, %c0_i32, %c0_i32_0 : i32, i32, i32
  }
  func.func @transform_11(%arg0: i32) -> (i32, i32, i32) {
    %c0_i32 = arith.constant 0 : i32
    %c0_i32_0 = arith.constant 0 : i32
    %c0_i32_1 = arith.constant 0 : i32
    return %arg0, %c0_i32, %c0_i32_0 : i32, i32, i32
  }
  func.func @transform_12(%arg0: i32) -> (i32, i32, i32) {
    %c0_i32 = arith.constant 0 : i32
    %c0_i32_0 = arith.constant 0 : i32
    %c0_i32_1 = arith.constant 0 : i32
    return %arg0, %c0_i32, %c0_i32_0 : i32, i32, i32
  }
  func.func @transform_13(%arg0: i32) -> (i32, i32, i32) {
    %c0_i32 = arith.constant 0 : i32
    %c0_i32_0 = arith.constant 0 : i32
    %c0_i32_1 = arith.constant 0 : i32
    return %arg0, %c0_i32, %c0_i32_0 : i32, i32, i32
  }
  func.func @transform_14(%arg0: i32) -> (i32, i32, i32) {
    %c0_i32 = arith.constant 0 : i32
    %c0_i32_0 = arith.constant 0 : i32
    %c0_i32_1 = arith.constant 0 : i32
    return %arg0, %c0_i32, %c0_i32_0 : i32, i32, i32
  }
  func.func @transform_15(%arg0: i32) -> (i32, i32) {
    %c0_i32 = arith.constant 0 : i32
    %c0_i32_0 = arith.constant 0 : i32
    %c0_i32_1 = arith.constant 0 : i32
    return %c0_i32, %c0_i32_0 : i32, i32
  }
  func.func @transform_16(%arg0: i32) -> (i32, i32) {
    %c0_i32 = arith.constant 0 : i32
    %c0_i32_0 = arith.constant 0 : i32
    %c0_i32_1 = arith.constant 0 : i32
    return %c0_i32, %c0_i32_0 : i32, i32
  }
  func.func @transform_17(%arg0: i32) -> (i32, i32) {
    %c0_i32 = arith.constant 0 : i32
    %c0_i32_0 = arith.constant 0 : i32
    %c0_i32_1 = arith.constant 0 : i32
    return %c0_i32, %c0_i32_0 : i32, i32
  }
  func.func @transform_18(%arg0: i32) -> (i32, i32, i32) {
    %c0_i32 = arith.constant 0 : i32
    %c0_i32_0 = arith.constant 0 : i32
    %c0_i32_1 = arith.constant 0 : i32
    %c0_i32_2 = arith.constant 0 : i32
    return %c0_i32, %c0_i32_0, %c0_i32_1 : i32, i32, i32
  }
}

</mosaic_0001>

<bundles_post_ra>
// kernel: tpu_custom_call.1
= control target key start
LH: loop header
LB: loop body
LE: loop exit
PB: predicated region body
PF: predicated region fallthrough
CT: control target
= control target key end

     0   :  { %s7455_s0 = inlined_call_operand.vmem [shape: s32[16,1], index: 0, kind: input, shape index: {}]   ;;  %s7456_s1 = inlined_call_operand.hbm [shape: f32[512,128], index: 1, kind: input, shape index: {}]   ;;  %s7457_s2 = inlined_call_operand.vmem [shape: f32[16,128], index: 2, kind: input, shape index: {}]   ;;  %s7458_s3 = inlined_call_operand.hbm [shape: f32[2,1,128], index: 3, kind: input, shape index: {}]   ;;  %s7459_s4 = inlined_call_operand.hbm [shape: f32[2,1,128], index: 4, kind: input, shape index: {}]   ;;  %s7460_s5 = inlined_call_operand.hbm [shape: bf16[2,128,384], index: 5, kind: input, shape index: {}]   ;;  %s7461_s6 = inlined_call_operand.hbm [shape: f32[2,1,384], index: 6, kind: input, shape index: {}]   ;;  %s7462_s7 = inlined_call_operand.hbm [shape: bf16[2,128,128], index: 7, kind: input, shape index: {}]   ;;  %s7463_s8 = inlined_call_operand.vmem [shape: f32[2,1,128], index: 8, kind: input, shape index: {}]   ;;  %s7464_s9 = inlined_call_operand.vmem [shape: f32[2,1,128], index: 9, kind: input, shape index: {}]   ;;  %s7465_s10 = inlined_call_operand.vmem [shape: f32[2,1,128], index: 10, kind: input, shape index: {}]   ;;  %s7466_s11 = inlined_call_operand.hbm [shape: bf16[2,128,512], index: 11, kind: input, shape index: {}]   ;;  %s7467_s12 = inlined_call_operand.vmem [shape: f32[2,1,512], index: 12, kind: input, shape index: {}]   ;;  %s7468_s13 = inlined_call_operand.hbm [shape: bf16[2,512,128], index: 13, kind: input, shape index: {}]   ;;  %s7469_s14 = inlined_call_operand.vmem [shape: f32[2,1,128], index: 14, kind: input, shape index: {}]   ;;  %s7470_s15 = inlined_call_operand.vmem [shape: f32[1,128], index: 15, kind: input, shape index: {}]   ;;  %s7471_s16 = inlined_call_operand.vmem [shape: f32[1,128], index: 16, kind: input, shape index: {}]   ;;  %s7472_s17 = inlined_call_operand.hbm [shape: bf16[128,512], index: 17, kind: input, shape index: {}]   ;;  %s7473_s18 = inlined_call_operand.hbm [shape: f32[2,8,512], index: 18, kind: output, shape index: {}]  }
   0x1   :  { %7493 = sst [smem:[#allocation31_spill]] %s7455_s0 }
   0x2   :  { %7494 = sst [smem:[#allocation32_spill]] %s7456_s1 }
   0x3   :  { %7495 = sst [smem:[#allocation33_spill]] %s7457_s2 }
   0x4   :  { %7496 = sst [smem:[#allocation34_spill]] %s7458_s3 }
   0x5   :  { %7497 = sst [smem:[#allocation35_spill]] %s7459_s4 }
   0x6   :  { %7498 = sst [smem:[#allocation36_spill]] %s7460_s5 }
   0x7   :  { %7499 = sst [smem:[#allocation37_spill]] %s7461_s6 }
   0x8   :  { %7500 = sst [smem:[#allocation38_spill]] %s7462_s7 }
   0x9   :  { %7501 = sst [smem:[#allocation39_spill]] %s7463_s8 }
   0xa   :  { %7502 = sst [smem:[#allocation40_spill]] %s7464_s9 }
   0xb   :  { %7503 = sst [smem:[#allocation41_spill]] %s7465_s10 }
   0xc   :  { %7504 = sst [smem:[#allocation42_spill]] %s7467_s12 }
   0xd   :  { %7505 = sst [smem:[#allocation43_spill]] %s7469_s14 }
   0xe   :  { %7506 = sst [smem:[#allocation44_spill]] %s7470_s15 }
   0xf   :  { %7507 = sst [smem:[#allocation45_spill]] %s7471_s16 }
  0x10   :  { %7508 = sst [smem:[#allocation46_spill]] %s7473_s18 }
  0x11   :  { %23 = vsyncpa [#allocation5], 0 }
  0x12   :  { %24 = vsyncpa [#allocation8], 0 }
  0x13   :  { %26 = vsyncpa [#allocation8 + $0x1], 0 }
  0x14   :  { %27 = vsyncpa [#allocation11], 0 }
  0x15   :  { %29 = vsyncpa [#allocation11 + $0x1], 0 }
  0x16   :  { %30 = vsyncpa [#allocation14], 0 }
  0x17   :  { %32 = vsyncpa [#allocation14 + $0x1], 0 }
  0x18   :  { %33 = vsyncpa [#allocation17], 0 }
  0x19   :  { %35 = vsyncpa [#allocation17 + $0x1], 0 }
  0x1a   :  { %36 = vsyncpa [#allocation6], 0  ;;  %s6342_s27 = smov 0   ;;  %s6344_s28 = smov 0  }
  0x1b   :  { %s6346_s29 = smov 0   ;;  %s6348_s30 = smov 0  }
  0x1c LB: > { %7509 = sst [smem:[#allocation27_spill]] %s6210_s29  ;;  %s6361_s0 = sadd.s32 4294967295, %s6214_s30   ;;  %s6214_s30 = sphi %s6348_s30, %s7558_s30   ;;  %s6210_s29 = sphi %s6346_s29, %s7560_s29   ;;  %s6206_s28 = sphi %s6344_s28, %s7562_s28   ;;  %s6202_s27 = sphi %s6342_s27, %s7561_s27  }
  0x1d   : > { %s6364_s19 = sadd.s32 1, %s6214_s30   ;;  %s112_s20 = sadd.s32 1, %s6210_s29 }
  0x1e   : > { %7510 = sst [smem:[#allocation28_spill]] %s6364_s19  ;;  %s109_s1 = ssub.s32 %s6214_s30, %s6364_s19 }
  0x1f   : > { %p110_p0 = scmp.eq.s32.totalorder %s109_s1, 0  ;;  %p119_p1 = scmp.ne.s32.totalorder %s6210_s29, %s6206_s28 }
  0x20   : > { %p120_p2 = scmp.eq.s32.totalorder %s6214_s30, 0  ;;  %p125_p3 = scmp.ne.s32.totalorder %s6206_s28, %s6202_s27 }
  0x21   : > { %s6374_s21 = scalar_select %p110_p0, %s6210_s29, %s112_s20  }
  0x22   : > { %p6376_p4 = por %p120_p2, %p119_p1  ;;  %p7475_p5 = scmp.eq.s32.totalorder %s6361_s0, 0 }
  0x23   : > { %7511 = sst [smem:[#allocation29_spill]] %s6374_s21  ;;  %p4991_p6 = scmp.ge.s32.totalorder %s6214_s30, 1 }
  0x24   : > { %p506_p7 = scmp.lt.s32.totalorder %s6214_s30, 3  ;;  %p6385_p8 = por %p7475_p5, %p125_p3 }
  0x25   : > { %s6216_s24 = smov [#allocation18]   ;;  %p5577_p13 = scmp.lt.s32.totalorder %s6214_s30, 2 }
  0x26   : > { %s7513_s2 = scalar_select %p6385_p8, 1, 0 }
  0x27   : > { %p6390_p10 = pnand %p4991_p6, %p506_p7  ;;  %s543_s25 = sshll.u32 %s6216_s24, 4  ;;  %s544_s25 = int_to_ptr.vmem [resolvable:$true] %s543_s25 }
  0x28   : > { %7514 = sst [smem:[#allocation30_spill]] %s7513_s2  ;;  %s6404_s27 = sand.u32 1, %s6214_s30  }
  0x29   : > { %s7515_s23 = scalar_select %p6390_p10, 1, 0 }
  0x2a   : > { %p5546_p11 = pneg %p6390_p10  ;;  %s6407_s1 = sand.u32 1, %s6210_s29  }
  0x2b   : > { %p6411_p0 = pnand %p5577_p13, %p6376_p4  ;;  %s5895_s24 = scalar_lea.vmem %s544_s25, 4096 }
  0x2c   : > { %p6398_p12 = pnand %p5546_p11, %p7475_p5  ;;  %p5896_p2 = scmp.ne.s32.totalorder %s544_s25, %s5895_s24 }
  0x2d   : > { %p5903_p7 = scmp.lt.s32.totalorder %s544_s25, %s544_s25  ;;  %p5904_p11 = scmp.lt.s32.totalorder %s5895_s24, %s5895_s24 }
  0x2e   : > { %s7516_s26 = scalar_select %p6398_p12, 1, 0 }
  0x2f   : > { %p7481_p1 = pneg %p6398_p12  ;;  %p5905_p9 = por %p5904_p11, %p5903_p7 }
  0x31   : > { %p5898_p3 = pnand %p5896_p2, %p7481_p1 }
  0x33   : > { %p5899_p6 = pneg %p5898_p3 }
  0x35   : > { %p5906_p5 = pnand %p5905_p9, %p5899_p6 }
  0x37   : > { %5909 = shalt.err (!%p5906_p5)
}
  0x38   : > { %s7483_s21 = smov 256   ;;  %s7484_s22 = smov 16  }
  0x39   : > { %5552 = dma.hbm_to_vmem [thread:$0]  (!%p6398_p12), %s7472_s17, 4096, %s544_s25, [#allocation17], %s7483_s21, %s7483_s21, %s7484_s22  }
  0x3a   : > { %s4995_s18 = sshll.u32 %s6214_s30, 4  ;;  %s7518_s3 = sld [smem:[#allocation34_spill]] }
  0x3b   : > { %s560_s14 = scalar_lea.vmem [#allocation7], %s6407_s1  ;;  %s7519_s4 = sld [smem:[#allocation35_spill]] }
  0x3c   : > { %s567_s12 = sshll.u32 %s560_s14, 4  ;;  %s7488_s2 = scalar_lea.sflag [#allocation8], %s6404_s27  ;;  %s568_s12 = int_to_ptr.vmem [resolvable:$true] %s567_s12 }
  0x3d   : > { %p6445_p5 = pneg %p6411_p0 }
  0x40   : > { %s6432_s15 = scalar_lea.hbm %s7518_s3, %s4995_s18  ;;  %s5915_s25 = scalar_lea.hbm %s7518_s3, 32 }
  0x41   : > { %s6438_s8 = scalar_lea.hbm %s7519_s4, %s4995_s18  ;;  %s5910_s29 = scalar_lea.hbm %s6432_s15, 16 }
  0x42   : > { %p5911_p4 = scmp.ne.s32.totalorder %s6432_s15, %s5910_s29  ;;  %p5916_p2 = scmp.lt.s32.totalorder %s6432_s15, %s7518_s3 }
  0x43   : > { %p5917_p3 = scmp.lt.s32.totalorder %s5915_s25, %s5910_s29 }
  0x44   : > { %p5913_p9 = pnand %p6445_p5, %p5911_p4 }
  0x45   : > { %p5918_p6 = por %p5917_p3, %p5916_p2 }
  0x46   : > { %p5914_p13 = pneg %p5913_p9 }
  0x48   : > { %p5919_p7 = pnand %p5918_p6, %p5914_p13 }
  0x4a   : > { %5922 = shalt.err (!%p5919_p7)
}
  0x4b   : > { %s5923_s10 = scalar_lea.vmem %s568_s12, 16  ;;  %s6219_s18 = smov [#allocation7]  }
  0x4c   : > { %p5924_p11 = scmp.ne.s32.totalorder %s568_s12, %s5923_s10  ;;  %s5928_s21 = sshll.u32 %s6219_s18, 4  ;;  %s5929_s21 = int_to_ptr.vmem [resolvable:$false] %s5928_s21 }
  0x4d   : > { %s5930_s22 = scalar_lea.vmem %s5929_s21, 32  ;;  %p5931_p4 = scmp.lt.s32.totalorder %s568_s12, %s5929_s21 }
  0x4e   : > { %p5926_p1 = pnand %p5924_p11, %p6445_p5  ;;  %p5932_p9 = scmp.lt.s32.totalorder %s5930_s22, %s5923_s10 }
  0x50   : > { %p5927_p8 = pneg %p5926_p1  ;;  %p5933_p10 = por %p5932_p9, %p5931_p4 }
  0x52   : > { %p5934_p12 = pnand %p5933_p10, %p5927_p8 }
  0x54   : > { %5937 = shalt.err (!%p5934_p12)
}
  0x55   : > { %5556 = dma.hbm_to_vmem [thread:$0]  (!%p6411_p0), %s6432_s15, 16, %s568_s12, %s7488_s2  }
  0x56   : > { %s5514_s29 = smul.u32 192, %s6407_s1  ;;  %s7521_s5 = sld [smem:[#allocation36_spill]] }
  0x57   : > { %s5515_s16 = smul.u32 3072, %s6214_s30  ;;  %s4999_s9 = sshll.u32 %s6407_s1, 6 }
  0x58   : > { %s595_s22 = scalar_lea.vmem [#allocation10], %s5514_s29  ;;  %s7492_s10 = scalar_lea.sflag [#allocation11], %s6404_s27 }
  0x59   : > { %s602_s24 = sshll.u32 %s595_s22, 4  ;;  %s6472_s24 = int_to_ptr.vmem [resolvable:$true] %s602_s24 }
  0x5c   : > { %s6470_s21 = scalar_lea.hbm %s7521_s5, %s5515_s16  ;;  %s5943_s14 = scalar_lea.hbm %s7521_s5, 6144 }
  0x5d   : > { %s5938_s18 = scalar_lea.hbm %s6470_s21, 3072  ;;  %p5944_p1 = scmp.lt.s32.totalorder %s6470_s21, %s7521_s5 }
  0x5e   : > { %p5939_p8 = scmp.ne.s32.totalorder %s6470_s21, %s5938_s18  ;;  %p5945_p13 = scmp.lt.s32.totalorder %s5943_s14, %s5938_s18 }
  0x60   : > { %p5941_p10 = pnand %p5939_p8, %p6445_p5  ;;  %p5946_p2 = por %p5945_p13, %p5944_p1 }
  0x62   : > { %p5942_p12 = pneg %p5941_p10 }
  0x64   : > { %p5947_p3 = pnand %p5946_p2, %p5942_p12 }
  0x66   : > { %5950 = shalt.err (!%p5947_p3)
}
  0x67   : > { %s5951_s29 = scalar_lea.vmem %s6472_s24, 3072  ;;  %s6220_s22 = smov [#allocation10]  }
  0x68   : > { %p5952_p6 = scmp.ne.s32.totalorder %s6472_s24, %s5951_s29  ;;  %s5956_s12 = sshll.u32 %s6220_s22, 4  ;;  %s5957_s12 = int_to_ptr.vmem [resolvable:$false] %s5956_s12 }
  0x69   : > { %s5958_s15 = scalar_lea.vmem %s5957_s12, 6144  ;;  %p5959_p4 = scmp.lt.s32.totalorder %s6472_s24, %s5957_s12 }
  0x6a   : > { %p5954_p7 = pnand %p5952_p6, %p6445_p5  ;;  %p5960_p9 = scmp.lt.s32.totalorder %s5958_s15, %s5951_s29 }
  0x6c   : > { %p5955_p11 = pneg %p5954_p7  ;;  %p5961_p8 = por %p5960_p9, %p5959_p4 }
  0x6e   : > { %p5962_p10 = pnand %p5961_p8, %p5955_p11 }
  0x70   : > { %5965 = shalt.err (!%p5962_p10)
}
  0x71   : > { %s6221_s18 = smov 192   ;;  %s6222_s14 = smov 12  }
  0x72   : > { %5562 = dma.hbm_to_vmem [thread:$0]  (!%p6411_p0), %s6470_s21, 3072, %s6472_s24, %s7492_s10, %s6221_s18, %s6221_s18, %s6222_s14  }
  0x73   : > { %s5205_s16 = sshll.u32 %s6214_s30, 10  ;;  %s7522_s7 = sld [smem:[#allocation38_spill]] }
  0x74   : > { %s635_s12 = scalar_lea.vmem [#allocation13], %s4999_s9  ;;  %s7491_s2 = scalar_lea.sflag [#allocation14], %s6404_s27 }
  0x75   : > { %s642_s15 = sshll.u32 %s635_s12, 4  ;;  %s6506_s15 = int_to_ptr.vmem [resolvable:$true] %s642_s15 }
  0x79   : > { %s6502_s29 = scalar_lea.hbm %s7522_s7, %s5205_s16  ;;  %s5971_s18 = scalar_lea.hbm %s7522_s7, 2048 }
  0x7a   : > { %s5966_s3 = scalar_lea.hbm %s6502_s29, 1024  ;;  %p5972_p2 = scmp.lt.s32.totalorder %s6502_s29, %s7522_s7 }
  0x7b   : > { %p5967_p12 = scmp.ne.s32.totalorder %s6502_s29, %s5966_s3  ;;  %p5973_p3 = scmp.lt.s32.totalorder %s5971_s18, %s5966_s3 }
  0x7d   : > { %p5969_p1 = pnand %p5967_p12, %p6445_p5  ;;  %p5974_p6 = por %p5973_p3, %p5972_p2 }
  0x7f   : > { %p5970_p13 = pneg %p5969_p1 }
  0x81   : > { %p5975_p7 = pnand %p5974_p6, %p5970_p13 }
  0x83   : > { %5978 = shalt.err (!%p5975_p7)
}
  0x84   : > { %s5979_s9 = scalar_lea.vmem %s6506_s15, 1024  ;;  %s6223_s25 = smov [#allocation13]  }
  0x85   : > { %p5980_p11 = scmp.ne.s32.totalorder %s6506_s15, %s5979_s9  ;;  %s5984_s22 = sshll.u32 %s6223_s25, 4  ;;  %s5985_s22 = int_to_ptr.vmem [resolvable:$false] %s5984_s22 }
  0x86   : > { %s5986_s12 = scalar_lea.vmem %s5985_s22, 2048  ;;  %p5987_p8 = scmp.lt.s32.totalorder %s6506_s15, %s5985_s22 }
  0x87   : > { %p5982_p4 = pnand %p5980_p11, %p6445_p5  ;;  %p5988_p10 = scmp.lt.s32.totalorder %s5986_s12, %s5979_s9 }
  0x89   : > { %p5983_p9 = pneg %p5982_p4  ;;  %p5989_p12 = por %p5988_p10, %p5987_p8 }
  0x8b   : > { %p5990_p1 = pnand %p5989_p12, %p5983_p9 }
  0x8d   : > { %5993 = shalt.err (!%p5990_p1)
}
  0x8e   : > { %s7489_s3 = smov 64   ;;  %s7490_s21 = smov 4  }
  0x8f   : > { %5568 = dma.hbm_to_vmem [thread:$0]  (!%p6411_p0), %s6502_s29, 1024, %s6506_s15, %s7491_s2, %s7489_s3, %s7489_s3, %s7490_s21  }
  0x90   : > { %s6226_s24 = smov [#allocation4]   ;;  %p7523_p2 = scmp.ne.s32.totalorder %s7516_s26, 0 }
  0x91   : > { %s521_s18 = sshll.u32 %s6226_s24, 4  ;;  %s522_s18 = int_to_ptr.vmem [resolvable:$true] %s521_s18 }
  0x92   : > { %s6005_s14 = scalar_lea.vmem %s522_s18, 8192  ;;  %p7524_p3 = pneg %p7523_p2 }
  0x93   : > { %p6006_p13 = scmp.ne.s32.totalorder %s522_s18, %s6005_s14  ;;  %p6013_p11 = scmp.lt.s32.totalorder %s522_s18, %s522_s18 }
  0x94   : > { %p6014_p4 = scmp.lt.s32.totalorder %s6005_s14, %s6005_s14 }
  0x95   : > { %p6008_p6 = pnand %p6006_p13, %p7524_p3 }
  0x96   : > { %p6015_p9 = por %p6014_p4, %p6013_p11 }
  0x97   : > { %p6009_p7 = pneg %p6008_p6 }
  0x99   : > { %p6016_p8 = pnand %p6015_p9, %p6009_p7 }
  0x9b   : > { %6019 = shalt.err (!%p6016_p8)
}
  0x9c   : > { %s6227_s16 = smov 128   ;;  %s6228_s29 = smov 8  }
  0x9d   : > { %s7525_s25 = sld [smem:[#allocation32_spill]]  ;;  %s5516_s22 = smul.u32 3, %s6407_s1 }
  0x9e   : > { %s577_s12 = scalar_lea.vmem [#allocation9], %s6407_s1  ;;  %s5517_s14 = smul.u32 48, %s6214_s30 }
  0x9f   : > { %s584_s24 = sshll.u32 %s577_s12, 4  ;;  %s6020_s3 = scalar_lea.hbm %s6438_s8, 16  ;;  %s585_s24 = int_to_ptr.vmem [resolvable:$true] %s584_s24 }
  0xa0   : > { %p6021_p10 = scmp.ne.s32.totalorder %s6438_s8, %s6020_s3  ;;  %s6025_s10 = scalar_lea.hbm %s7519_s4, 32 }
  0xa1   : > { %p6026_p13 = scmp.lt.s32.totalorder %s6438_s8, %s7519_s4  ;;  %p6027_p3 = scmp.lt.s32.totalorder %s6025_s10, %s6020_s3 }
  0xa2   : > { %p6023_p12 = pnand %p6021_p10, %p6445_p5 }
  0xa3   : > { %5549 = dma.hbm_to_vmem [thread:$0]  (!%p7523_p2), %s7525_s25, 8192, %s522_s18, [#allocation5], %s6227_s16, %s6227_s16, %s6228_s29  }
  0xa4   : > { %p6024_p1 = pneg %p6023_p12  ;;  %p6028_p2 = por %p6027_p3, %p6026_p13 }
  0xa6   : > { %p6029_p6 = pnand %p6028_p2, %p6024_p1 }
  0xa8   : > { %6032 = shalt.err (!%p6029_p6)
}
  0xa9   : > { %s6033_s18 = scalar_lea.vmem %s585_s24, 16  ;;  %s6229_s16 = smov [#allocation9]  }
  0xaa   : > { %p6034_p7 = scmp.ne.s32.totalorder %s585_s24, %s6033_s18  ;;  %s6038_s29 = sshll.u32 %s6229_s16, 4  ;;  %s6039_s29 = int_to_ptr.vmem [resolvable:$false] %s6038_s29 }
  0xab   : > { %s6040_s15 = scalar_lea.vmem %s6039_s29, 32  ;;  %p6041_p9 = scmp.lt.s32.totalorder %s585_s24, %s6039_s29 }
  0xac   : > { %p6036_p11 = pnand %p6034_p7, %p6445_p5  ;;  %p6042_p8 = scmp.lt.s32.totalorder %s6040_s15, %s6033_s18 }
  0xae   : > { %p6037_p4 = pneg %p6036_p11  ;;  %p6043_p10 = por %p6042_p8, %p6041_p9 }
  0xb0   : > { %p6044_p12 = pnand %p6043_p10, %p6037_p4 }
  0xb2   : > { %6047 = shalt.err (!%p6044_p12)
}
  0xb3   : > { %s7526_s5 = scalar_lea.sflag [#allocation8], %s6404_s27  ;;  %s7527_s6 = sld [smem:[#allocation37_spill]] }
  0xb4   : > { %5559 = dma.hbm_to_vmem [thread:$0]  (!%p6411_p0), %s6438_s8, 16, %s585_s24, %s7526_s5  }
  0xb5   : > { %s616_s21 = scalar_lea.vmem [#allocation12], %s5516_s22  ;;  %s5002_s25 = sshll.u32 %s6407_s1, 8 }
  0xb6   : > { %s624_s9 = sshll.u32 %s616_s21, 4  ;;  %s625_s9 = int_to_ptr.vmem [resolvable:$true] %s624_s9 }
  0xb9   : > { %s6566_s3 = scalar_lea.hbm %s7527_s6, %s5517_s14  ;;  %s6053_s24 = scalar_lea.hbm %s7527_s6, 96 }
  0xba   : > { %s6048_s12 = scalar_lea.hbm %s6566_s3, 48  ;;  %p6054_p2 = scmp.lt.s32.totalorder %s6566_s3, %s7527_s6 }
  0xbb   : > { %p6049_p1 = scmp.ne.s32.totalorder %s6566_s3, %s6048_s12  ;;  %p6055_p6 = scmp.lt.s32.totalorder %s6053_s24, %s6048_s12 }
  0xbd   : > { %p6051_p13 = pnand %p6049_p1, %p6445_p5  ;;  %p6056_p7 = por %p6055_p6, %p6054_p2 }
  0xbf   : > { %p6052_p3 = pneg %p6051_p13 }
  0xc1   : > { %p6057_p11 = pnand %p6056_p7, %p6052_p3 }
  0xc3   : > { %6060 = shalt.err (!%p6057_p11)
}
  0xc4   : > { %s6061_s22 = scalar_lea.vmem %s625_s9, 48  ;;  %s6230_s16 = smov [#allocation12]  }
  0xc5   : > { %p6062_p4 = scmp.ne.s32.totalorder %s625_s9, %s6061_s22  ;;  %s6066_s29 = sshll.u32 %s6230_s16, 4  ;;  %s6067_s29 = int_to_ptr.vmem [resolvable:$false] %s6066_s29 }
  0xc6   : > { %s6068_s15 = scalar_lea.vmem %s6067_s29, 96  ;;  %p6069_p10 = scmp.lt.s32.totalorder %s625_s9, %s6067_s29 }
  0xc7   : > { %p6064_p9 = pnand %p6062_p4, %p6445_p5  ;;  %p6070_p12 = scmp.lt.s32.totalorder %s6068_s15, %s6061_s22 }
  0xc9   : > { %p6065_p8 = pneg %p6064_p9  ;;  %p6071_p1 = por %p6070_p12, %p6069_p10 }
  0xcb   : > { %p6072_p13 = pnand %p6071_p1, %p6065_p8 }
  0xcd   : > { %6075 = shalt.err (!%p6072_p13)
}
  0xce   : > { %s7528_s5 = scalar_lea.sflag [#allocation11], %s6404_s27  ;;  %s5206_s2 = sshll.u32 %s6214_s30, 12 }
  0xcf   : > { %5565 = dma.hbm_to_vmem [thread:$0]  (!%p6411_p0), %s6566_s3, 48, %s625_s9, %s7528_s5  }
  0xd0   : > { %s6595_s12 = scalar_lea.hbm %s7466_s11, %s5206_s2  ;;  %s674_s26 = scalar_lea.vmem [#allocation15], %s5002_s25 }
  0xd1   : > { %s681_s8 = sshll.u32 %s674_s26, 4  ;;  %s6076_s24 = scalar_lea.hbm %s6595_s12, 4096  ;;  %s682_s8 = int_to_ptr.vmem [resolvable:$true] %s681_s8 }
  0xd2   : > { %p6077_p3 = scmp.ne.s32.totalorder %s6595_s12, %s6076_s24  ;;  %s6081_s18 = scalar_lea.hbm %s7466_s11, 8192 }
  0xd3   : > { %p6082_p7 = scmp.lt.s32.totalorder %s6595_s12, %s7466_s11  ;;  %p6083_p11 = scmp.lt.s32.totalorder %s6081_s18, %s6076_s24 }
  0xd4   : > { %p6079_p2 = pnand %p6077_p3, %p6445_p5 }
  0xd5   : > { %p6084_p4 = por %p6083_p11, %p6082_p7 }
  0xd6   : > { %p6080_p6 = pneg %p6079_p2 }
  0xd8   : > { %p6085_p9 = pnand %p6084_p4, %p6080_p6 }
  0xda   : > { %6088 = shalt.err (!%p6085_p9)
}
  0xdb   : > { %s6089_s16 = scalar_lea.vmem %s682_s8, 4096  ;;  %s6231_s29 = smov [#allocation15]  }
  0xdc   : > { %p6090_p8 = scmp.ne.s32.totalorder %s682_s8, %s6089_s16  ;;  %s6094_s15 = sshll.u32 %s6231_s29, 4  ;;  %s6095_s15 = int_to_ptr.vmem [resolvable:$false] %s6094_s15 }
  0xdd   : > { %s6096_s5 = scalar_lea.vmem %s6095_s15, 8192  ;;  %p6097_p1 = scmp.lt.s32.totalorder %s682_s8, %s6095_s15 }
  0xde   : > { %p6092_p10 = pnand %p6090_p8, %p6445_p5  ;;  %p6098_p13 = scmp.lt.s32.totalorder %s6096_s5, %s6089_s16 }
  0xe0   : > { %p6093_p12 = pneg %p6092_p10  ;;  %p6099_p3 = por %p6098_p13, %p6097_p1 }
  0xe2   : > { %p6100_p2 = pnand %p6099_p3, %p6093_p12 }
  0xe4   : > { %6103 = shalt.err (!%p6100_p2)
}
  0xe5   : > { %s7529_s10 = smov 16   ;;  %s7530_s21 = smov 256  }
  0xe6   : > { %s7531_s26 = scalar_lea.sflag [#allocation14], %s6404_s27  ;;  %s6625_s9 = scalar_lea.hbm %s7468_s13, %s5206_s2 }
  0xe7   : > { %5571 = dma.hbm_to_vmem [thread:$0]  (!%p6411_p0), %s6595_s12, 4096, %s682_s8, %s7531_s26, %s7530_s21, %s7530_s21, %s7529_s10  }
  0xe8   : > { %s702_s18 = scalar_lea.vmem [#allocation16], %s5002_s25  ;;  %s699_s22 = scalar_lea.sflag [#allocation17], %s6404_s27 }
  0xe9   : > { %s709_s14 = sshll.u32 %s702_s18, 4  ;;  %s6104_s16 = scalar_lea.hbm %s6625_s9, 4096  ;;  %s6629_s14 = int_to_ptr.vmem [resolvable:$true] %s709_s14 }
  0xea   : > { %p6105_p6 = scmp.ne.s32.totalorder %s6625_s9, %s6104_s16  ;;  %s6109_s8 = scalar_lea.hbm %s7468_s13, 8192 }
  0xeb   : > { %p6110_p4 = scmp.lt.s32.totalorder %s6625_s9, %s7468_s13  ;;  %p6111_p9 = scmp.lt.s32.totalorder %s6109_s8, %s6104_s16 }
  0xec   : > { %p6107_p7 = pnand %p6105_p6, %p6445_p5 }
  0xed   : > { %p6112_p8 = por %p6111_p9, %p6110_p4 }
  0xee   : > { %p6108_p11 = pneg %p6107_p7 }
  0xf0   : > { %p6113_p10 = pnand %p6112_p8, %p6108_p11 }
  0xf2   : > { %6116 = shalt.err (!%p6113_p10)
}
  0xf3   : > { %s6117_s27 = scalar_lea.vmem %s6629_s14, 4096  ;;  %s6232_s1 = smov [#allocation16]  }
  0xf4   : > { %p6118_p12 = scmp.ne.s32.totalorder %s6629_s14, %s6117_s27  ;;  %s6122_s25 = sshll.u32 %s6232_s1, 4  ;;  %s6123_s25 = int_to_ptr.vmem [resolvable:$false] %s6122_s25 }
  0xf5   : > { %s6124_s15 = scalar_lea.vmem %s6123_s25, 8192  ;;  %p6125_p3 = scmp.lt.s32.totalorder %s6629_s14, %s6123_s25 }
  0xf6   : > { %p6120_p1 = pnand %p6118_p12, %p6445_p5  ;;  %p6126_p2 = scmp.lt.s32.totalorder %s6124_s15, %s6117_s27 }
  0xf8   : > { %p6121_p13 = pneg %p6120_p1  ;;  %p6127_p6 = por %p6126_p2, %p6125_p3 }
  0xfa   : > { %p6128_p7 = pnand %p6127_p6, %p6121_p13 }
  0xfc   : > { %6131 = shalt.err (!%p6128_p7)
}
  0xfd   : > { %s7532_s5 = smov 4   ;;  %s7533_s10 = smov 64  }
  0xfe   : > { %5574 = dma.hbm_to_vmem [thread:$0]  (!%p6411_p0), %s6625_s9, 4096, %s6629_s14, %s699_s22, %s7533_s10, %s7533_s10, %s7532_s5  }
  0xff   : > { %p7534_p5 = scmp.ne.s32.totalorder %s7515_s23, 0 }
 0x100   : > { %p7535_p11 = scmp.eq.s32.totalorder (!%p7534_p5), %s6361_s0, 0 }
 0x101   : > { %727 = sbr.rel (%p7534_p5) target bundleno = 3714 (0xe82), region = 92 }
 0x106   : > { %6173 = dma.done.wait (%p7535_p11), [#allocation5], 8192   ;;  %p7536_p4 = pmov %p7535_p11 }
 0x107   : > { %s7537_s19 = sld [smem:[#allocation30_spill]]  ;;  %s733_s21 = sand.u32 1, %s6361_s0  }
 0x108   : > { %6175 = vsyncadd (%p7536_p4), [#allocation5], 4294959104  ;;  %s6663_s20 = sand.u32 1, %s6206_s28   ;;  %s734_s26 = scalar_lea.sflag [#allocation8], %s733_s21 }
 0x10d   : > { %p7538_p9 = scmp.ne.s32.totalorder %s7537_s19, 0 }
 0x10f   : > { %6177 = dma.done.wait (%p7538_p9), %s734_s26, 32  }
 0x110   : > { %6179 = vsyncadd (%p7538_p9), %s734_s26, 4294967264  ;;  %s5518_s23 = smul.u32 192, %s6663_s20  ;;  %s750_s9 = scalar_lea.sflag [#allocation11], %s733_s21 }
 0x112   : > { %s6672_s18 = scalar_lea.vmem [#allocation10], %s5518_s23 }
 0x113   : > { %6181 = dma.done.wait (%p7538_p9), %s750_s9, 3120  }
 0x114   : > { %6183 = vsyncadd (%p7538_p9), %s750_s9, 4294964176  ;;  %s5519_s14 = smul.u32 3, %s6663_s20  ;;  %s5010_s22 = sshll.u32 %s6663_s20, 6 }
 0x115   : > { %s768_s30 = scalar_lea.sflag [#allocation14], %s733_s21  ;;  %s6682_s12 = scalar_lea.vmem [#allocation13], %s5010_s22 }
 0x116   : > { %s6680_s16 = scalar_lea.vmem [#allocation12], %s5519_s14 }
 0x117   : > { %6185 = dma.done.wait (%p7538_p9), %s768_s30, 5120  }
 0x118   : > { %6187 = vsyncadd (%p7538_p9), %s768_s30, 4294962176  ;;  %s5011_s8 = sshll.u32 %s6663_s20, 8  ;;  %s786_s29 = scalar_lea.sflag [#allocation17], %s733_s21 }
 0x119   : > { %s6689_s2 = scalar_lea.vmem [#allocation15], %s5011_s8  ;;  %s6691_s27 = scalar_lea.vmem [#allocation16], %s5011_s8 }
 0x11a   : > { %6189 = dma.done.wait (%p7538_p9), %s786_s29, 4096  }
 0x11b   : > { %6191 = vsyncadd (%p7538_p9), %s786_s29, 4294963200  ;;  %p7539_p0 = pmov %p7536_p4 }
 0x11d   : > { %6193 = dma.done.wait (%p7539_p0), [#allocation17], 4096   ;;  %p7540_p8 = pmov %p7539_p0 }
 0x11e   : > { %p885_p10 = scmp.lt.s32.totalorder %s6361_s0, 1  ;;  %s7541_s5 = sld [smem:[#allocation39_spill]] }
 0x11f   : > { %6195 = vsyncadd (%p7540_p8), [#allocation17], 4294963200  ;;  %s7542_s26 = sld [smem:[#allocation40_spill]]  ;;  %p7546_p12 = scmp.ne.s32.totalorder %s6361_s0, 0 }
 0x120   : > { %s6703_s1 = scalar_select %p885_p10, %s6361_s0, 1 }
 0x121   : > { %s7543_s22 = sld [smem:[#allocation41_spill]] }
 0x122   : > { %s5014_s8 = sshll.u32 %s6703_s1, 2  ;;  %s7544_s24 = sld [smem:[#allocation42_spill]] }
 0x123   : > { %s7545_s6 = sld [smem:[#allocation43_spill]] }
 0x124   : > { %s887_s10 = scalar_lea.vmem %s7541_s5, %s6703_s1  ;;  %s7547_s21 = sld [smem:[#allocation31_spill]] (!%p7546_p12) }
 0x125   : > { %s890_s23 = scalar_lea.vmem %s7542_s26, %s6703_s1  ;;  %905 = sbr.rel (%p7546_p12) target bundleno = 633 (0x279), region = 132 }
 0x126   : > { %s7548_s9 = sld [smem:[#allocation33_spill]] (!%p7546_p12) }
 0x127   : > { %s893_s30 = scalar_lea.vmem %s7543_s22, %s6703_s1 }
 0x128   : > { %s6721_s4 = scalar_lea.vmem %s7544_s24, %s5014_s8 }
 0x129   : > { %s900_s7 = scalar_lea.vmem %s7545_s6, %s6703_s1 }
 0x12a   : > { %v911_v0 = vld [vmem:[%s7547_s21] sm:$0xff]  ;;  %v906_v2 = vlaneseq  ;;  %v6233_v3 = vmov 0   ;;  %v973_v7 = vld [vmem:[#allocation4 + $0xf0] sm:$0xff]  ;;  %v912_v12 = vld [vmem:[%s7547_s21 + $0x8] sm:$0xff]  ;;  %vm1164_vm0 = vcmask 64512  }
 0x12b   : > { %v974_v1 = vld [vmem:[#allocation4 + $0xf8] sm:$0xff]  ;;  %5638 = vset.pattern.permute.xlu0 %v6233_v3  ;;  %v1005_v8 = vld [vmem:[#allocation4 + $0x1f0] sm:$0xff]  ;;  %v972_v14 = vld [vmem:[#allocation4 + $0xe8] sm:$0xff]  ;;  %v6234_v19 = vmov -1e+30  }
 0x12c   : > { %5208 = vmatprep.subr.mxu0 %v974_v1  ;;  %v1006_v4 = vld [vmem:[#allocation4 + $0x1f8] sm:$0xff]  ;;  %914 = vperm.xlu0 %5638, %v911_v0   ;;  %v957_v9 = vld [vmem:[#allocation4 + $0x70] sm:$0xff]  ;;  %v6732_v10 = vand.u32 127, %v906_v2  ;;  %v1161_v11 = vshrl.u32 %v906_v2, 7  ;;  %v1004_v15 = vld [vmem:[#allocation4 + $0x1e8] sm:$0xff] }
 0x12d   : > { %v958_v5 = vld [vmem:[#allocation4 + $0x78] sm:$0xff]  ;;  %5246 = vmatprep.subr.mxu1 %v1006_v4  ;;  %v989_v13 = vld [vmem:[#allocation4 + $0x170] sm:$0xff]  ;;  %v956_v16 = vld [vmem:[#allocation4 + $0x68] sm:$0xff] }
 0x12e   : > { %v990_v6 = vld [vmem:[#allocation4 + $0x178] sm:$0xff]  ;;  %5209 = vmatpush3.msra.mxu0 %v958_v5  ;;  %vm1162_vm1 = vcmp.le.s32.totalorder %v6732_v10, %v1161_v11  ;;  %v988_v17 = vld [vmem:[#allocation4 + $0x168] sm:$0xff]  ;;  %v971_v18 = vld [vmem:[#allocation4 + $0xe0] sm:$0xff]  ;;  %v909_v11 = vadd.s32 256, %v6732_v10 }
 0x12f   : > { %5247 = vmatpush3.msra.mxu1 %v990_v6  ;;  %5210 = vmatprep.subr.mxu0 %v973_v7  ;;  %v1163_v20 = vsel %vm1162_vm1, 0.0, %v6234_v19  ;;  %v1003_v21 = vld [vmem:[#allocation4 + $0x1e0] sm:$0xff]  ;;  %v970_v24 = vld [vmem:[#allocation4 + $0xd8] sm:$0xff]  ;;  %v969_v28 = vld [vmem:[#allocation4 + $0xd0] sm:$0xff] }
 0x130   : > { %5248 = vmatprep.subr.mxu1 %v1005_v8  ;;  %5211 = vmatpush3.msra.mxu0 %v957_v9  ;;  %v955_v22 = vld [vmem:[#allocation4 + $0x60] sm:$0xff]  ;;  %1165 = vst.msk [vmem:[#allocation3] sm:$0xff] %vm1164_vm0, %v1163_v20  ;;  %v1002_v25 = vld [vmem:[#allocation4 + $0x1d8] sm:$0xff]  ;;  %v1001_v29 = vld [vmem:[#allocation4 + $0x1d0] sm:$0xff]  ;;  %v908_v8 = vadd.s32 128, %v6732_v10  ;;  %v910_v9 = vadd.s32 384, %v6732_v10 }
 0x131   : > { %5249 = vmatpush3.msra.mxu1 %v989_v13  ;;  %917 = vperm.xlu0 %5638, %v912_v12   ;;  %v987_v23 = vld [vmem:[#allocation4 + $0x160] sm:$0xff]  ;;  %v954_v26 = vld [vmem:[#allocation4 + $0x58] sm:$0xff]  ;;  %v953_v30 = vld [vmem:[#allocation4 + $0x50] sm:$0xff]  ;;  %v6235_v13 = vmov 1.0  }
 0x132   : > { %5212 = vmatprep.subr.mxu0 %v972_v14  ;;  %5250 = vmatprep.subr.mxu1 %v1004_v15  ;;  %v986_v27 = vld [vmem:[#allocation4 + $0x158] sm:$0xff]  ;;  %v985_v31 = vld [vmem:[#allocation4 + $0x150] sm:$0xff]  ;;  %v968_v32 = vld [vmem:[#allocation4 + $0xc8] sm:$0xff] }
 0x133   : > { %5213 = vmatpush3.msra.mxu0 %v956_v16  ;;  %5251 = vmatpush3.msra.mxu1 %v988_v17  ;;  %v1000_v33 = vld [vmem:[#allocation4 + $0x1c8] sm:$0xff]  ;;  %v967_v36 = vld [vmem:[#allocation4 + $0xc0] sm:$0xff]  ;;  %v966_v40 = vld [vmem:[#allocation4 + $0xb8] sm:$0xff] }
 0x134   : > { %5214 = vmatprep.subr.mxu0 %v971_v18  ;;  %5252 = vmatprep.subr.mxu1 %v1003_v21  ;;  %v952_v34 = vld [vmem:[#allocation4 + $0x48] sm:$0xff]  ;;  %v999_v37 = vld [vmem:[#allocation4 + $0x1c0] sm:$0xff]  ;;  %v998_v41 = vld [vmem:[#allocation4 + $0x1b8] sm:$0xff] }
 0x135   : > { %5215 = vmatpush3.msra.mxu0 %v955_v22  ;;  %5253 = vmatpush3.msra.mxu1 %v987_v23  ;;  %v984_v35 = vld [vmem:[#allocation4 + $0x148] sm:$0xff]  ;;  %v951_v38 = vld [vmem:[#allocation4 + $0x40] sm:$0xff]  ;;  %v950_v42 = vld [vmem:[#allocation4 + $0x38] sm:$0xff] }
 0x136   : > { %5216 = vmatprep.subr.mxu0 %v970_v24  ;;  %5254 = vmatprep.subr.mxu1 %v1002_v25  ;;  %v983_v39 = vld [vmem:[#allocation4 + $0x140] sm:$0xff]  ;;  %v982_v43 = vld [vmem:[#allocation4 + $0x138] sm:$0xff]  ;;  %v965_v44 = vld [vmem:[#allocation4 + $0xb0] sm:$0xff] }
 0x137   : > { %5217 = vmatpush3.msra.mxu0 %v954_v26  ;;  %5255 = vmatpush3.msra.mxu1 %v986_v27  ;;  %v997_v45 = vld [vmem:[#allocation4 + $0x1b0] sm:$0xff]  ;;  %v964_v48 = vld [vmem:[#allocation4 + $0xa8] sm:$0xff]  ;;  %v963_v52 = vld [vmem:[#allocation4 + $0xa0] sm:$0xff] }
 0x138   : > { %5218 = vmatprep.subr.mxu0 %v969_v28  ;;  %5256 = vmatprep.subr.mxu1 %v1001_v29  ;;  %v949_v46 = vld [vmem:[#allocation4 + $0x30] sm:$0xff]  ;;  %v996_v49 = vld [vmem:[#allocation4 + $0x1a8] sm:$0xff]  ;;  %v995_v53 = vld [vmem:[#allocation4 + $0x1a0] sm:$0xff] }
 0x139   : > { %5219 = vmatpush3.msra.mxu0 %v953_v30  ;;  %5257 = vmatpush3.msra.mxu1 %v985_v31  ;;  %v981_v47 = vld [vmem:[#allocation4 + $0x130] sm:$0xff]  ;;  %v948_v50 = vld [vmem:[#allocation4 + $0x28] sm:$0xff]  ;;  %v947_v54 = vld [vmem:[#allocation4 + $0x20] sm:$0xff] }
 0x13a   : > { %5220 = vmatprep.subr.mxu0 %v968_v32  ;;  %5258 = vmatprep.subr.mxu1 %v1000_v33  ;;  %v980_v51 = vld [vmem:[#allocation4 + $0x128] sm:$0xff]  ;;  %v979_v55 = vld [vmem:[#allocation4 + $0x120] sm:$0xff]  ;;  %v962_v56 = vld [vmem:[#allocation4 + $0x98] sm:$0xff] }
 0x13b   : > { %5221 = vmatpush3.msra.mxu0 %v952_v34  ;;  %5259 = vmatpush3.msra.mxu1 %v984_v35  ;;  %v994_v57 = vld [vmem:[#allocation4 + $0x198] sm:$0xff]  ;;  %v961_v60 = vld [vmem:[#allocation4 + $0x90] sm:$0xff]  ;;  %v960_v0 = vld [vmem:[#allocation4 + $0x88] sm:$0xff] }
 0x13c   : > { %5222 = vmatprep.subr.mxu0 %v967_v36  ;;  %5260 = vmatprep.subr.mxu1 %v999_v37  ;;  %v946_v58 = vld [vmem:[#allocation4 + $0x18] sm:$0xff]  ;;  %v993_v61 = vld [vmem:[#allocation4 + $0x190] sm:$0xff]  ;;  %v992_v1 = vld [vmem:[#allocation4 + $0x188] sm:$0xff] }
 0x13d   : > { %5223 = vmatpush3.msra.mxu0 %v951_v38  ;;  %5261 = vmatpush3.msra.mxu1 %v983_v39  ;;  %v978_v59 = vld [vmem:[#allocation4 + $0x118] sm:$0xff]  ;;  %v945_v62 = vld [vmem:[#allocation4 + $0x10] sm:$0xff]  ;;  %v944_v2 = vld [vmem:[#allocation4 + $0x8] sm:$0xff] }
 0x13e   : > { %5224 = vmatprep.subr.mxu0 %v966_v40  ;;  %5262 = vmatprep.subr.mxu1 %v998_v41  ;;  %v977_v63 = vld [vmem:[#allocation4 + $0x110] sm:$0xff]  ;;  %v976_v3 = vld [vmem:[#allocation4 + $0x108] sm:$0xff]  ;;  %v959_v4 = vld [vmem:[#allocation4 + $0x80] sm:$0xff] }
 0x13f   : > { %5225 = vmatpush3.msra.mxu0 %v950_v42  ;;  %5263 = vmatpush3.msra.mxu1 %v982_v43  ;;  %v991_v5 = vld [vmem:[#allocation4 + $0x180] sm:$0xff]  ;;  %v1007_v17 = vld [vmem:[%s7548_s9] sm:$0xff] }
 0x140   : > { %5226 = vmatprep.subr.mxu0 %v965_v44  ;;  %5264 = vmatprep.subr.mxu1 %v997_v45  ;;  %v943_v6 = vld [vmem:[#allocation4] sm:$0xff] }
 0x141   : > { %5227 = vmatpush3.msra.mxu0 %v949_v46  ;;  %5265 = vmatpush3.msra.mxu1 %v981_v47  ;;  %v975_v7 = vld [vmem:[#allocation4 + $0x100] sm:$0xff] }
 0x142   : > { %5228 = vmatprep.subr.mxu0 %v964_v48  ;;  %5266 = vmatprep.subr.mxu1 %v996_v49 }
 0x143   : > { %5229 = vmatpush3.msra.mxu0 %v948_v50  ;;  %5267 = vmatpush3.msra.mxu1 %v980_v51 }
 0x144   : > { %5230 = vmatprep.subr.mxu0 %v963_v52  ;;  %5268 = vmatprep.subr.mxu1 %v995_v53 }
 0x145   : > { %5231 = vmatpush3.msra.mxu0 %v947_v54  ;;  %5269 = vmatpush3.msra.mxu1 %v979_v55 }
 0x146   : > { %5232 = vmatprep.subr.mxu0 %v962_v56  ;;  %5270 = vmatprep.subr.mxu1 %v994_v57 }
 0x147   : > { %5233 = vmatpush3.msra.mxu0 %v946_v58  ;;  %5271 = vmatpush3.msra.mxu1 %v978_v59 }
 0x148   : > { %5234 = vmatprep.subr.mxu0 %v961_v60  ;;  %5272 = vmatprep.subr.mxu1 %v993_v61 }
 0x149   : > { %5235 = vmatpush3.msra.mxu0 %v945_v62  ;;  %5273 = vmatpush3.msra.mxu1 %v977_v63 }
 0x14a   : > { %5236 = vmatprep.subr.mxu0 %v960_v0  ;;  %5274 = vmatprep.subr.mxu1 %v992_v1 }
 0x14b   : > { %5237 = vmatpush3.msra.mxu0 %v944_v2  ;;  %5275 = vmatpush3.msra.mxu1 %v976_v3 }
 0x14c   : > { %5238 = vmatprep.subr.mxu0 %v959_v4  ;;  %5276 = vmatprep.subr.mxu1 %v991_v5 }
 0x14d   : > { %5239 = vmatpush3.msra.mxu0 %v943_v6  ;;  %5277 = vmatpush3.msra.mxu1 %v975_v7 }
 0x1a7   : > { %v915_v12 = vpop.permute.xlu0 %914 }
 0x1a8   : > { %vm920_vm2 = vcmp.eq.s32.totalorder %v915_v12, %v908_v8  ;;  %vm922_vm3 = vcmp.eq.s32.totalorder %v915_v12, %v910_v9  ;;  %vm919_vm4 = vcmp.eq.s32.totalorder %v915_v12, %v6732_v10  ;;  %vm921_vm5 = vcmp.eq.s32.totalorder %v915_v12, %v909_v11 }
 0x1a9   : > { %5024 = vmatprep.mubr.msk.f32.mxu0 %vm920_vm2, %v6235_v13  ;;  %5028 = vmatprep.mubr.msk.f32.mxu1 %vm922_vm3, %v6235_v13 }
 0x1aa   : > { %5025 = vmatmul.mubr.msk.f32.vlgmr.msra.gmra.mxu0 %vm919_vm4, %v6235_v13  ;;  %5029 = vmatmul.mubr.msk.f32.vlgmr.msra.gmra.mxu1 %vm921_vm5, %v6235_v13 }
 0x1ac   : > { %v918_v14 = vpop.permute.xlu0 %917 }
 0x1ad   : > { %vm924_vm6 = vcmp.eq.s32.totalorder %v918_v14, %v908_v8  ;;  %vm926_vm7 = vcmp.eq.s32.totalorder %v918_v14, %v910_v9  ;;  %vm923_vm8 = vcmp.eq.s32.totalorder %v918_v14, %v6732_v10  ;;  %vm925_vm9 = vcmp.eq.s32.totalorder %v918_v14, %v909_v11 }
 0x1ae   : > { %5026 = vmatprep.mubr.msk.f32.mxu0 %vm924_vm6, %v6235_v13  ;;  %5030 = vmatprep.mubr.msk.f32.mxu1 %vm926_vm7, %v6235_v13 }
 0x1af   : > { %5027 = vmatmul.mubr.msk.f32.gmra.mxu0 %vm923_vm8, %v6235_v13  ;;  %5031 = vmatmul.mubr.msk.f32.gmra.mxu1 %vm925_vm9, %v6235_v13 }
 0x26a   : > { %v5240_v15 = vpop.f32.mrf.mxu0  ;;  %v5278_v16 = vpop.f32.mrf.mxu1 }
 0x26c   : > { %v5241_v18 = vpop.f32.mrf.mxu0  ;;  %v5279_v19 = vpop.f32.mrf.mxu1 }
 0x26d   : > { %v5242_v20 = vadd.f32 %v5241_v18, %v5240_v15  ;;  %v5280_v24 = vadd.f32 %v5279_v19, %v5278_v16 }
 0x26f   : > { %v5243_v21 = vpop.f32.mrf.mxu0  ;;  %v5281_v22 = vpop.f32.mrf.mxu1  ;;  %v1075_v23 = vadd.f32 %v5242_v20, %v1007_v17 }
 0x271   : > { %v5244_v25 = vpop.f32.mrf.mxu0  ;;  %v5282_v10 = vpop.f32.mrf.mxu1  ;;  %v1150_v26 = vadd.f32 %v5280_v24, %v1075_v23 }
 0x272   : > { %v5245_v27 = vadd.f32 %v5244_v25, %v5243_v21  ;;  %v5283_v29 = vadd.f32 %v5282_v10, %v5281_v22 }
 0x273   : > { %1158 = vst [vmem:[#allocation2] sm:$0xff] %v1150_v26 }
 0x274   : > { %v1080_v28 = vadd.f32 %v5245_v27, %v1007_v17 }
 0x276   : > { %v1155_v30 = vadd.f32 %v5283_v29, %v1080_v28 }
 0x278   : > { %1159 = vst [vmem:[#allocation2 + $0x8] sm:$0xff] %v1155_v30 }
 0x279 PF: > { %v5654_v33 = vld [vmem:[%s6672_s18 + $0xac] ss:$12 sps:$4 sm:$0xff]   ;;  %v5656_v34 = vld [vmem:[%s6672_s18 + $0xa8] ss:$12 sps:$4 sm:$0xff]   ;;  %v6236_v35 = vmov 0.0   ;;  %v6237_v58 = vmov 0   ;;  %v1245_v21 = vlaneseq }
 0x27a   : > { %v1166_v31 = vld [vmem:[#allocation2] sm:$0xff]  ;;  %5378 = vmatprep.subr.bf16.mxu1 %v6236_v35  ;;  %v5657_v36 = vld [vmem:[%s6672_s18 + $0xb0] ss:$12 sps:$4 sm:$0xff]   ;;  %1388 = vmatprep.subr.bf16.mxu0 %v5654_v33  ;;  %v5658_v45 = vld [vmem:[%s6672_s18 + $0x94] ss:$12 sps:$4 sm:$0xff]   ;;  %vm6238_vm10 = vmmov 0  }
 0x27b   : > { %1171 = vadd.xlane.f32.xlu0 %v1166_v31  ;;  %1389 = vmatpush1.bf16.msra.mxu0 %v5656_v34  ;;  %v5660_v46 = vld [vmem:[%s6672_s18 + $0x90] ss:$12 sps:$4 sm:$0xff]   ;;  %v5661_v47 = vld [vmem:[%s6672_s18 + $0x98] ss:$12 sps:$4 sm:$0xff]   ;;  %v5665_v50 = vld [vmem:[%s6672_s18 + $0x80] ss:$12 sps:$4 sm:$0xff]  }
 0x27c   : > { %5379 = vmatpush3.bf16.msra.mxu1 %v5657_v36  ;;  %1390 = vmatprep.subr.bf16.mxu0 %v5658_v45  ;;  %v5662_v48 = vld [vmem:[%s6672_s18 + $0x7c] ss:$12 sps:$4 sm:$0xff]   ;;  %v5664_v49 = vld [vmem:[%s6672_s18 + $0x78] ss:$12 sps:$4 sm:$0xff]   ;;  %v5668_v52 = vld [vmem:[%s6672_s18 + $0x60] ss:$12 sps:$4 sm:$0xff]  }
 0x27d   : > { %5380 = vmatprep.subr.bf16.mxu1 %v6236_v35  ;;  %v5666_v51 = vld [vmem:[%s6672_s18 + $0x64] ss:$12 sps:$4 sm:$0xff]   ;;  %v5669_v53 = vld [vmem:[%s6672_s18 + $0x68] ss:$12 sps:$4 sm:$0xff]   ;;  %v5670_v54 = vld [vmem:[%s6672_s18 + $0x4c] ss:$12 sps:$4 sm:$0xff]   ;;  %1420 = vmatprep.mubr.bf16.mxu0 %v6237_v58 }
 0x27e   : > { %v5672_v55 = vld [vmem:[%s6672_s18 + $0x48] ss:$12 sps:$4 sm:$0xff]   ;;  %v5673_v56 = vld [vmem:[%s6672_s18 + $0x50] ss:$12 sps:$4 sm:$0xff]   ;;  %5394 = vmatprep.mubr.msk.bf16.mxu1 %vm6238_vm10, %v6236_v35  ;;  %v5677_v60 = vld [vmem:[%s6672_s18 + $0x38] ss:$12 sps:$4 sm:$0xff]  }
 0x27f   : > { %v1167_v32 = vld [vmem:[#allocation2 + $0x8] sm:$0xff]  ;;  %1391 = vmatpush1.bf16.msra.mxu0 %v5660_v46  ;;  %v5674_v57 = vld [vmem:[%s6672_s18 + $0x34] ss:$12 sps:$4 sm:$0xff]   ;;  %v5678_v61 = vld [vmem:[%s6672_s18 + $0x1c] ss:$12 sps:$4 sm:$0xff]   ;;  %s7550_s14 = scalar_lea.vmem [#allocation9], %s6663_s20 }
 0x280   : > { %1173 = vadd.xlane.f32.xlu0 %v1167_v32  ;;  %5381 = vmatpush3.bf16.msra.mxu1 %v5661_v47  ;;  %v5676_v59 = vld [vmem:[%s6672_s18 + $0x30] ss:$12 sps:$4 sm:$0xff]   ;;  %v5680_v62 = vld [vmem:[%s6672_s18 + $0x18] ss:$12 sps:$4 sm:$0xff]   ;;  %v5681_v63 = vld [vmem:[%s6672_s18 + $0x20] ss:$12 sps:$4 sm:$0xff]  }
 0x281   : > { %5382 = vmatprep.subr.bf16.mxu1 %v6236_v35  ;;  %1392 = vmatprep.subr.bf16.mxu0 %v5662_v48  ;;  %v5682_v0 = vld [vmem:[%s6672_s18 + $0x4] ss:$12 sps:$4 sm:$0xff]   ;;  %v5684_v1 = vld [vmem:[%s6672_s18] ss:$12 sps:$4 sm:$0xff]   ;;  %v5685_v2 = vld [vmem:[%s6672_s18 + $0x8] ss:$12 sps:$4 sm:$0xff]  }
 0x282   : > { %s7549_s18 = scalar_lea.vmem [#allocation7], %s6663_s20  ;;  %v5033_v16 = vld [vmem:[%s7550_s14] ss:$0 sm:$0xff]  ;;  %v6802_v22 = vshrl.u32 %v1245_v21, 7  ;;  %v6806_v24 = vld [vmem:[%s6680_s16] sm:$0x7] }
 0x283   : > { %1393 = vmatpush1.bf16.msra.mxu0 %v5664_v49  ;;  %v5032_v12 = vld [vmem:[%s7549_s18] ss:$0 sm:$0xff]  ;;  %s6239_s20 = smov 64   ;;  %s6240_s16 = smov 96   ;;  %vm2364_vm11 = vcmask 261120   ;;  %vm2749_vm12 = vcmask 64512  }
 0x284   : > { %5383 = vmatpush3.bf16.msra.mxu1 %v5665_v50  ;;  %1394 = vmatprep.subr.bf16.mxu0 %v5666_v51  ;;  %v1247_v23 = vsub.s32 0, %v6802_v22  ;;  %v1251_v10 = vsub.s32 1, %v6802_v22  ;;  %s6241_s22 = smov 32   ;;  %vm2857_vm13 = vcmask 1043456   ;;  %vm3521_vm14 = vcmask 523264   ;;  %p5166_p1 = scmp.ne.s32.totalorder %s6361_s0, 1 }
 0x285   : > { %5384 = vmatprep.subr.bf16.mxu1 %v6236_v35  ;;  %vm3524_vm15 = vcmask 785408   ;;  %s7556_s3 = sld [smem:[#allocation45_spill]] (!%p5166_p1) }
 0x286   : > { %v1248_v25 = vrot.slane %v6806_v24, %v1247_v23  ;;  %v1252_v29 = vrot.slane %v6806_v24, %v1251_v10 }
 0x287   : > { %1395 = vmatpush1.bf16.msra.mxu0 %v5668_v52 }
 0x288   : > { %5385 = vmatpush3.bf16.msra.mxu1 %v5669_v53  ;;  %1396 = vmatprep.subr.bf16.mxu0 %v5670_v54 }
 0x289   : > { %5386 = vmatprep.subr.bf16.mxu1 %v6236_v35 }
 0x28b   : > { %1397 = vmatpush1.bf16.msra.mxu0 %v5672_v55 }
 0x28c   : > { %5387 = vmatpush3.bf16.msra.mxu1 %v5673_v56  ;;  %1398 = vmatprep.subr.bf16.mxu0 %v5674_v57 }
 0x28d   : > { %5388 = vmatprep.subr.bf16.mxu1 %v6236_v35 }
 0x28f   : > { %1399 = vmatpush1.bf16.msra.mxu0 %v5676_v59 }
 0x290   : > { %5389 = vmatpush3.bf16.msra.mxu1 %v5677_v60  ;;  %1400 = vmatprep.subr.bf16.mxu0 %v5678_v61 }
 0x291   : > { %5390 = vmatprep.subr.bf16.mxu1 %v6236_v35 }
 0x293   : > { %1401 = vmatpush1.bf16.msra.mxu0 %v5680_v62 }
 0x294   : > { %5391 = vmatpush3.bf16.msra.mxu1 %v5681_v63  ;;  %1402 = vmatprep.subr.bf16.mxu0 %v5682_v0 }
 0x295   : > { %5392 = vmatprep.subr.bf16.mxu1 %v6236_v35 }
 0x297   : > { %1403 = vmatpush1.bf16.msra.mxu0 %v5684_v1 }
 0x298   : > { %5393 = vmatpush3.bf16.msra.mxu1 %v5685_v2  ;;  %5422 = vmatprep.subr.bf16.mxu0 %v6236_v35 }
 0x299   : > { %5398 = vmatprep.subr.bf16.mxu1 %v6236_v35 }
 0x304   : > { %v1172_v37 = vpop.xlane.xlu0 %1171 }
 0x305   : > { %v1176_v38 = vmul.f32 0.0078125, %v1172_v37 }
 0x307   : > { %v6752_v39 = vsub.f32 %v1166_v31, %v1176_v38 }
 0x309   : > { %v1174_v40 = vpop.xlane.xlu0 %1173  ;;  %v1180_v42 = vmul.f32 %v6752_v39, %v6752_v39 }
 0x30a   : > { %v1177_v41 = vmul.f32 0.0078125, %v1174_v40  ;;  %v6242_v40 = vmov 1983009808  }
 0x30b   : > { %1182 = vadd.xlane.f32.xlu1 %v1180_v42 }
 0x30c   : > { %v6756_v43 = vsub.f32 %v1167_v32, %v1177_v41  ;;  %v1495_v41 = vunpack.c.l.s4 %v6242_v40 }
 0x30e   : > { %v1181_v44 = vmul.f32 %v6756_v43, %v6756_v43  ;;  %v1496_v46 = vunpack.c.0.s8 %v1495_v41 }
 0x310   : > { %1184 = vadd.xlane.f32.xlu1 %v1181_v44  ;;  %v6243_v44 = vmov 1934713408   ;;  %v6847_v52 = vsub.s32 %v1496_v46, %v6802_v22 }
 0x311   : > { %v1527_v45 = vunpack.c.l.s4 %v6243_v44 }
 0x313   : > { %v1528_v49 = vunpack.c.0.s8 %v1527_v45 }
 0x315   : > { %v6851_v59 = vsub.s32 %v1528_v49, %v6802_v22 }
 0x394   : > { %v1183_v3 = vpop.xlane.xlu1 %1182 }
 0x395   : > { %v1186_v4 = vmul.f32 0.0078125, %v1183_v3 }
 0x397   : > { %v1188_v5 = vadd.f32 1e-05, %v1186_v4 }
 0x399   : > { %v1185_v6 = vpop.xlane.xlu1 %1184  ;;  %5774 = vrsqrt.f32 %v1188_v5 }
 0x39a   : > { %v1187_v7 = vmul.f32 0.0078125, %v1185_v6 }
 0x39c   : > { %v1189_v8 = vadd.f32 1e-05, %v1187_v7 }
 0x39e   : > { %5776 = vrsqrt.f32 %v1189_v8 }
 0x3a6   : > { %v5775_v9 = vpop.eup %5774 }
 0x3a7   : > { %v1192_v11 = vmul.f32 %v5775_v9, %v6752_v39 }
 0x3a9   : > { %v1200_v15 = vmul.f32 %v5032_v12, %v1192_v11 }
 0x3ab   : > { %v5777_v13 = vpop.eup %5776  ;;  %v1208_v18 = vadd.f32 %v5033_v16, %v1200_v15 }
 0x3ac   : > { %v1193_v14 = vmul.f32 %v5777_v13, %v6756_v43 }
 0x3ae   : > { %v1201_v17 = vmul.f32 %v5032_v12, %v1193_v14 }
 0x3b0   : > { %v1209_v19 = vadd.f32 %v5033_v16, %v1201_v17 }
 0x3b2   : > { %v1242_v20 = vpack.c.bf16 %v1209_v19, %v1208_v18 }
 0x3b4   : > { %1421 = vmatmul.mubr.bf16.vlgmr.msra.gmra.mxu0 %v1242_v20  ;;  %5395 = vmatmul.mubr.bf16.vlgmr.msra.gmra.mxu1 %v1242_v20 }
 0x3b5   : > { %5400 = vmatprep.mubr.msk.bf16.mxu1 %vm6238_vm10, %v6236_v35  ;;  %5424 = vmatprep.mubr.msk.bf16.mxu0 %vm6238_vm10, %v6236_v35 }
 0x474   : > { %v1422_v26 = vpop.f32.mrf.mxu0  ;;  %v6812_v27 = vpop.f32.mrf.mxu1 }
 0x475   : > { %v6814_v28 = vadd.f32 %v1422_v26, %v1248_v25 }
 0x476   : > { %v1424_v30 = vpop.f32.mrf.mxu0  ;;  %v5396_v31 = vpop.f32.mrf.mxu1 }
 0x477   : > { %1480 = vrot.lane.b32.xlu0 %v6814_v28, %s6239_s20  ;;  %1474 = vrot.lane.b32.xlu1 %v6814_v28, %s6240_s16  ;;  %v1425_v34 = vadd.f32 %v1424_v30, %v1252_v29 }
 0x478   : > { %v1426_v32 = vpop.f32.mrf.mxu0  ;;  %v6823_v33 = vpop.f32.mrf.mxu1 }
 0x479   : > { %v6836_v39 = vadd.f32 %v1426_v32, %v1248_v25 }
 0x47a   : > { %v1428_v36 = vpop.f32.mrf.mxu0  ;;  %v5397_v37 = vpop.f32.mrf.mxu1 }
 0x47b   : > { %1766 = vrot.lane.b32.xlu0 %v1425_v34, %s6240_s16  ;;  %1772 = vrot.lane.b32.xlu1 %v1425_v34, %s6239_s20  ;;  %v6827_v38 = vadd.f32 %v1428_v36, %v1252_v29 }
 0x47f   : > { %1768 = vrot.lane.b32.xlu0 %v6827_v38, %s6240_s16  ;;  %1778 = vrot.lane.b32.xlu1 %v1425_v34, %s6241_s22 }
 0x483   : > { %1780 = vrot.lane.b32.xlu0 %v6827_v38, %s6241_s22  ;;  %1486 = vrot.lane.b32.xlu1 %v6814_v28, %s6241_s22 }
 0x487   : > { %1482 = vrot.lane.b32.xlu0 %v6836_v39, %s6239_s20  ;;  %1774 = vrot.lane.b32.xlu1 %v6827_v38, %s6239_s20 }
 0x48b   : > { %1476 = vrot.lane.b32.xlu1 %v6836_v39, %s6240_s16 }
 0x48f   : > { %1488 = vrot.lane.b32.xlu1 %v6836_v39, %s6241_s22 }
 0x4e9   : > { %v1481_v42 = vpop.permute.xlu0 %1480  ;;  %v1475_v43 = vpop.permute.xlu1 %1474 }
 0x4ea   : > { %v1492_v53 = vcombine.low %v6814_v28, %v1481_v42  ;;  %v1493_v0 = vcombine.high %v6814_v28, %v1481_v42 }
 0x4ec   : > { %v1500_v1 = vrot.slane %v1492_v53, %v6847_v52  ;;  %v1507_v17 = vrot.slane %v1493_v0, %v6847_v52 }
 0x4ed   : > { %v1767_v47 = vpop.permute.xlu0 %1766  ;;  %v1773_v48 = vpop.permute.xlu1 %1772 }
 0x4ee   : > { %v1784_v50 = vcombine.low %v1425_v34, %v1773_v48  ;;  %v1785_v51 = vcombine.high %v1425_v34, %v1773_v48 }
 0x4f0   : > { %v1792_v60 = vrot.slane %v1784_v50, %v6847_v52  ;;  %v1799_v61 = vrot.slane %v1785_v51, %v6847_v52 }
 0x4f1   : > { %v1769_v54 = vpop.permute.xlu0 %1768  ;;  %v1779_v55 = vpop.permute.xlu1 %1778 }
 0x4f2   : > { %v1800_v56 = vcombine.low %v1767_v47, %v1779_v55  ;;  %v1801_v57 = vcombine.high %v1767_v47, %v1779_v55 }
 0x4f4   : > { %v1808_v62 = vrot.slane %v1800_v56, %v6847_v52  ;;  %v1815_v63 = vrot.slane %v1801_v57, %v6847_v52 }
 0x4f5   : > { %v1781_v2 = vpop.permute.xlu0 %1780  ;;  %v1487_v3 = vpop.permute.xlu1 %1486 }
 0x4f6   : > { %v1816_v4 = vcombine.low %v1792_v60, %v1808_v62  ;;  %v1817_v5 = vcombine.high %v1792_v60, %v1808_v62  ;;  %v1832_v6 = vcombine.low %v1799_v61, %v1815_v63  ;;  %v1833_v7 = vcombine.high %v1799_v61, %v1815_v63 }
 0x4f7   : > { %v1868_v8 = vcombine.low %v1769_v54, %v1781_v2  ;;  %v1869_v9 = vcombine.high %v1769_v54, %v1781_v2  ;;  %v1508_v11 = vcombine.low %v1475_v43, %v1487_v3  ;;  %v1509_v12 = vcombine.high %v1475_v43, %v1487_v3 }
 0x4f8   : > { %v1824_v13 = vrot.slane %v1816_v4, %v6851_v59  ;;  %v1831_v14 = vrot.slane %v1817_v5, %v6851_v59  ;;  %v1840_v15 = vrot.slane %v1832_v6, %v6851_v59  ;;  %v1847_v16 = vrot.slane %v1833_v7, %v6851_v59 }
 0x4f9   : > { %v1876_v18 = vrot.slane %v1868_v8, %v6847_v52  ;;  %v1516_v19 = vrot.slane %v1508_v11, %v6847_v52  ;;  %v1523_v20 = vrot.slane %v1509_v12, %v6847_v52  ;;  %v1775_v21 = vpop.permute.xlu1 %1774  ;;  %v1883_v29 = vrot.slane %v1869_v9, %v6847_v52  ;;  %v1483_v36 = vpop.permute.xlu0 %1482 }
 0x4fa   : > { %v1920_v25 = vcombine.low %v1824_v13, %v1831_v14  ;;  %v5062_v26 = vcombine.high %v1824_v13, %v1831_v14  ;;  %v1936_v28 = vcombine.low %v1840_v15, %v1847_v16  ;;  %v5063_v42 = vcombine.high %v1840_v15, %v1847_v16 }
 0x4fb   : > { %v1524_v30 = vcombine.low %v1500_v1, %v1516_v19  ;;  %v1525_v31 = vcombine.high %v1500_v1, %v1516_v19  ;;  %v1540_v32 = vcombine.low %v1507_v17, %v1523_v20  ;;  %v1541_v34 = vcombine.high %v1507_v17, %v1523_v20 }
 0x4fc   : > { %v6869_v37 = vrot.slane %v1920_v25, %v6847_v52  ;;  %v6872_v40 = vrot.slane %v5062_v26, %v6847_v52  ;;  %v6875_v41 = vrot.slane %v1936_v28, %v6847_v52  ;;  %v1560_v48 = vcombine.low %v6836_v39, %v1483_v36 }
 0x4fd   : > { %v1532_v43 = vrot.slane %v1524_v30, %v6851_v59  ;;  %v1539_v44 = vrot.slane %v1525_v31, %v6851_v59  ;;  %v1548_v45 = vrot.slane %v1540_v32, %v6851_v59  ;;  %v1555_v46 = vrot.slane %v1541_v34, %v6851_v59  ;;  %v1477_v47 = vpop.permute.xlu1 %1476 }
 0x4fe   : > { %v1561_v49 = vcombine.high %v6836_v39, %v1483_v36  ;;  %v1852_v50 = vcombine.low %v6827_v38, %v1775_v21  ;;  %v1853_v51 = vcombine.high %v6827_v38, %v1775_v21  ;;  %v1951_v57 = vrot.slane %v5063_v42, %v6847_v52 }
 0x4ff   : > { %v1628_v53 = vcombine.low %v1532_v43, %v1539_v44  ;;  %v5058_v54 = vcombine.high %v1532_v43, %v1539_v44  ;;  %v1644_v55 = vcombine.low %v1548_v45, %v1555_v46  ;;  %v5059_v56 = vcombine.high %v1548_v45, %v1555_v46 }
 0x500   : > { %v1568_v60 = vrot.slane %v1560_v48, %v6847_v52  ;;  %v1860_v61 = vrot.slane %v1852_v50, %v6847_v52  ;;  %v1867_v62 = vrot.slane %v1853_v51, %v6847_v52  ;;  %v1575_v9 = vrot.slane %v1561_v49, %v6847_v52 }
 0x501   : > { %v6890_v63 = vrot.slane %v1628_v53, %v6847_v52  ;;  %v6893_v39 = vrot.slane %v5058_v54, %v6847_v52  ;;  %v6896_v38 = vrot.slane %v1644_v55, %v6847_v52  ;;  %v6899_v0 = vrot.slane %v5059_v56, %v6847_v52  ;;  %v1489_v5 = vpop.permute.xlu1 %1488 }
 0x502   : > { %v1884_v1 = vcombine.low %v1860_v61, %v1876_v18  ;;  %v1885_v2 = vcombine.high %v1860_v61, %v1876_v18  ;;  %v1900_v3 = vcombine.low %v1867_v62, %v1883_v29  ;;  %v1901_v4 = vcombine.high %v1867_v62, %v1883_v29 }
 0x503   : > { %v1660_v6 = vcombine.low %v6890_v63, %v6893_v39  ;;  %v1661_v7 = vcombine.high %v6890_v63, %v6893_v39  ;;  %v1676_v8 = vcombine.low %v6896_v38, %v6899_v0  ;;  %v1576_v15 = vcombine.low %v1477_v47, %v1489_v5 }
 0x504   : > { %v1892_v11 = vrot.slane %v1884_v1, %v6851_v59  ;;  %v1899_v12 = vrot.slane %v1885_v2, %v6851_v59  ;;  %v1908_v13 = vrot.slane %v1900_v3, %v6851_v59  ;;  %v1915_v14 = vrot.slane %v1901_v4, %v6851_v59 }
 0x505   : > { %v1577_v16 = vcombine.high %v1477_v47, %v1489_v5  ;;  %v1952_v17 = vcombine.low %v6869_v37, %v6872_v40  ;;  %v1968_v18 = vcombine.low %v6875_v41, %v1951_v57  ;;  %v1677_v19 = vcombine.high %v6896_v38, %v6899_v0 }
 0x506   : > { %v1988_v20 = vcombine.low %v1892_v11, %v1899_v12  ;;  %v5064_v21 = vcombine.high %v1892_v11, %v1899_v12  ;;  %v2004_v25 = vcombine.low %v1908_v13, %v1915_v14  ;;  %v1584_v26 = vrot.slane %v1576_v15, %v6847_v52 }
 0x507   : > { %v1591_v28 = vrot.slane %v1577_v16, %v6847_v52  ;;  %v6920_v29 = vrot.slane %v1952_v17, %v6851_v59  ;;  %v1976_v30 = vrot.slane %v1968_v18, %v6851_v59  ;;  %v5065_v36 = vcombine.high %v1908_v13, %v1915_v14 }
 0x508   : > { %v6924_v31 = vrot.slane %v1988_v20, %v6847_v52  ;;  %v6927_v32 = vrot.slane %v5064_v21, %v6847_v52  ;;  %v6930_v34 = vrot.slane %v2004_v25, %v6847_v52  ;;  %v1592_v42 = vcombine.low %v1568_v60, %v1584_v26 }
 0x509   : > { %v1593_v43 = vcombine.high %v1568_v60, %v1584_v26  ;;  %v1608_v44 = vcombine.low %v1575_v9, %v1591_v28  ;;  %v1609_v45 = vcombine.high %v1575_v9, %v1591_v28  ;;  %v1984_v46 = vcombine.low %v6920_v29, %v1976_v30 }
 0x50a   : > { %v1953_v47 = vcombine.high %v6869_v37, %v6872_v40  ;;  %v1969_v48 = vcombine.high %v6875_v41, %v1951_v57  ;;  %v6937_v49 = vrot.slane %v1660_v6, %v6851_v59  ;;  %v1600_v50 = vrot.slane %v1592_v42, %v6851_v59 }
 0x50b   : > { %v1607_v51 = vrot.slane %v1593_v43, %v6851_v59  ;;  %v1616_v53 = vrot.slane %v1608_v44, %v6851_v59  ;;  %v1623_v54 = vrot.slane %v1609_v45, %v6851_v59  ;;  %v2356_v55 = vpack.c.bf16 %v1984_v46, %v1984_v46 }
 0x50c   : > { %v1967_v56 = vrot.slane %v1953_v47, %v6851_v59  ;;  %v1983_v60 = vrot.slane %v1969_v48, %v6851_v59  ;;  %v1684_v37 = vrot.slane %v1676_v8, %v6851_v59  ;;  %v2019_v62 = vrot.slane %v5065_v36, %v6847_v52 }
 0x50d   : > { %v1696_v40 = vcombine.low %v1600_v50, %v1607_v51  ;;  %v5060_v41 = vcombine.high %v1600_v50, %v1607_v51  ;;  %v1712_v57 = vcombine.low %v1616_v53, %v1623_v54  ;;  %v5061_v61 = vcombine.high %v1616_v53, %v1623_v54 }
 0x50e   : > { %v2369_v63 = vsel %vm2364_vm11, %v2356_v55, 0  ;;  %v1986_v39 = vcombine.low %v1967_v56, %v1983_v60  ;;  %v1692_v38 = vcombine.low %v6937_v49, %v1684_v37  ;;  %v1675_v5 = vrot.slane %v1661_v7, %v6851_v59 }
 0x50f   : > { %v6950_v0 = vrot.slane %v1696_v40, %v6847_v52  ;;  %v6953_v1 = vrot.slane %v5060_v41, %v6847_v52  ;;  %v6956_v2 = vrot.slane %v1712_v57, %v6847_v52  ;;  %v6959_v3 = vrot.slane %v5061_v61, %v6847_v52  ;;  %5399 = vmatpush3.bf16.xpose.msra.mxu1 %v2369_v63 }
 0x510   : > { %v2360_v4 = vpack.c.bf16 %v1986_v39, %v1986_v39  ;;  %5404 = vmatprep.subr.bf16.mxu1 %v6236_v35  ;;  %v1691_v6 = vrot.slane %v1677_v19, %v6851_v59  ;;  %v2020_v8 = vcombine.low %v6924_v31, %v6927_v32  ;;  %v2036_v14 = vcombine.low %v6930_v34, %v2019_v62 }
 0x511   : > { %v1728_v9 = vcombine.low %v6950_v0, %v6953_v1  ;;  %v1744_v11 = vcombine.low %v6956_v2, %v6959_v3  ;;  %v1987_v15 = vcombine.high %v1967_v56, %v1983_v60  ;;  %v2348_v7 = vpack.c.bf16 %v1692_v38, %v1692_v38 }
 0x512   : > { %v2553_v12 = vsel %vm2364_vm11, %v2360_v4, 0  ;;  %v2028_v13 = vrot.slane %v2020_v8, %v6851_v59  ;;  %v1694_v16 = vcombine.low %v1675_v5, %v1691_v6  ;;  %v2044_v17 = vrot.slane %v2036_v14, %v6851_v59  ;;  %v7026_v4 = vld [vmem:[#allocation3] sm:$0xff] }
 0x513   : > { %5423 = vmatpush3.bf16.xpose.msra.mxu0 %v2553_v12  ;;  %v2362_v19 = vpack.c.bf16 %v1987_v15, %v1987_v15  ;;  %v1736_v20 = vrot.slane %v1728_v9, %v6851_v59  ;;  %v1752_v21 = vrot.slane %v1744_v11, %v6851_v59  ;;  %v1985_v43 = vcombine.high %v6920_v29, %v1976_v30 }
 0x514   : > { %5434 = vmatprep.subr.bf16.mxu0 %v6236_v35  ;;  %v2052_v18 = vcombine.low %v2028_v13, %v2044_v17  ;;  %v2352_v25 = vpack.c.bf16 %v1694_v16, %v1694_v16  ;;  %v1695_v44 = vcombine.high %v1675_v5, %v1691_v6  ;;  %v2053_v29 = vcombine.high %v2028_v13, %v2044_v17 }
 0x515   : > { %v2645_v36 = vsel %vm2364_vm11, %v2362_v19, 0  ;;  %v1760_v42 = vcombine.low %v1736_v20, %v1752_v21  ;;  %v2358_v46 = vpack.c.bf16 %v1985_v43, %v1985_v43  ;;  %v2021_v30 = vcombine.high %v6924_v31, %v6927_v32 }
 0x516   : > { %5401 = vmatmul.mubr.msk.bf16.vlgmr.msra.gmra.mxu1 %vm2364_vm11, %v2348_v7  ;;  %v2357_v26 = vpack.c.bf16 %v2052_v18, %v2052_v18  ;;  %v2354_v47 = vpack.c.bf16 %v1695_v44, %v1695_v44  ;;  %v2037_v50 = vcombine.high %v6930_v34, %v2019_v62  ;;  %v1693_v51 = vcombine.high %v6937_v49, %v1684_v37 }
 0x517   : > { %5406 = vmatprep.mubr.msk.bf16.mxu1 %vm6238_vm10, %v6236_v35  ;;  %v2349_v45 = vpack.c.bf16 %v1760_v42, %v1760_v42  ;;  %v2461_v48 = vsel %vm2364_vm11, %v2358_v46, 0  ;;  %v2359_v53 = vpack.c.bf16 %v2053_v29, %v2053_v29  ;;  %v2035_v54 = vrot.slane %v2021_v30, %v6851_v59 }
 0x518   : > { %v2415_v28 = vsel %vm2364_vm11, %v2357_v26, 0  ;;  %v2051_v55 = vrot.slane %v2037_v50, %v6851_v59  ;;  %v2350_v56 = vpack.c.bf16 %v1693_v51, %v1693_v51  ;;  %v1729_v34 = vcombine.high %v6950_v0, %v6953_v1 }
 0x519   : > { %5405 = vmatpush3.bf16.xpose.msra.mxu1 %v2415_v28  ;;  %v2507_v31 = vsel %vm2364_vm11, %v2359_v53, 0  ;;  %v1745_v49 = vcombine.high %v6956_v2, %v6959_v3  ;;  %v1761_v60 = vcombine.high %v1736_v20, %v1752_v21 }
 0x51a   : > { %5425 = vmatmul.mubr.msk.bf16.vlgmr.msra.gmra.mxu0 %vm2364_vm11, %v2352_v25  ;;  %5410 = vmatprep.subr.bf16.mxu1 %v6236_v35  ;;  %v2054_v32 = vcombine.low %v2035_v54, %v2051_v55  ;;  %v1743_v41 = vrot.slane %v1729_v34, %v6851_v59  ;;  %v2055_v62 = vcombine.high %v2035_v54, %v2051_v55 }
 0x51b   : > { %5435 = vmatpush3.bf16.xpose.msra.mxu0 %v2645_v36  ;;  %5436 = vmatprep.mubr.msk.bf16.mxu0 %vm6238_vm10, %v6236_v35  ;;  %v2351_v40 = vpack.c.bf16 %v1761_v60, %v1761_v60  ;;  %v1759_v57 = vrot.slane %v1745_v49, %v6851_v59 }
 0x51c   : > { %5446 = vmatprep.subr.bf16.mxu0 %v6236_v35  ;;  %v2361_v37 = vpack.c.bf16 %v2054_v32, %v2054_v32  ;;  %v2363_v39 = vpack.c.bf16 %v2055_v62, %v2055_v62 }
 0x51d   : > { %v1762_v63 = vcombine.low %v1743_v41, %v1759_v57  ;;  %v1763_v1 = vcombine.high %v1743_v41, %v1759_v57 }
 0x51e   : > { %v2599_v61 = vsel %vm2364_vm11, %v2361_v37, 0  ;;  %v2691_v0 = vsel %vm2364_vm11, %v2363_v39, 0 }
 0x51f   : > { %v2353_v38 = vpack.c.bf16 %v1762_v63, %v1762_v63  ;;  %v2355_v2 = vpack.c.bf16 %v1763_v1, %v1763_v1 }
 0x520   : > { %5407 = vmatmul.mubr.msk.bf16.vlgmr.msra.gmra.mxu1 %vm2364_vm11, %v2349_v45 }
 0x521   : > { %5411 = vmatpush3.bf16.xpose.msra.mxu1 %v2461_v48  ;;  %5412 = vmatprep.mubr.msk.bf16.mxu1 %vm6238_vm10, %v6236_v35 }
 0x522   : > { %5437 = vmatmul.mubr.msk.bf16.vlgmr.msra.gmra.mxu0 %vm2364_vm11, %v2354_v47  ;;  %5416 = vmatprep.subr.bf16.mxu1 %v6236_v35 }
 0x523   : > { %5448 = vmatprep.mubr.msk.bf16.mxu0 %vm6238_vm10, %v6236_v35 }
 0x528   : > { %5413 = vmatmul.mubr.msk.bf16.vlgmr.msra.gmra.mxu1 %vm2364_vm11, %v2350_v56  ;;  %v1255_v56 = vsub.s32 2, %v6802_v22 }
 0x529   : > { %5417 = vmatpush3.bf16.xpose.msra.mxu1 %v2507_v31  ;;  %5418 = vmatprep.mubr.msk.bf16.mxu1 %vm6238_vm10, %v6236_v35 }
 0x52a   : > { %5428 = vmatprep.subr.bf16.mxu1 %v6236_v35  ;;  %v1256_v49 = vrot.slane %v6806_v24, %v1255_v56 }
 0x52c   : > { %v7059_v62 = vadd.f32 %v6812_v27, %v1256_v49 }
 0x530   : > { %5419 = vmatmul.mubr.msk.bf16.vlgmr.msra.gmra.mxu1 %vm2364_vm11, %v2351_v40  ;;  %v7053_v40 = vadd.f32 %v6823_v33, %v1256_v49 }
 0x531   : > { %5429 = vmatpush3.bf16.xpose.msra.mxu1 %v2599_v61  ;;  %5430 = vmatprep.mubr.msk.bf16.mxu1 %vm6238_vm10, %v6236_v35 }
 0x532   : > { %5440 = vmatprep.subr.bf16.mxu1 %v6236_v35 }
 0x538   : > { %5431 = vmatmul.mubr.msk.bf16.vlgmr.msra.gmra.mxu1 %vm2364_vm11, %v2353_v38 }
 0x539   : > { %5441 = vmatpush3.bf16.xpose.msra.mxu1 %v2691_v0  ;;  %5442 = vmatprep.mubr.msk.bf16.mxu1 %vm6238_vm10, %v6236_v35 }
 0x53a   : > { %5452 = vmatprep.subr.bf16.mxu1 %v6236_v35 }
 0x540   : > { %5443 = vmatmul.mubr.msk.bf16.vlgmr.msra.gmra.mxu1 %vm2364_vm11, %v2355_v2 }
 0x541   : > { %5454 = vmatprep.mubr.msk.bf16.mxu1 %vm6238_vm10, %v6236_v35 }
 0x5d6   : > { %v2405_v3 = vpop.f32.mrf.mxu1 }
 0x5d7   : > { %v2733_v5 = vmul.f32 0.17677669, %v2405_v3 }
 0x5d8   : > { %v5402_v6 = vpop.f32.mrf.mxu1 }
 0x5d9   : > { %v7029_v8 = vadd.f32 %v2733_v5, %v7026_v4 }
 0x5da   : > { %v2589_v9 = vpop.f32.mrf.mxu0  ;;  %v2408_v11 = vpop.f32.mrf.mxu1 }
 0x5db   : > { %v2737_v12 = vmul.f32 0.17677669, %v2589_v9  ;;  %v2750_v13 = vsel %vm2749_vm12, %v7029_v8, -inf }
 0x5dc   : > { %v5426_v14 = vpop.f32.mrf.mxu0  ;;  %2751 = vmax.xlane.f32.xlu0 %v2750_v13  ;;  %v5403_v15 = vpop.f32.mrf.mxu1 }
 0x5dd   : > { %v7034_v7 = vadd.f32 %v2737_v12, %v7026_v4 }
 0x5de   : > { %v2592_v16 = vpop.f32.mrf.mxu0 }
 0x5df   : > { %v2762_v17 = vsel %vm2749_vm12, %v7034_v7, -inf }
 0x5e0   : > { %v5427_v18 = vpop.f32.mrf.mxu0  ;;  %2763 = vmax.xlane.f32.xlu0 %v2762_v17  ;;  %v2451_v19 = vpop.f32.mrf.mxu1 }
 0x5e1   : > { %v2734_v21 = vmul.f32 0.17677669, %v2451_v19 }
 0x5e2   : > { %v2681_v20 = vpop.f32.mrf.mxu0  ;;  %v5408_v28 = vpop.f32.mrf.mxu1 }
 0x5e3   : > { %v2739_v25 = vmul.f32 0.17677669, %v2681_v20  ;;  %v2742_v42 = vadd.f32 %v2734_v21, %v7026_v4 }
 0x5e4   : > { %v5438_v26 = vpop.f32.mrf.mxu0  ;;  %v2454_v43 = vpop.f32.mrf.mxu1 }
 0x5e5   : > { %v7039_v36 = vadd.f32 %v2739_v25, %v7026_v4  ;;  %v2753_v46 = vsel %vm2749_vm12, %v2742_v42, -inf }
 0x5e6   : > { %v2684_v44 = vpop.f32.mrf.mxu0  ;;  %2754 = vmax.xlane.f32.xlu1 %v2753_v46  ;;  %v5409_v48 = vpop.f32.mrf.mxu1 }
 0x5e7   : > { %v2768_v45 = vsel %vm2749_vm12, %v7039_v36, -inf }
 0x5e8   : > { %v5439_v47 = vpop.f32.mrf.mxu0  ;;  %2769 = vmax.xlane.f32.xlu0 %v2768_v45  ;;  %v2497_v29 = vpop.f32.mrf.mxu1 }
 0x5e9   : > { %v2735_v30 = vmul.f32 0.17677669, %v2497_v29 }
 0x5ea   : > { %v5414_v50 = vpop.f32.mrf.mxu1 }
 0x5eb   : > { %v2743_v51 = vadd.f32 %v2735_v30, %v7026_v4 }
 0x5ec   : > { %v2500_v53 = vpop.f32.mrf.mxu1 }
 0x5ed   : > { %v2756_v54 = vsel %vm2749_vm12, %v2743_v51, -inf }
 0x5ee   : > { %2757 = vmax.xlane.f32.xlu0 %v2756_v54  ;;  %v5415_v55 = vpop.f32.mrf.mxu1 }
 0x5f0   : > { %v2543_v31 = vpop.f32.mrf.mxu1 }
 0x5f1   : > { %v2736_v32 = vmul.f32 0.17677669, %v2543_v31 }
 0x5f2   : > { %v5420_v34 = vpop.f32.mrf.mxu1 }
 0x5f3   : > { %v2744_v60 = vadd.f32 %v2736_v32, %v7026_v4 }
 0x5f4   : > { %v2546_v37 = vpop.f32.mrf.mxu1 }
 0x5f5   : > { %v2759_v41 = vsel %vm2749_vm12, %v2744_v60, -inf }
 0x5f6   : > { %2760 = vmax.xlane.f32.xlu0 %v2759_v41  ;;  %v5421_v57 = vpop.f32.mrf.mxu1 }
 0x5f7   : > { %2060 = vrot.lane.b32.xlu1 %v7053_v40, %s6240_s16 }
 0x5f8   : > { %v2635_v61 = vpop.f32.mrf.mxu1 }
 0x5f9   : > { %v2738_v2 = vmul.f32 0.17677669, %v2635_v61 }
 0x5fa   : > { %v5432_v63 = vpop.f32.mrf.mxu1 }
 0x5fb   : > { %2064 = vrot.lane.b32.xlu1 %v7059_v62, %s6239_s20  ;;  %v2746_v5 = vadd.f32 %v2738_v2, %v7026_v4 }
 0x5fc   : > { %v2638_v24 = vpop.f32.mrf.mxu1 }
 0x5fd   : > { %v2765_v27 = vsel %vm2749_vm12, %v2746_v5, -inf }
 0x5fe   : > { %v5433_v39 = vpop.f32.mrf.mxu1 }
 0x600   : > { %v2727_v38 = vpop.f32.mrf.mxu1 }
 0x601   : > { %v2740_v3 = vmul.f32 0.17677669, %v2727_v38 }
 0x602   : > { %v5444_v33 = vpop.f32.mrf.mxu1 }
 0x603   : > { %v2748_v6 = vadd.f32 %v2740_v3, %v7026_v4 }
 0x604   : > { %v2730_v0 = vpop.f32.mrf.mxu1 }
 0x605   : > { %v2771_v9 = vsel %vm2749_vm12, %v2748_v6, -inf }
 0x606   : > { %v5445_v1 = vpop.f32.mrf.mxu1 }
 0x60c   : > { %2058 = vrot.lane.b32.xlu0 %v7059_v62, %s6240_s16 }
 0x61f   : > { %2766 = vmax.xlane.f32.xlu1 %v2765_v27 }
 0x623   : > { %2772 = vmax.xlane.f32.xlu1 %v2771_v9 }
 0x634   : > { %2066 = vrot.lane.b32.xlu1 %v7053_v40, %s6239_s20 }
 0x665   : > { %v2752_v11 = vpop.xlane.xlu0 %2751 }
 0x666   : > { %v2774_v12 = vsub.f32 %v7029_v8, %v2752_v11 }
 0x668   : > { %v2782_v13 = vmul.f32 1.442695, %v2774_v12 }
 0x669   : > { %v2764_v20 = vpop.xlane.xlu0 %2763 }
 0x66a   : > { %5778 = vpow2.f32 %v2782_v13  ;;  %v2778_v26 = vsub.f32 %v7034_v7, %v2764_v20 }
 0x66f   : > { %v2755_v14 = vpop.xlane.xlu1 %2754 }
 0x670   : > { %v2775_v15 = vsub.f32 %v2742_v42, %v2755_v14  ;;  %v2790_v42 = vmul.f32 1.442695, %v2778_v26 }
 0x671   : > { %v2770_v8 = vpop.xlane.xlu0 %2769 }
 0x672   : > { %v2784_v16 = vmul.f32 1.442695, %v2775_v15  ;;  %v2780_v48 = vsub.f32 %v7039_v36, %v2770_v8 }
 0x673   : > { %v7085_v44 = vpop.permute.xlu1 %2060 }
 0x674   : > { %5780 = vpow2.f32 %v2784_v16 }
 0x677   : > { %v7072_v17 = vpop.eup %5778  ;;  %v2758_v21 = vpop.xlane.xlu0 %2757 }
 0x678   : > { %v2798_v4 = vsel %vm2749_vm12, %v7072_v17, 0.0  ;;  %v2776_v25 = vsub.f32 %v2743_v51, %v2758_v21  ;;  %v2065_v46 = vpop.permute.xlu1 %2064  ;;  %v2794_v51 = vmul.f32 1.442695, %v2780_v48 }
 0x679   : > { %2799 = vadd.xlane.f32.xlu0 %v2798_v4  ;;  %v2076_v38 = vcombine.low %v7059_v62, %v2065_v46  ;;  %v2077_v33 = vcombine.high %v7059_v62, %v2065_v46 }
 0x67a   : > { %v2786_v28 = vmul.f32 1.442695, %v2776_v25 }
 0x67b   : > { %v2084_v3 = vrot.slane %v2076_v38, %v6847_v52 }
 0x67c   : > { %5782 = vpow2.f32 %v2786_v28 }
 0x67d   : > { %5784 = vpow2.f32 %v2790_v42 }
 0x67f   : > { %v2761_v43 = vpop.xlane.xlu0 %2760 }
 0x680   : > { %v2777_v45 = vsub.f32 %v2744_v60, %v2761_v43 }
 0x681   : > { %v7076_v18 = vpop.eup %5780 }
 0x682   : > { %v2801_v19 = vsel %vm2749_vm12, %v7076_v18, 0.0  ;;  %v2788_v47 = vmul.f32 1.442695, %v2777_v45 }
 0x683   : > { %2802 = vadd.xlane.f32.xlu1 %v2801_v19  ;;  %v2059_v24 = vpop.permute.xlu0 %2058 }
 0x684   : > { %5786 = vpow2.f32 %v2788_v47 }
 0x689   : > { %v7088_v29 = vpop.eup %5782 }
 0x68a   : > { %v2804_v7 = vsel %vm2749_vm12, %v7088_v29, 0.0  ;;  %v7092_v54 = vpop.eup %5784 }
 0x68b   : > { %v2810_v36 = vsel %vm2749_vm12, %v7092_v54, 0.0 }
 0x68f   : > { %2070 = vrot.lane.b32.xlu0 %v7059_v62, %s6241_s22 }
 0x691   : > { %v7096_v34 = vpop.eup %5786 }
 0x692   : > { %v2807_v49 = vsel %vm2749_vm12, %v7096_v34, 0.0 }
 0x694   : > { %2072 = vrot.lane.b32.xlu1 %v7053_v40, %s6241_s22 }
 0x6a8   : > { %v2767_v30 = vpop.xlane.xlu1 %2766 }
 0x6a9   : > { %v2779_v50 = vsub.f32 %v2746_v5, %v2767_v30  ;;  %v2091_v5 = vrot.slane %v2077_v33, %v6847_v52 }
 0x6ab   : > { %v2792_v53 = vmul.f32 1.442695, %v2779_v50 }
 0x6ac   : > { %v2773_v55 = vpop.xlane.xlu1 %2772 }
 0x6ad   : > { %5788 = vpow2.f32 %v2792_v53  ;;  %v2781_v31 = vsub.f32 %v2748_v6, %v2773_v55 }
 0x6ae   : > { %2805 = vadd.xlane.f32.xlu0 %v2804_v7  ;;  %5790 = vpow2.f32 %v2794_v51 }
 0x6af   : > { %v2796_v32 = vmul.f32 1.442695, %v2781_v31 }
 0x6b0   : > { %v2067_v9 = vpop.permute.xlu1 %2066 }
 0x6b1   : > { %5792 = vpow2.f32 %v2796_v32  ;;  %v2144_v26 = vcombine.low %v7053_v40, %v2067_v9  ;;  %v2145_v46 = vcombine.high %v7053_v40, %v2067_v9 }
 0x6b2   : > { %2811 = vadd.xlane.f32.xlu0 %v2810_v36 }
 0x6b3   : > { %v2152_v53 = vrot.slane %v2144_v26, %v6847_v52  ;;  %v2159_v40 = vrot.slane %v2145_v46, %v6847_v52 }
 0x6b8   : > { %2808 = vadd.xlane.f32.xlu1 %v2807_v49 }
 0x6ba   : > { %v7100_v60 = vpop.eup %5788 }
 0x6bb   : > { %v2813_v37 = vsel %vm2749_vm12, %v7100_v60, 0.0  ;;  %v7104_v41 = vpop.eup %5790 }
 0x6bc   : > { %2814 = vadd.xlane.f32.xlu0 %v2813_v37  ;;  %v2816_v61 = vsel %vm2749_vm12, %v7104_v41, 0.0 }
 0x6be   : > { %v7106_v57 = vpop.eup %5792 }
 0x6bf   : > { %v2819_v63 = vsel %vm2749_vm12, %v7106_v57, 0.0 }
 0x6c0   : > { %2817 = vadd.xlane.f32.xlu0 %v2816_v61  ;;  %2820 = vadd.xlane.f32.xlu1 %v2819_v63 }
 0x702   : > { %v2800_v39 = vpop.xlane.xlu0 %2799 }
 0x703   : > { %5794 = vrcp.f32 %v2800_v39 }
 0x706   : > { %v2071_v0 = vpop.permute.xlu0 %2070 }
 0x707   : > { %v2092_v1 = vcombine.low %v2059_v24, %v2071_v0  ;;  %v2093_v2 = vcombine.high %v2059_v24, %v2071_v0 }
 0x709   : > { %v2100_v27 = vrot.slane %v2092_v1, %v6847_v52  ;;  %v2107_v6 = vrot.slane %v2093_v2, %v6847_v52 }
 0x70b   : > { %v2108_v11 = vcombine.low %v2084_v3, %v2100_v27  ;;  %v2109_v12 = vcombine.high %v2084_v3, %v2100_v27  ;;  %v2124_v13 = vcombine.low %v2091_v5, %v2107_v6  ;;  %v2125_v14 = vcombine.high %v2091_v5, %v2107_v6 }
 0x70c   : > { %v2803_v25 = vpop.xlane.xlu1 %2802 }
 0x70d   : > { %v2116_v15 = vrot.slane %v2108_v11, %v6851_v59  ;;  %v2123_v62 = vrot.slane %v2109_v12, %v6851_v59  ;;  %v2132_v16 = vrot.slane %v2124_v13, %v6851_v59  ;;  %v2139_v4 = vrot.slane %v2125_v14, %v6851_v59 }
 0x70e   : > { %5796 = vrcp.f32 %v2803_v25 }
 0x70f   : > { %v2212_v19 = vcombine.low %v2116_v15, %v2123_v62  ;;  %v5066_v20 = vcombine.high %v2116_v15, %v2123_v62  ;;  %v2228_v8 = vcombine.low %v2132_v16, %v2139_v4  ;;  %v5067_v21 = vcombine.high %v2132_v16, %v2139_v4 }
 0x710   : > { %v2073_v47 = vpop.permute.xlu1 %2072  ;;  %v5795_v31 = vpop.eup %5794 }
 0x711   : > { %v7124_v28 = vrot.slane %v2212_v19, %v6847_v52  ;;  %v7127_v42 = vrot.slane %v5066_v20, %v6847_v52  ;;  %v7130_v43 = vrot.slane %v2228_v8, %v6847_v52  ;;  %v7133_v45 = vrot.slane %v5067_v21, %v6847_v52 }
 0x712   : > { %v2160_v50 = vcombine.low %v7085_v44, %v2073_v47  ;;  %v2161_v51 = vcombine.high %v7085_v44, %v2073_v47  ;;  %v2830_v38 = vmul.f32 %v5795_v31, %v7072_v17 }
 0x713   : > { %v2244_v48 = vcombine.low %v7124_v28, %v7127_v42  ;;  %v2260_v30 = vcombine.low %v7130_v43, %v7133_v45 }
 0x714   : > { %v2168_v32 = vrot.slane %v2160_v50, %v6847_v52  ;;  %v2175_v36 = vrot.slane %v2161_v51, %v6847_v52  ;;  %v2838_v12 = vpack.c.bf16 %v2830_v38, %v2830_v38 }
 0x715   : > { %v2252_v7 = vrot.slane %v2244_v48, %v6851_v59  ;;  %v2268_v55 = vrot.slane %v2260_v30, %v6851_v59 }
 0x716   : > { %v2176_v61 = vcombine.low %v2152_v53, %v2168_v32  ;;  %v2177_v63 = vcombine.high %v2152_v53, %v2168_v32  ;;  %v2192_v44 = vcombine.low %v2159_v40, %v2175_v36  ;;  %v2193_v24 = vcombine.high %v2159_v40, %v2175_v36 }
 0x717   : > { %v2276_v49 = vcombine.low %v2252_v7, %v2268_v55  ;;  %v2277_v37 = vcombine.high %v2252_v7, %v2268_v55  ;;  %v2261_v53 = vcombine.high %v7130_v43, %v7133_v45 }
 0x718   : > { %v2184_v33 = vrot.slane %v2176_v61, %v6851_v59  ;;  %v2191_v0 = vrot.slane %v2177_v63, %v6851_v59  ;;  %v2200_v1 = vrot.slane %v2192_v44, %v6851_v59  ;;  %v2207_v2 = vrot.slane %v2193_v24, %v6851_v59 }
 0x719   : > { %v2846_v39 = vpack.c.bf16 %v2276_v49, %v2276_v49  ;;  %v2848_v5 = vpack.c.bf16 %v2277_v37, %v2277_v37  ;;  %v2275_v31 = vrot.slane %v2261_v53, %v6851_v59 }
 0x71a   : > { %v2280_v27 = vcombine.low %v2184_v33, %v2191_v0  ;;  %v5068_v6 = vcombine.high %v2184_v33, %v2191_v0  ;;  %v2296_v9 = vcombine.low %v2200_v1, %v2207_v2  ;;  %v5069_v11 = vcombine.high %v2200_v1, %v2207_v2 }
 0x71b   : > { %v2859_v3 = vsel %vm2857_vm13, %v2846_v39, 0  ;;  %v2951_v62 = vsel %vm2857_vm13, %v2848_v5, 0  ;;  %v5797_v8 = vpop.eup %5796 }
 0x71c   : > { %5447 = vmatpush3.bf16.msra.mxu0 %v2859_v3  ;;  %v2287_v17 = vrot.slane %v2280_v27, %v6847_v52  ;;  %v2295_v13 = vrot.slane %v5068_v6, %v6847_v52  ;;  %v2303_v14 = vrot.slane %v2296_v9, %v6847_v52  ;;  %v2311_v15 = vrot.slane %v5069_v11, %v6847_v52 }
 0x71d   : > { %5458 = vmatprep.subr.bf16.mxu0 %v6236_v35  ;;  %v2831_v46 = vmul.f32 %v5797_v8, %v7076_v18  ;;  %v2245_v18 = vcombine.high %v7124_v28, %v7127_v42  ;;  %v5688_v8 = vld [vmem:[%s6682_s12 + $0x28] sm:$0xff]  }
 0x71e   : > { %v2312_v16 = vcombine.low %v2287_v17, %v2295_v13  ;;  %v2328_v4 = vcombine.low %v2303_v14, %v2311_v15  ;;  %v2313_v63 = vcombine.high %v2287_v17, %v2295_v13  ;;  %v2329_v44 = vcombine.high %v2303_v14, %v2311_v15 }
 0x71f   : > { %5449 = vmatmul.mubr.msk.bf16.vlgmr.msra.gmra.mxu0 %vm2749_vm12, %v2838_v12  ;;  %v2839_v30 = vpack.c.bf16 %v2831_v46, %v2831_v46  ;;  %v2259_v55 = vrot.slane %v2245_v18, %v6851_v59 }
 0x720   : > { %5459 = vmatpush3.bf16.msra.mxu0 %v2951_v62  ;;  %5460 = vmatprep.mubr.msk.bf16.mxu0 %vm6238_vm10, %v6236_v35  ;;  %v2320_v19 = vrot.slane %v2312_v16, %v6851_v59  ;;  %v2336_v20 = vrot.slane %v2328_v4, %v6851_v59  ;;  %v2327_v39 = vrot.slane %v2313_v63, %v6851_v59 }
 0x721   : > { %5470 = vmatprep.subr.bf16.mxu0 %v6236_v35  ;;  %v2278_v40 = vcombine.low %v2259_v55, %v2275_v31  ;;  %v2279_v45 = vcombine.high %v2259_v55, %v2275_v31 }
 0x722   : > { %v2344_v21 = vcombine.low %v2320_v19, %v2336_v20  ;;  %v2345_v25 = vcombine.high %v2320_v19, %v2336_v20  ;;  %v5686_v19 = vld [vmem:[%s6682_s12 + $0x38] sm:$0xff]   ;;  %v5687_v20 = vld [vmem:[%s6682_s12 + $0x30] sm:$0xff]  }
 0x723   : > { %v2850_v37 = vpack.c.bf16 %v2278_v40, %v2278_v40  ;;  %v2852_v0 = vpack.c.bf16 %v2279_v45, %v2279_v45 }
 0x724   : > { %v2847_v26 = vpack.c.bf16 %v2344_v21, %v2344_v21  ;;  %v2849_v48 = vpack.c.bf16 %v2345_v25, %v2345_v25  ;;  %v5689_v21 = vld [vmem:[%s6682_s12 + $0x20] sm:$0xff]   ;;  %v5691_v25 = vld [vmem:[%s6682_s12 + $0x10] sm:$0xff]  }
 0x725   : > { %v3043_v43 = vsel %vm2857_vm13, %v2850_v37, 0  ;;  %v3135_v5 = vsel %vm2857_vm13, %v2852_v0, 0 }
 0x726   : > { %v2905_v47 = vsel %vm2857_vm13, %v2847_v26, 0  ;;  %v2997_v50 = vsel %vm2857_vm13, %v2849_v48, 0 }
 0x727   : > { %5453 = vmatpush3.bf16.msra.mxu1 %v2905_v47 }
 0x728   : > { %5464 = vmatprep.subr.bf16.mxu1 %v6236_v35 }
 0x72a   : > { %5455 = vmatmul.mubr.msk.bf16.vlgmr.msra.gmra.mxu1 %vm2749_vm12, %v2839_v30 }
 0x72b   : > { %5465 = vmatpush3.bf16.msra.mxu1 %v2997_v50  ;;  %5466 = vmatprep.mubr.msk.bf16.mxu1 %vm6238_vm10, %v6236_v35 }
 0x72c   : > { %5476 = vmatprep.subr.bf16.mxu1 %v6236_v35 }
 0x737   : > { %v2806_v51 = vpop.xlane.xlu0 %2805 }
 0x738   : > { %5798 = vrcp.f32 %v2806_v51 }
 0x73b   : > { %v2812_v7 = vpop.xlane.xlu0 %2811 }
 0x73c   : > { %5800 = vrcp.f32 %v2812_v7 }
 0x741   : > { %v2809_v32 = vpop.xlane.xlu1 %2808 }
 0x742   : > { %5802 = vrcp.f32 %v2809_v32 }
 0x745   : > { %v5799_v36 = vpop.eup %5798  ;;  %v2815_v61 = vpop.xlane.xlu0 %2814 }
 0x746   : > { %v2832_v49 = vmul.f32 %v5799_v36, %v7088_v29  ;;  %5804 = vrcp.f32 %v2815_v61  ;;  %v2343_v29 = vrot.slane %v2329_v44, %v6851_v59 }
 0x748   : > { %v2840_v28 = vpack.c.bf16 %v2832_v49, %v2832_v49  ;;  %v2346_v1 = vcombine.low %v2327_v39, %v2343_v29  ;;  %v2347_v12 = vcombine.high %v2327_v39, %v2343_v29 }
 0x749   : > { %v5801_v42 = vpop.eup %5800  ;;  %v2818_v24 = vpop.xlane.xlu0 %2817 }
 0x74a   : > { %5461 = vmatmul.mubr.msk.bf16.vlgmr.msra.gmra.mxu0 %vm2749_vm12, %v2840_v28  ;;  %5806 = vrcp.f32 %v2818_v24  ;;  %v2834_v38 = vmul.f32 %v5801_v42, %v7092_v54  ;;  %v2821_v33 = vpop.xlane.xlu1 %2820  ;;  %v2851_v6 = vpack.c.bf16 %v2346_v1, %v2346_v1  ;;  %v2853_v14 = vpack.c.bf16 %v2347_v12, %v2347_v12 }
 0x74b   : > { %5471 = vmatpush3.bf16.msra.mxu0 %v3043_v43  ;;  %5472 = vmatprep.mubr.msk.bf16.mxu0 %vm6238_vm10, %v6236_v35  ;;  %5808 = vrcp.f32 %v2821_v33 }
 0x74c   : > { %5482 = vmatprep.subr.bf16.mxu0 %v6236_v35  ;;  %v2842_v2 = vpack.c.bf16 %v2834_v38, %v2834_v38  ;;  %v3089_v11 = vsel %vm2857_vm13, %v2851_v6, 0  ;;  %v3181_v4 = vsel %vm2857_vm13, %v2853_v14, 0 }
 0x74f   : > { %v5803_v3 = vpop.eup %5802 }
 0x750   : > { %v2833_v27 = vmul.f32 %v5803_v3, %v7096_v34 }
 0x752   : > { %5473 = vmatmul.mubr.msk.bf16.vlgmr.msra.gmra.mxu0 %vm2749_vm12, %v2842_v2  ;;  %v2841_v54 = vpack.c.bf16 %v2833_v27, %v2833_v27 }
 0x753   : > { %5483 = vmatpush3.bf16.msra.mxu0 %v3135_v5  ;;  %5484 = vmatprep.mubr.msk.bf16.mxu0 %vm6238_vm10, %v6236_v35  ;;  %v5805_v9 = vpop.eup %5804 }
 0x754   : > { %5494 = vmatprep.subr.bf16.mxu0 %v6236_v35  ;;  %5467 = vmatmul.mubr.msk.bf16.vlgmr.msra.gmra.mxu1 %vm2749_vm12, %v2841_v54  ;;  %v2835_v34 = vmul.f32 %v5805_v9, %v7100_v60 }
 0x755   : > { %5477 = vmatpush3.bf16.msra.mxu1 %v3089_v11  ;;  %5478 = vmatprep.mubr.msk.bf16.mxu1 %vm6238_vm10, %v6236_v35 }
 0x756   : > { %5488 = vmatprep.subr.bf16.mxu1 %v6236_v35  ;;  %v2843_v62 = vpack.c.bf16 %v2835_v34, %v2835_v34 }
 0x757   : > { %v5807_v17 = vpop.eup %5806 }
 0x758   : > { %v2836_v13 = vmul.f32 %v5807_v17, %v7104_v41  ;;  %v5809_v16 = vpop.eup %5808 }
 0x759   : > { %v2837_v60 = vmul.f32 %v5809_v16, %v7106_v57  ;;  %v5690_v57 = vld [vmem:[%s6682_s12 + $0x18] sm:$0xff]  }
 0x75a   : > { %v2844_v15 = vpack.c.bf16 %v2836_v13, %v2836_v13 }
 0x75b   : > { %v2845_v41 = vpack.c.bf16 %v2837_v60, %v2837_v60 }
 0x75c   : > { %5485 = vmatmul.mubr.msk.bf16.vlgmr.msra.gmra.mxu0 %vm2749_vm12, %v2844_v15  ;;  %5479 = vmatmul.mubr.msk.bf16.vlgmr.msra.gmra.mxu1 %vm2749_vm12, %v2843_v62 }
 0x75d   : > { %5510 = vmatprep.mubr.msk.bf16.mxu0 %vm6238_vm10, %v6236_v35  ;;  %5489 = vmatpush3.bf16.msra.mxu1 %v3181_v4 }
 0x75e   : > { %5490 = vmatprep.mubr.msk.bf16.mxu1 %vm6238_vm10, %v6236_v35  ;;  %5495 = vmatpush3.bf16.msra.mxu0 %v5686_v19 }
 0x75f   : > { %5496 = vmatprep.subr.bf16.mxu0 %v6236_v35 }
 0x762   : > { %5497 = vmatpush3.bf16.msra.mxu0 %v5687_v20 }
 0x763   : > { %5498 = vmatprep.subr.bf16.mxu0 %v6236_v35 }
 0x764   : > { %5491 = vmatmul.mubr.msk.bf16.vlgmr.msra.gmra.mxu1 %vm2749_vm12, %v2845_v41 }
 0x765   : > { %3929 = vmatprep.mubr.bf16.mxu1 %v6237_v58 }
 0x766   : > { %5499 = vmatpush3.bf16.msra.mxu0 %v5688_v8 }
 0x767   : > { %5500 = vmatprep.subr.bf16.mxu0 %v6236_v35 }
 0x76a   : > { %5501 = vmatpush3.bf16.msra.mxu0 %v5689_v21 }
 0x76b   : > { %5502 = vmatprep.subr.bf16.mxu0 %v6236_v35 }
 0x76e   : > { %5503 = vmatpush3.bf16.msra.mxu0 %v5690_v57 }
 0x76f   : > { %5504 = vmatprep.subr.bf16.mxu0 %v6236_v35 }
 0x772   : > { %5505 = vmatpush3.bf16.msra.mxu0 %v5691_v25 }
 0x773   : > { %5506 = vmatprep.subr.bf16.mxu0 %v6236_v35 }
 0x7df   : > { %v2895_v26 = vpop.f32.mrf.mxu0 }
 0x7e1   : > { %v5450_v46 = vpop.f32.mrf.mxu0 }
 0x7e3   : > { %v2898_v47 = vpop.f32.mrf.mxu0 }
 0x7e5   : > { %v5451_v48 = vpop.f32.mrf.mxu0 }
 0x7ea   : > { %v2941_v30 = vpop.f32.mrf.mxu1 }
 0x7ec   : > { %v5456_v50 = vpop.f32.mrf.mxu1 }
 0x7ee   : > { %v2944_v51 = vpop.f32.mrf.mxu1 }
 0x7f0   : > { %v5457_v18 = vpop.f32.mrf.mxu1 }
 0x80a   : > { %v2987_v53 = vpop.f32.mrf.mxu0 }
 0x80c   : > { %v5462_v7 = vpop.f32.mrf.mxu0 }
 0x80e   : > { %v2990_v55 = vpop.f32.mrf.mxu0 }
 0x810   : > { %v5463_v31 = vpop.f32.mrf.mxu0 }
 0x812   : > { %v3079_v40 = vpop.f32.mrf.mxu0 }
 0x813   : > { %v3223_v44 = vcombine.low %v2895_v26, %v3079_v40  ;;  %v3224_v28 = vcombine.high %v2895_v26, %v3079_v40 }
 0x814   : > { %v5474_v32 = vpop.f32.mrf.mxu0  ;;  %v3033_v49 = vpop.f32.mrf.mxu1 }
 0x815   : > { %v3231_v38 = vrot.slane %v3223_v44, %v6847_v52  ;;  %v3238_v33 = vrot.slane %v3224_v28, %v6847_v52 }
 0x816   : > { %v3082_v36 = vpop.f32.mrf.mxu0  ;;  %v5468_v61 = vpop.f32.mrf.mxu1 }
 0x818   : > { %v5475_v37 = vpop.f32.mrf.mxu0  ;;  %v3036_v63 = vpop.f32.mrf.mxu1 }
 0x81a   : > { %v5469_v42 = vpop.f32.mrf.mxu1 }
 0x81c   : > { %v3171_v43 = vpop.f32.mrf.mxu0  ;;  %v3125_v45 = vpop.f32.mrf.mxu1 }
 0x81d   : > { %v3239_v24 = vcombine.low %v2987_v53, %v3171_v43  ;;  %v3240_v39 = vcombine.high %v2987_v53, %v3171_v43  ;;  %v3291_v15 = vcombine.low %v2941_v30, %v3125_v45  ;;  %v3292_v62 = vcombine.high %v2941_v30, %v3125_v45 }
 0x81e   : > { %v5486_v29 = vpop.f32.mrf.mxu0  ;;  %v5480_v2 = vpop.f32.mrf.mxu1 }
 0x81f   : > { %v3247_v0 = vrot.slane %v3239_v24, %v6847_v52  ;;  %v3254_v1 = vrot.slane %v3240_v39, %v6847_v52  ;;  %v3299_v47 = vrot.slane %v3291_v15, %v6847_v52  ;;  %v3306_v48 = vrot.slane %v3292_v62, %v6847_v52 }
 0x820   : > { %v3174_v3 = vpop.f32.mrf.mxu0  ;;  %v3128_v9 = vpop.f32.mrf.mxu1 }
 0x821   : > { %v3255_v5 = vcombine.low %v3231_v38, %v3247_v0  ;;  %v3256_v27 = vcombine.high %v3231_v38, %v3247_v0  ;;  %v3271_v6 = vcombine.low %v3238_v33, %v3254_v1  ;;  %v3272_v54 = vcombine.high %v3238_v33, %v3254_v1  ;;  %v5692_v38 = vld [vmem:[%s6682_s12 + $0x8] sm:$0xff]  }
 0x822   : > { %v5487_v11 = vpop.f32.mrf.mxu0  ;;  %v5481_v14 = vpop.f32.mrf.mxu1  ;;  %5507 = vmatpush3.bf16.msra.mxu0 %v5692_v38 }
 0x823   : > { %v3263_v12 = vrot.slane %v3255_v5, %v6851_v59  ;;  %v3270_v17 = vrot.slane %v3256_v27, %v6851_v59  ;;  %v3279_v34 = vrot.slane %v3271_v6, %v6851_v59  ;;  %v3286_v13 = vrot.slane %v3272_v54, %v6851_v59  ;;  %5508 = vmatprep.subr.bf16.mxu0 %v6236_v35 }
 0x824   : > { %v3217_v19 = vpop.f32.mrf.mxu1 }
 0x825   : > { %v3359_v16 = vcombine.low %v3263_v12, %v3270_v17  ;;  %v5086_v4 = vcombine.high %v3263_v12, %v3270_v17  ;;  %v3375_v60 = vcombine.low %v3279_v34, %v3286_v13  ;;  %v5087_v41 = vcombine.high %v3279_v34, %v3286_v13 }
 0x826   : > { %v3307_v20 = vcombine.low %v3033_v49, %v3217_v19  ;;  %v3308_v8 = vcombine.high %v3033_v49, %v3217_v19  ;;  %v5492_v46 = vpop.f32.mrf.mxu1 }
 0x827   : > { %v3366_v21 = vrot.slane %v3359_v16, %v6847_v52  ;;  %v3374_v57 = vrot.slane %v5086_v4, %v6847_v52  ;;  %v3382_v25 = vrot.slane %v3375_v60, %v6847_v52  ;;  %v3390_v26 = vrot.slane %v5087_v41, %v6847_v52 }
 0x828   : > { %v3315_v30 = vrot.slane %v3307_v20, %v6847_v52  ;;  %v3322_v50 = vrot.slane %v3308_v8, %v6847_v52  ;;  %v3220_v51 = vpop.f32.mrf.mxu1 }
 0x829   : > { %v3391_v18 = vcombine.low %v3366_v21, %v3374_v57  ;;  %v3407_v53 = vcombine.low %v3382_v25, %v3390_v26  ;;  %v3392_v28 = vcombine.high %v3366_v21, %v3374_v57  ;;  %v3408_v42 = vcombine.high %v3382_v25, %v3390_v26 }
 0x82a   : > { %v3323_v7 = vcombine.low %v3299_v47, %v3315_v30  ;;  %v3324_v55 = vcombine.high %v3299_v47, %v3315_v30  ;;  %v3339_v31 = vcombine.low %v3306_v48, %v3322_v50  ;;  %v3340_v40 = vcombine.high %v3306_v48, %v3322_v50  ;;  %v5493_v32 = vpop.f32.mrf.mxu1 }
 0x82b   : > { %v3399_v36 = vrot.slane %v3391_v18, %v6851_v59  ;;  %v3415_v49 = vrot.slane %v3407_v53, %v6851_v59  ;;  %v3406_v3 = vrot.slane %v3392_v28, %v6851_v59  ;;  %v3422_v5 = vrot.slane %v3408_v42, %v6851_v59  ;;  %v5694_v28 = vld [vmem:[%s6689_s2 + $0xe0] ss:$16 sps:$4 sm:$0xff]   ;;  %v5696_v42 = vld [vmem:[%s6689_s2 + $0xe4] ss:$16 sps:$4 sm:$0xff]  }
 0x82c   : > { %v3331_v37 = vrot.slane %v3323_v7, %v6851_v59  ;;  %v3338_v61 = vrot.slane %v3324_v55, %v6851_v59  ;;  %v3347_v63 = vrot.slane %v3339_v31, %v6851_v59  ;;  %v3354_v44 = vrot.slane %v3340_v40, %v6851_v59  ;;  %v5090_v55 = vld [vmem:[%s887_s10] ss:$0 sm:$0xff]  ;;  %3897 = vmatprep.subr.bf16.mxu1 %v5696_v42  ;;  %v5744_v42 = vld [vmem:[%s6691_s27 + $0x38] sm:$0xff]  }
 0x82d   : > { %v3423_v43 = vcombine.low %v3399_v36, %v3415_v49  ;;  %v3425_v13 = vcombine.low %v3406_v3, %v3422_v5  ;;  %v3424_v15 = vcombine.high %v3399_v36, %v3415_v49  ;;  %v3426_v35 = vcombine.high %v3406_v3, %v3422_v5  ;;  %v5830_v36 = vld [vmem:[#allocation2] sm:$0xff]  ;;  %3898 = vmatpush1.bf16.msra.mxu1 %v5694_v28 }
 0x82e   : > { %v3427_v45 = vcombine.low %v3331_v37, %v3338_v61  ;;  %v5088_v24 = vcombine.high %v3331_v37, %v3338_v61  ;;  %v3443_v39 = vcombine.low %v3347_v63, %v3354_v44  ;;  %v5089_v29 = vcombine.high %v3347_v63, %v3354_v44  ;;  %v5831_v44 = vld [vmem:[#allocation2 + $0x8] sm:$0xff]  ;;  %v5700_v3 = vld [vmem:[%s6689_s2 + $0xc0] ss:$16 sps:$4 sm:$0xff]   ;;  %v5743_v28 = vld [vmem:[%s6691_s27 + $0xf8] sm:$0xff]  }
 0x82f   : > { %v5702_v5 = vld [vmem:[%s6689_s2 + $0xc4] ss:$16 sps:$4 sm:$0xff]  }
 0x830   : > { %v3434_v33 = vrot.slane %v3427_v45, %v6847_v52  ;;  %v3442_v0 = vrot.slane %v5088_v24, %v6847_v52  ;;  %v3450_v1 = vrot.slane %v3443_v39, %v6847_v52  ;;  %v3458_v2 = vrot.slane %v5089_v29, %v6847_v52  ;;  %v5693_v52 = vld [vmem:[%s6682_s12] sm:$0xff]   ;;  %v5699_v45 = vld [vmem:[%s6689_s2 + $0xec] ss:$16 sps:$4 sm:$0xff]   ;;  %3899 = vmatprep.subr.bf16.mxu1 %v5702_v5 }
 0x831   : > { %5509 = vmatpush3.bf16.msra.mxu0 %v5693_v52  ;;  %3900 = vmatpush1.bf16.msra.mxu1 %v5700_v3  ;;  %v5712_v52 = vld [vmem:[%s6689_s2 + $0x80] ss:$16 sps:$4 sm:$0xff]  }
 0x832   : > { %v3460_v27 = vcombine.high %v3434_v33, %v3442_v0  ;;  %v3476_v6 = vcombine.high %v3450_v1, %v3458_v2  ;;  %v3459_v54 = vcombine.low %v3434_v33, %v3442_v0  ;;  %v3475_v9 = vcombine.low %v3450_v1, %v3458_v2  ;;  %3940 = vmatprep.subr.bf16.mxu0 %v5699_v45  ;;  %v5746_v45 = vld [vmem:[%s6691_s27 + $0x70] sm:$0xff]   ;;  %v5755_v3 = vld [vmem:[%s6691_s27 + $0xe0] sm:$0xff]  }
 0x833   : > { %v5756_v5 = vld [vmem:[%s6691_s27 + $0x20] sm:$0xff]  }
 0x834   : > { %v3474_v11 = vrot.slane %v3460_v27, %v6851_v59  ;;  %v3490_v12 = vrot.slane %v3476_v6, %v6851_v59  ;;  %v3467_v17 = vrot.slane %v3459_v54, %v6851_v59  ;;  %v3483_v34 = vrot.slane %v3475_v9, %v6851_v59  ;;  %v5703_v27 = vld [vmem:[%s6689_s2 + $0xc8] ss:$16 sps:$4 sm:$0xff]   ;;  %v5705_v6 = vld [vmem:[%s6689_s2 + $0xcc] ss:$16 sps:$4 sm:$0xff]   ;;  %v5706_v54 = vld [vmem:[%s6689_s2 + $0xa0] ss:$16 sps:$4 sm:$0xff]  }
 0x835   : > { %v5708_v9 = vld [vmem:[%s6689_s2 + $0xa4] ss:$16 sps:$4 sm:$0xff]  }
 0x836   : > { %v3493_v14 = vcombine.low %v3474_v11, %v3490_v12  ;;  %v3492_v62 = vcombine.high %v3467_v17, %v3483_v34  ;;  %v3491_v16 = vcombine.low %v3467_v17, %v3483_v34  ;;  %v3494_v41 = vcombine.high %v3474_v11, %v3490_v12  ;;  %v5709_v11 = vld [vmem:[%s6689_s2 + $0xa8] ss:$16 sps:$4 sm:$0xff]   ;;  %v5711_v12 = vld [vmem:[%s6689_s2 + $0xac] ss:$16 sps:$4 sm:$0xff]   ;;  %v5714_v17 = vld [vmem:[%s6689_s2 + $0x84] ss:$16 sps:$4 sm:$0xff]   ;;  %3901 = vmatprep.subr.bf16.mxu1 %v5708_v9 }
 0x837   : > { %v5717_v34 = vld [vmem:[%s6689_s2 + $0x8c] ss:$16 sps:$4 sm:$0xff]   ;;  %3902 = vmatpush1.bf16.msra.mxu1 %v5706_v54 }
 0x838   : > { %v5644_v4 = vpack.i.bf16 %v3493_v14, %v3425_v13  ;;  %v5639_v60 = vpack.i.bf16 %v3492_v62, %v3424_v15  ;;  %v5649_v19 = vpack.i.bf16 %v3494_v41, %v3426_v35  ;;  %3903 = vmatprep.subr.bf16.mxu1 %v5714_v17  ;;  %v5715_v13 = vld [vmem:[%s6689_s2 + $0x88] ss:$16 sps:$4 sm:$0xff]   ;;  %v5720_v14 = vld [vmem:[%s6689_s2 + $0x64] ss:$16 sps:$4 sm:$0xff]   ;;  %v5723_v15 = vld [vmem:[%s6689_s2 + $0x6c] ss:$16 sps:$4 sm:$0xff]  }
 0x839   : > { %v5718_v62 = vld [vmem:[%s6689_s2 + $0x60] ss:$16 sps:$4 sm:$0xff]   ;;  %v5727_v35 = vld [vmem:[%s6689_s2 + $0x48] ss:$16 sps:$4 sm:$0xff]  }
 0x83a   : > { %5645 = vrot.lane.b32.xlu1 %v5644_v4, %s6239_s20  ;;  %5640 = vrot.lane.b32.xlu0 %v5639_v60, %s6241_s22  ;;  %v5726_v4 = vld [vmem:[%s6689_s2 + $0x44] ss:$16 sps:$4 sm:$0xff]   ;;  %v5729_v60 = vld [vmem:[%s6689_s2 + $0x4c] ss:$16 sps:$4 sm:$0xff]  }
 0x83b   : > { %3904 = vmatpush1.bf16.msra.mxu1 %v5712_v52  ;;  %v5724_v41 = vld [vmem:[%s6689_s2 + $0x40] ss:$16 sps:$4 sm:$0xff]   ;;  %v5759_v54 = vld [vmem:[%s6691_s27 + $0xd8] sm:$0xff]  }
 0x83c   : > { %3905 = vmatprep.subr.bf16.mxu1 %v5720_v14  ;;  %v5760_v9 = vld [vmem:[%s6691_s27 + $0x18] sm:$0xff]   ;;  %v5763_v17 = vld [vmem:[%s6691_s27 + $0xd0] sm:$0xff]   ;;  %v5767_v14 = vld [vmem:[%s6691_s27 + $0xc8] sm:$0xff]  }
 0x83d   : > { %v5765_v52 = vld [vmem:[%s6691_s27 + $0x90] sm:$0xff]  }
 0x83e   : > { %5650 = vrot.lane.b32.xlu1 %v5649_v19, %s6240_s16  ;;  %v5732_v19 = vld [vmem:[%s6689_s2 + $0x24] ss:$16 sps:$4 sm:$0xff]  }
 0x83f   : > { %3906 = vmatpush1.bf16.msra.mxu1 %v5718_v62  ;;  %v5769_v62 = vld [vmem:[%s6691_s27 + $0x88] sm:$0xff]  }
 0x840   : > { %3907 = vmatprep.subr.bf16.mxu1 %v5726_v4  ;;  %v5771_v4 = vld [vmem:[%s6691_s27 + $0xc0] sm:$0xff]  }
 0x843   : > { %3908 = vmatpush1.bf16.msra.mxu1 %v5724_v41  ;;  %v5773_v41 = vld [vmem:[%s6691_s27 + $0x80] sm:$0xff]  }
 0x844   : > { %3909 = vmatprep.subr.bf16.mxu1 %v5732_v19  ;;  %v3731_v19 = vsub.s32 3, %v6802_v22 }
 0x8ac   : > { %v5646_v20 = vpop.permute.xlu1 %5645  ;;  %v5641_v59 = vpop.permute.xlu0 %5640 }
 0x8ad   : > { %v5643_v8 = vunpack.i.h.bf16 %v5641_v59  ;;  %v5642_v21 = vunpack.i.l.bf16 %v5641_v59  ;;  %v5648_v57 = vunpack.i.h.bf16 %v5646_v20  ;;  %v5647_v25 = vunpack.i.l.bf16 %v5646_v20  ;;  %v5735_v20 = vld [vmem:[%s6689_s2 + $0x2c] ss:$16 sps:$4 sm:$0xff]   ;;  %v5730_v59 = vld [vmem:[%s6689_s2 + $0x20] ss:$16 sps:$4 sm:$0xff]  }
 0x8ae   : > { %3910 = vmatpush1.bf16.msra.mxu1 %v5730_v59 }
 0x8af   : > { %v3519_v26 = vsel %vm2364_vm11, %v3423_v43, %v5642_v21  ;;  %v3520_v46 = vsel %vm2364_vm11, %v3491_v16, %v5643_v8  ;;  %v5697_v43 = vld [vmem:[%s6689_s2 + $0xe8] ss:$16 sps:$4 sm:$0xff]   ;;  %v5738_v21 = vld [vmem:[%s6689_s2 + $0x4] ss:$16 sps:$4 sm:$0xff]  }
 0x8b0   : > { %v5651_v47 = vpop.permute.xlu1 %5650  ;;  %v3522_v50 = vsel %vm3521_vm14, %v3519_v26, %v5647_v25  ;;  %v3523_v51 = vsel %vm3521_vm14, %v3520_v46, %v5648_v57  ;;  %v5721_v16 = vld [vmem:[%s6689_s2 + $0x68] ss:$16 sps:$4 sm:$0xff]   ;;  %v5741_v57 = vld [vmem:[%s6689_s2 + $0xc] ss:$16 sps:$4 sm:$0xff]   ;;  %v5736_v25 = vld [vmem:[%s6689_s2] ss:$16 sps:$4 sm:$0xff]   ;;  %3911 = vmatprep.subr.bf16.mxu1 %v5738_v21 }
 0x8b1   : > { %v5653_v48 = vunpack.i.h.bf16 %v5651_v47  ;;  %v5652_v30 = vunpack.i.l.bf16 %v5651_v47  ;;  %v5733_v8 = vld [vmem:[%s6689_s2 + $0x28] ss:$16 sps:$4 sm:$0xff]  }
 0x8b2   : > { %v5739_v26 = vld [vmem:[%s6689_s2 + $0x8] ss:$16 sps:$4 sm:$0xff]   ;;  %3912 = vmatpush1.bf16.msra.mxu1 %v5736_v25 }
 0x8b3   : > { %v3525_v18 = vsel %vm3524_vm15, %v3522_v50, %v5652_v30  ;;  %v3526_v53 = vsel %vm3524_vm15, %v3523_v51, %v5653_v48 }
 0x8b4   : > { %v3543_v7 = vpack.c.bf16 %v3526_v53, %v3525_v18 }
 0x8b6   : > { %5511 = vmatmul.mubr.bf16.vlgmr.msra.gmra.mxu0 %v3543_v7  ;;  %v5099_v7 = vld [vmem:[%s890_s23] ss:$0 sm:$0xff] }
 0x8b7   : > { %3972 = vmatprep.mubr.bf16.mxu0 %v6237_v58  ;;  %3941 = vmatpush1.bf16.msra.mxu0 %v5697_v43  ;;  %v5745_v43 = vld [vmem:[%s6691_s27 + $0xb8] sm:$0xff]  }
 0x8b8   : > { %3942 = vmatprep.subr.bf16.mxu0 %v5705_v6  ;;  %v5758_v6 = vld [vmem:[%s6691_s27 + $0x58] sm:$0xff]  }
 0x8bb   : > { %3943 = vmatpush1.bf16.msra.mxu0 %v5703_v27  ;;  %v5757_v27 = vld [vmem:[%s6691_s27 + $0xa0] sm:$0xff]  }
 0x8bc   : > { %3944 = vmatprep.subr.bf16.mxu0 %v5711_v12  ;;  %v5762_v12 = vld [vmem:[%s6691_s27 + $0x50] sm:$0xff]  }
 0x8bf   : > { %3945 = vmatpush1.bf16.msra.mxu0 %v5709_v11  ;;  %v5761_v11 = vld [vmem:[%s6691_s27 + $0x98] sm:$0xff]  }
 0x8c0   : > { %3946 = vmatprep.subr.bf16.mxu0 %v5717_v34  ;;  %v5764_v34 = vld [vmem:[%s6691_s27 + $0x10] sm:$0xff]  }
 0x8c3   : > { %3947 = vmatpush1.bf16.msra.mxu0 %v5715_v13  ;;  %v5766_v13 = vld [vmem:[%s6691_s27 + $0x48] sm:$0xff]  }
 0x8c4   : > { %3948 = vmatprep.subr.bf16.mxu0 %v5723_v15  ;;  %v5768_v15 = vld [vmem:[%s6691_s27 + $0x8] sm:$0xff]  }
 0x8c7   : > { %3949 = vmatpush1.bf16.msra.mxu0 %v5721_v16  ;;  %v5770_v16 = vld [vmem:[%s6691_s27 + $0x40] sm:$0xff]  }
 0x8c8   : > { %3950 = vmatprep.subr.bf16.mxu0 %v5729_v60  ;;  %v5772_v60 = vld [vmem:[%s6691_s27] sm:$0xff]  }
 0x8cb   : > { %3951 = vmatpush1.bf16.msra.mxu0 %v5727_v35  ;;  %v3715_v35 = vld [vmem:[%s6721_s4] sm:$0xf] }
 0x8cc   : > { %3952 = vmatprep.subr.bf16.mxu0 %v5735_v20  ;;  %v3720_v20 = vrot.slane %v3715_v35, %v1247_v23  ;;  %v3728_v59 = vrot.slane %v3715_v35, %v1255_v56  ;;  %v3732_v25 = vrot.slane %v3715_v35, %v3731_v19 }
 0x8cf   : > { %3953 = vmatpush1.bf16.msra.mxu0 %v5733_v8 }
 0x8d0   : > { %3954 = vmatprep.subr.bf16.mxu0 %v5741_v57  ;;  %v3724_v57 = vrot.slane %v3715_v35, %v1251_v10 }
 0x8d3   : > { %3955 = vmatpush1.bf16.msra.mxu0 %v5739_v26 }
 0x8d4   : > { %5356 = vmatprep.subr.bf16.mxu0 %v5743_v28 }
 0x976   : > { %v3633_v31 = vpop.f32.mrf.mxu0 }
 0x977   : > { %v3634_v40 = vadd.f32 %v5090_v55, %v3633_v31 }
 0x978   : > { %v5512_v32 = vpop.f32.mrf.mxu0 }
 0x979   : > { %v7270_v49 = vadd.f32 %v5830_v36, %v3634_v40  ;;  %v5100_v32 = vld [vmem:[%s893_s30] ss:$0 sm:$0xff]  ;;  %s7555_s30 = sld [smem:[#allocation44_spill]] (!%p5166_p1) }
 0x97a   : > { %v3636_v37 = vpop.f32.mrf.mxu0 }
 0x97b   : > { %v3637_v61 = vadd.f32 %v5090_v55, %v3636_v37  ;;  %3644 = vadd.xlane.f32.xlu1 %v7270_v49 }
 0x97c   : > { %v5513_v63 = vpop.f32.mrf.mxu0 }
 0x97d   : > { %v7273_v58 = vadd.f32 %v5831_v44, %v3637_v61  ;;  %v5742_v44 = vld [vmem:[%s6691_s27 + $0x78] sm:$0xff]  }
 0x97e   : > { %5334 = vmatprep.subr.bf16.mxu1 %v5742_v44 }
 0x97f   : > { %3646 = vadd.xlane.f32.xlu0 %v7273_v58 }
 0xa04   : > { %v3645_v24 = vpop.xlane.xlu1 %3644 }
 0xa05   : > { %v3648_v39 = vmul.f32 0.0078125, %v3645_v24  ;;  %v5747_v24 = vld [vmem:[%s6691_s27 + $0xf0] sm:$0xff]  }
 0xa07   : > { %v7281_v29 = vsub.f32 %v7270_v49, %v3648_v39  ;;  %v5748_v39 = vld [vmem:[%s6691_s27 + $0x30] sm:$0xff]  }
 0xa08   : > { %v3647_v38 = vpop.xlane.xlu0 %3646 }
 0xa09   : > { %v3649_v33 = vmul.f32 0.0078125, %v3647_v38  ;;  %v3652_v0 = vmul.f32 %v7281_v29, %v7281_v29  ;;  %v5750_v38 = vld [vmem:[%s6691_s27 + $0x68] sm:$0xff]  }
 0xa0b   : > { %v7286_v1 = vsub.f32 %v7273_v58, %v3649_v33  ;;  %3654 = vadd.xlane.f32.xlu0 %v3652_v0  ;;  %v5751_v33 = vld [vmem:[%s6691_s27 + $0xe8] sm:$0xff]  }
 0xa0c   : > { %v5752_v0 = vld [vmem:[%s6691_s27 + $0x28] sm:$0xff]  }
 0xa0d   : > { %v3653_v2 = vmul.f32 %v7286_v1, %v7286_v1 }
 0xa0f   : > { %3656 = vadd.xlane.f32.xlu0 %v3653_v2  ;;  %v5754_v2 = vld [vmem:[%s6691_s27 + $0x60] sm:$0xff]  }
 0xa94   : > { %v3655_v46 = vpop.xlane.xlu0 %3654 }
 0xa95   : > { %v3658_v47 = vmul.f32 0.0078125, %v3655_v46 }
 0xa97   : > { %v3660_v48 = vadd.f32 1e-05, %v3658_v47 }
 0xa98   : > { %v3657_v30 = vpop.xlane.xlu0 %3656 }
 0xa99   : > { %5810 = vrsqrt.f32 %v3660_v48  ;;  %v3659_v50 = vmul.f32 0.0078125, %v3657_v30 }
 0xa9b   : > { %v3661_v51 = vadd.f32 1e-05, %v3659_v50 }
 0xa9d   : > { %5812 = vrsqrt.f32 %v3661_v51 }
 0xaa6   : > { %v5811_v18 = vpop.eup %5810 }
 0xaa7   : > { %v3664_v53 = vmul.f32 %v5811_v18, %v7281_v29  ;;  %v5749_v29 = vld [vmem:[%s6691_s27 + $0xb0] sm:$0xff]  }
 0xaa9   : > { %v3672_v40 = vmul.f32 %v5099_v7, %v3664_v53 }
 0xaaa   : > { %v5813_v55 = vpop.eup %5812 }
 0xaab   : > { %v3665_v31 = vmul.f32 %v5813_v55, %v7286_v1  ;;  %v3680_v37 = vadd.f32 %v5100_v32, %v3672_v40  ;;  %v5753_v1 = vld [vmem:[%s6691_s27 + $0xa8] sm:$0xff]  }
 0xaad   : > { %v3673_v36 = vmul.f32 %v5099_v7, %v3665_v31 }
 0xaaf   : > { %v3681_v61 = vadd.f32 %v5100_v32, %v3673_v36 }
 0xab1   : > { %v3714_v63 = vpack.c.bf16 %v3681_v61, %v3680_v37 }
 0xab3   : > { %3930 = vmatmul.mubr.bf16.vlgmr.msra.gmra.mxu1 %v3714_v63  ;;  %3973 = vmatmul.mubr.bf16.vlgmr.msra.gmra.mxu0 %v3714_v63 }
 0xab4   : > { %5335 = vmatpush3.bf16.msra.mxu1 %v5744_v42  ;;  %5357 = vmatpush3.bf16.msra.mxu0 %v5745_v43 }
 0xab5   : > { %5336 = vmatprep.subr.bf16.mxu1 %v5746_v45  ;;  %5358 = vmatprep.subr.bf16.mxu0 %v5747_v24 }
 0xab8   : > { %5337 = vmatpush3.bf16.msra.mxu1 %v5748_v39  ;;  %5359 = vmatpush3.bf16.msra.mxu0 %v5749_v29 }
 0xab9   : > { %5338 = vmatprep.subr.bf16.mxu1 %v5750_v38  ;;  %5360 = vmatprep.subr.bf16.mxu0 %v5751_v33 }
 0xabc   : > { %5339 = vmatpush3.bf16.msra.mxu1 %v5752_v0  ;;  %5361 = vmatpush3.bf16.msra.mxu0 %v5753_v1 }
 0xabd   : > { %5340 = vmatprep.subr.bf16.mxu1 %v5754_v2  ;;  %5362 = vmatprep.subr.bf16.mxu0 %v5755_v3 }
 0xac0   : > { %5341 = vmatpush3.bf16.msra.mxu1 %v5756_v5  ;;  %5363 = vmatpush3.bf16.msra.mxu0 %v5757_v27 }
 0xac1   : > { %5342 = vmatprep.subr.bf16.mxu1 %v5758_v6  ;;  %5364 = vmatprep.subr.bf16.mxu0 %v5759_v54 }
 0xac4   : > { %5343 = vmatpush3.bf16.msra.mxu1 %v5760_v9  ;;  %5365 = vmatpush3.bf16.msra.mxu0 %v5761_v11 }
 0xac5   : > { %5344 = vmatprep.subr.bf16.mxu1 %v5762_v12  ;;  %5366 = vmatprep.subr.bf16.mxu0 %v5763_v17 }
 0xac8   : > { %5345 = vmatpush3.bf16.msra.mxu1 %v5764_v34  ;;  %5367 = vmatpush3.bf16.msra.mxu0 %v5765_v52 }
 0xac9   : > { %5346 = vmatprep.subr.bf16.mxu1 %v5766_v13  ;;  %5368 = vmatprep.subr.bf16.mxu0 %v5767_v14 }
 0xacc   : > { %5347 = vmatpush3.bf16.msra.mxu1 %v5768_v15  ;;  %5369 = vmatpush3.bf16.msra.mxu0 %v5769_v62 }
 0xacd   : > { %5348 = vmatprep.subr.bf16.mxu1 %v5770_v16  ;;  %5370 = vmatprep.subr.bf16.mxu0 %v5771_v4 }
 0xad0   : > { %5349 = vmatpush3.bf16.msra.mxu1 %v5772_v60  ;;  %5371 = vmatpush3.bf16.msra.mxu0 %v5773_v41 }
 0xb73   : > { %v3931_v8 = vpop.f32.mrf.mxu1  ;;  %v3974_v21 = vpop.f32.mrf.mxu0 }
 0xb74   : > { %v7370_v26 = vadd.f32 %v3931_v8, %v3720_v20  ;;  %v7372_v46 = vadd.f32 %v3974_v21, %v3728_v59 }
 0xb75   : > { %v3933_v47 = vpop.f32.mrf.mxu1  ;;  %v3976_v48 = vpop.f32.mrf.mxu0 }
 0xb76   : > { %v3991_v30 = vmul.f32 %v7370_v26, %v7370_v26  ;;  %v3993_v23 = vmul.f32 %v7372_v46, %v7372_v46  ;;  %v7378_v50 = vadd.f32 %v3933_v47, %v3724_v57  ;;  %v7380_v56 = vadd.f32 %v3976_v48, %v3732_v25 }
 0xb77   : > { %v3935_v51 = vpop.f32.mrf.mxu1  ;;  %v3978_v22 = vpop.f32.mrf.mxu0  ;;  %v3983_v48 = vmul.f32 0.5, %v7370_v26 }
 0xb78   : > { %v3999_v10 = vmul.f32 %v3991_v30, %v7370_v26  ;;  %v4001_v18 = vmul.f32 %v3993_v23, %v7372_v46  ;;  %v3936_v53 = vadd.f32 %v3935_v51, %v3720_v20  ;;  %v7384_v7 = vadd.f32 %v3978_v22, %v3728_v59 }
 0xb79   : > { %v3992_v55 = vmul.f32 %v7378_v50, %v7378_v50  ;;  %v3994_v31 = vmul.f32 %v7380_v56, %v7380_v56  ;;  %v3937_v40 = vpop.f32.mrf.mxu1  ;;  %v3980_v61 = vpop.f32.mrf.mxu0  ;;  %v3984_v22 = vmul.f32 0.5, %v7378_v50 }
 0xb7a   : > { %v4007_v32 = vmul.f32 0.044715, %v3999_v10  ;;  %v4009_v36 = vmul.f32 0.044715, %v4001_v18  ;;  %v3995_v37 = vmul.f32 %v3936_v53, %v3936_v53  ;;  %v3997_v28 = vmul.f32 %v7384_v7, %v7384_v7 }
 0xb7b   : > { %v4000_v63 = vmul.f32 %v3992_v55, %v7378_v50  ;;  %v4002_v44 = vmul.f32 %v3994_v31, %v7380_v56  ;;  %v3938_v45 = vadd.f32 %v3937_v40, %v3724_v57  ;;  %v3981_v38 = vadd.f32 %v3980_v61, %v3732_v25 }
 0xb7c   : > { %v4015_v42 = vadd.f32 %v4007_v32, %v7370_v26  ;;  %v4003_v43 = vmul.f32 %v3995_v37, %v3936_v53  ;;  %v4005_v29 = vmul.f32 %v3997_v28, %v7384_v7  ;;  %v4017_v0 = vadd.f32 %v4009_v36, %v7372_v46 }
 0xb7d   : > { %v4008_v24 = vmul.f32 0.044715, %v4000_v63  ;;  %v4010_v39 = vmul.f32 0.044715, %v4002_v44  ;;  %v3996_v2 = vmul.f32 %v3938_v45, %v3938_v45  ;;  %v3998_v6 = vmul.f32 %v3981_v38, %v3981_v38 }
 0xb7e   : > { %v4023_v33 = vmul.f32 0.7978846, %v4015_v42  ;;  %v4011_v1 = vmul.f32 0.044715, %v4003_v43  ;;  %v4013_v27 = vmul.f32 0.044715, %v4005_v29 }
 0xb7f   : > { %v4016_v3 = vadd.f32 %v4008_v24, %v7378_v50  ;;  %v4018_v5 = vadd.f32 %v4010_v39, %v7380_v56  ;;  %v4004_v9 = vmul.f32 %v3996_v2, %v3938_v45  ;;  %v4006_v13 = vmul.f32 %v3998_v6, %v3981_v38 }
 0xb80   : > { %v4019_v54 = vadd.f32 %v4011_v1, %v3936_v53  ;;  %v4021_v17 = vadd.f32 %v4013_v27, %v7384_v7  ;;  %5814 = vtanh.f32 %v4023_v33  ;;  %v4025_v14 = vmul.f32 0.7978846, %v4017_v0 }
 0xb81   : > { %v4024_v11 = vmul.f32 0.7978846, %v4016_v3  ;;  %v4026_v12 = vmul.f32 0.7978846, %v4018_v5  ;;  %v4012_v52 = vmul.f32 0.044715, %v4004_v9 }
 0xb82   : > { %v4027_v34 = vmul.f32 0.7978846, %v4019_v54  ;;  %v4029_v15 = vmul.f32 0.7978846, %v4021_v17  ;;  %v4014_v16 = vmul.f32 0.044715, %v4006_v13 }
 0xb83   : > { %5816 = vtanh.f32 %v4024_v11  ;;  %v4020_v62 = vadd.f32 %v4012_v52, %v3938_v45  ;;  %v3987_v30 = vmul.f32 0.5, %v3936_v53  ;;  %v3988_v10 = vmul.f32 0.5, %v3938_v45 }
 0xb84   : > { %5818 = vtanh.f32 %v4026_v12  ;;  %v4022_v60 = vadd.f32 %v4014_v16, %v3981_v38  ;;  %v3989_v40 = vmul.f32 0.5, %v7384_v7  ;;  %v3986_v32 = vmul.f32 0.5, %v7380_v56 }
 0xb85   : > { %5820 = vtanh.f32 %v4027_v34  ;;  %v4028_v4 = vmul.f32 0.7978846, %v4020_v62  ;;  %v3990_v44 = vmul.f32 0.5, %v3981_v38  ;;  %v3985_v26 = vmul.f32 0.5, %v7372_v46  ;;  %v5133_v46 = vld [vmem:[%s900_s7] ss:$0 sm:$0xff] }
 0xb86   : > { %5822 = vtanh.f32 %v4029_v15  ;;  %v4030_v41 = vmul.f32 0.7978846, %v4022_v60 }
 0xb87   : > { %5824 = vtanh.f32 %v4025_v14 }
 0xb88   : > { %5826 = vtanh.f32 %v4028_v4 }
 0xb89   : > { %5828 = vtanh.f32 %v4030_v41 }
 0xb8d   : > { %v5815_v35 = vpop.eup %5814 }
 0xb8e   : > { %v4039_v23 = vadd.f32 1.0, %v5815_v35 }
 0xb90   : > { %v5817_v19 = vpop.eup %5816  ;;  %v4047_v53 = vmul.f32 %v4039_v23, %v3983_v48 }
 0xb91   : > { %v5819_v20 = vpop.eup %5818  ;;  %v4040_v25 = vadd.f32 1.0, %v5817_v19 }
 0xb92   : > { %v5821_v59 = vpop.eup %5820  ;;  %v4042_v55 = vadd.f32 1.0, %v5819_v20 }
 0xb93   : > { %v5823_v8 = vpop.eup %5822  ;;  %v4043_v21 = vadd.f32 1.0, %v5821_v59  ;;  %v4048_v61 = vmul.f32 %v4040_v25, %v3984_v22 }
 0xb94   : > { %v5825_v57 = vpop.eup %5824  ;;  %v4045_v51 = vadd.f32 1.0, %v5823_v8  ;;  %v4050_v43 = vmul.f32 %v4042_v55, %v3986_v32 }
 0xb95   : > { %v5827_v47 = vpop.eup %5826  ;;  %v4051_v36 = vmul.f32 %v4043_v21, %v3987_v30  ;;  %v4041_v37 = vadd.f32 1.0, %v5825_v57 }
 0xb96   : > { %v4044_v18 = vadd.f32 1.0, %v5827_v47  ;;  %v5829_v31 = vpop.eup %5828  ;;  %v4053_v42 = vmul.f32 %v4045_v51, %v3989_v40 }
 0xb97   : > { %v4046_v28 = vadd.f32 1.0, %v5829_v31  ;;  %v4119_v24 = vpack.c.bf16 %v4051_v36, %v4047_v53  ;;  %v4049_v39 = vmul.f32 %v4041_v37, %v3985_v26 }
 0xb98   : > { %v4052_v63 = vmul.f32 %v4044_v18, %v3988_v10 }
 0xb99   : > { %v4054_v45 = vmul.f32 %v4046_v28, %v3990_v44  ;;  %v4121_v56 = vpack.c.bf16 %v4053_v42, %v4049_v39 }
 0xb9a   : > { %v4120_v50 = vpack.c.bf16 %v4052_v63, %v4048_v61 }
 0xb9b   : > { %v4122_v7 = vpack.c.bf16 %v4054_v45, %v4050_v43 }
 0xb9c   : > { %4354 = vmatprep.mubr.bf16.mxu1 %v4120_v50 }
 0xb9d   : > { %4355 = vmatmul.mubr.bf16.vlgmr.msra.gmra.mxu1 %v4119_v24  ;;  %4395 = vmatprep.mubr.bf16.mxu0 %v4122_v7 }
 0xb9e   : > { %4396 = vmatmul.mubr.bf16.vlgmr.msra.gmra.mxu0 %v4121_v56 }
 0xc5d   : > { %v5350_v29 = vpop.f32.mrf.mxu1 }
 0xc5e   : > { %v5372_v33 = vpop.f32.mrf.mxu0 }
 0xc5f   : > { %v5351_v38 = vpop.f32.mrf.mxu1 }
 0xc60   : > { %v5352_v0 = vadd.f32 %v5351_v38, %v5350_v29  ;;  %v5373_v1 = vpop.f32.mrf.mxu0 }
 0xc61   : > { %v5353_v2 = vpop.f32.mrf.mxu1  ;;  %v5374_v5 = vadd.f32 %v5373_v1, %v5372_v33 }
 0xc62   : > { %v4357_v3 = vadd.f32 %v5352_v0, %v5133_v46  ;;  %v5375_v27 = vpop.f32.mrf.mxu0 }
 0xc63   : > { %v5354_v6 = vpop.f32.mrf.mxu1 }
 0xc64   : > { %v4398_v54 = vadd.f32 %v5374_v5, %v4357_v3  ;;  %v5355_v9 = vadd.f32 %v5354_v6, %v5353_v2  ;;  %v5376_v11 = vpop.f32.mrf.mxu0 }
 0xc65   : > { %v5377_v34 = vadd.f32 %v5376_v11, %v5375_v27 }
 0xc66   : > { %v4404_v12 = vadd.f32 %v4398_v54, %v7270_v49  ;;  %v4360_v17 = vadd.f32 %v5355_v9, %v5133_v46 }
 0xc68   : > { %4406 = vst [vmem:[#allocation2] sm:$0xff] %v4404_v12  ;;  %v4401_v52 = vadd.f32 %v5377_v34, %v4360_v17  ;;  %4411 = sbr.rel (%p5166_p1) target bundleno = 3693 (0xe6d), region = 136 }
 0xc6a   : > { %v4405_v13 = vadd.f32 %v4401_v52, %v7273_v58 }
 0xc6c   : > { %4407 = vst [vmem:[#allocation2 + $0x8] sm:$0xff] %v4405_v13 }
 0xc6d   : > { %4414 = vadd.xlane.f32.xlu0 %v4404_v12  ;;  %v5832_v14 = vld [vmem:[#allocation18 + $0xe4] ss:$16 sps:$4 sm:$0xff]   ;;  %v5834_v15 = vld [vmem:[#allocation18 + $0xec] ss:$16 sps:$4 sm:$0xff]   ;;  %v5836_v19 = vld [vmem:[#allocation18 + $0xe0] ss:$16 sps:$4 sm:$0xff]  }
 0xc6e   : > { %4645 = vmatprep.subr.bf16.mxu0 %v5832_v14  ;;  %4688 = vmatprep.subr.bf16.mxu1 %v5834_v15  ;;  %v5837_v20 = vld [vmem:[#allocation18 + $0xe8] ss:$16 sps:$4 sm:$0xff]   ;;  %v5838_v59 = vld [vmem:[#allocation18 + $0xc4] ss:$16 sps:$4 sm:$0xff]   ;;  %v5840_v8 = vld [vmem:[#allocation18 + $0xcc] ss:$16 sps:$4 sm:$0xff]  }
 0xc6f   : > { %4646 = vmatpush1.bf16.msra.mxu0 %v5836_v19  ;;  %4689 = vmatpush1.bf16.msra.mxu1 %v5837_v20  ;;  %v5842_v21 = vld [vmem:[#allocation18 + $0xc0] ss:$16 sps:$4 sm:$0xff]   ;;  %v5843_v57 = vld [vmem:[#allocation18 + $0xc8] ss:$16 sps:$4 sm:$0xff]   ;;  %v5844_v25 = vld [vmem:[#allocation18 + $0xa4] ss:$16 sps:$4 sm:$0xff]  }
 0xc70   : > { %4647 = vmatprep.subr.bf16.mxu0 %v5838_v59  ;;  %4690 = vmatprep.subr.bf16.mxu1 %v5840_v8  ;;  %v5846_v47 = vld [vmem:[#allocation18 + $0xac] ss:$16 sps:$4 sm:$0xff]   ;;  %v5848_v48 = vld [vmem:[#allocation18 + $0xa0] ss:$16 sps:$4 sm:$0xff]   ;;  %v5849_v30 = vld [vmem:[#allocation18 + $0xa8] ss:$16 sps:$4 sm:$0xff]  }
 0xc71   : > { %4416 = vadd.xlane.f32.xlu0 %v4405_v13  ;;  %v5850_v23 = vld [vmem:[#allocation18 + $0x84] ss:$16 sps:$4 sm:$0xff]   ;;  %v5852_v51 = vld [vmem:[#allocation18 + $0x8c] ss:$16 sps:$4 sm:$0xff]   ;;  %v5854_v22 = vld [vmem:[#allocation18 + $0x80] ss:$16 sps:$4 sm:$0xff]  }
 0xc72   : > { %v5855_v10 = vld [vmem:[#allocation18 + $0x88] ss:$16 sps:$4 sm:$0xff]   ;;  %v5856_v18 = vld [vmem:[#allocation18 + $0x64] ss:$16 sps:$4 sm:$0xff]   ;;  %v5858_v55 = vld [vmem:[#allocation18 + $0x6c] ss:$16 sps:$4 sm:$0xff]  }
 0xc73   : > { %4648 = vmatpush1.bf16.msra.mxu0 %v5842_v21  ;;  %4691 = vmatpush1.bf16.msra.mxu1 %v5843_v57  ;;  %v5860_v31 = vld [vmem:[#allocation18 + $0x60] ss:$16 sps:$4 sm:$0xff]   ;;  %v5861_v40 = vld [vmem:[#allocation18 + $0x68] ss:$16 sps:$4 sm:$0xff]   ;;  %v5862_v32 = vld [vmem:[#allocation18 + $0x44] ss:$16 sps:$4 sm:$0xff]  }
 0xc74   : > { %4649 = vmatprep.subr.bf16.mxu0 %v5844_v25  ;;  %4692 = vmatprep.subr.bf16.mxu1 %v5846_v47  ;;  %v5864_v36 = vld [vmem:[#allocation18 + $0x4c] ss:$16 sps:$4 sm:$0xff]   ;;  %v5866_v37 = vld [vmem:[#allocation18 + $0x40] ss:$16 sps:$4 sm:$0xff]   ;;  %v5867_v61 = vld [vmem:[#allocation18 + $0x48] ss:$16 sps:$4 sm:$0xff]  }
 0xc75   : > { %v5868_v63 = vld [vmem:[#allocation18 + $0x24] ss:$16 sps:$4 sm:$0xff]   ;;  %v5870_v44 = vld [vmem:[#allocation18 + $0x2c] ss:$16 sps:$4 sm:$0xff]   ;;  %v6244_v28 = vmov 0  }
 0xc76   : > { %4677 = vmatprep.mubr.bf16.mxu0 %v6244_v28  ;;  %4720 = vmatprep.mubr.bf16.mxu1 %v6244_v28  ;;  %v5872_v26 = vld [vmem:[#allocation18 + $0x20] ss:$16 sps:$4 sm:$0xff]   ;;  %v5873_v53 = vld [vmem:[#allocation18 + $0x28] ss:$16 sps:$4 sm:$0xff]   ;;  %v5874_v42 = vld [vmem:[#allocation18 + $0x4] ss:$16 sps:$4 sm:$0xff]  }
 0xc77   : > { %4650 = vmatpush1.bf16.msra.mxu0 %v5848_v48  ;;  %4693 = vmatpush1.bf16.msra.mxu1 %v5849_v30  ;;  %v5876_v50 = vld [vmem:[#allocation18 + $0xc] ss:$16 sps:$4 sm:$0xff]   ;;  %v5878_v43 = vld [vmem:[#allocation18] ss:$16 sps:$4 sm:$0xff]   ;;  %v5879_v45 = vld [vmem:[#allocation18 + $0x8] ss:$16 sps:$4 sm:$0xff]  }
 0xc78   : > { %4651 = vmatprep.subr.bf16.mxu0 %v5850_v23  ;;  %4694 = vmatprep.subr.bf16.mxu1 %v5852_v51  ;;  %v5167_v0 = vld [vmem:[%s7555_s30] ss:$0 sm:$0xff] }
 0xc79   : > { %v5168_v5 = vld [vmem:[%s7556_s3] ss:$0 sm:$0xff] }
 0xc7b   : > { %4652 = vmatpush1.bf16.msra.mxu0 %v5854_v22  ;;  %4695 = vmatpush1.bf16.msra.mxu1 %v5855_v10 }
 0xc7c   : > { %4653 = vmatprep.subr.bf16.mxu0 %v5856_v18  ;;  %4696 = vmatprep.subr.bf16.mxu1 %v5858_v55 }
 0xc7f   : > { %4654 = vmatpush1.bf16.msra.mxu0 %v5860_v31  ;;  %4697 = vmatpush1.bf16.msra.mxu1 %v5861_v40 }
 0xc80   : > { %4655 = vmatprep.subr.bf16.mxu0 %v5862_v32  ;;  %4698 = vmatprep.subr.bf16.mxu1 %v5864_v36 }
 0xc83   : > { %4656 = vmatpush1.bf16.msra.mxu0 %v5866_v37  ;;  %4699 = vmatpush1.bf16.msra.mxu1 %v5867_v61 }
 0xc84   : > { %4657 = vmatprep.subr.bf16.mxu0 %v5868_v63  ;;  %4700 = vmatprep.subr.bf16.mxu1 %v5870_v44 }
 0xc87   : > { %4658 = vmatpush1.bf16.msra.mxu0 %v5872_v26  ;;  %4701 = vmatpush1.bf16.msra.mxu1 %v5873_v53 }
 0xc88   : > { %4659 = vmatprep.subr.bf16.mxu0 %v5874_v42  ;;  %4702 = vmatprep.subr.bf16.mxu1 %v5876_v50 }
 0xc8b   : > { %4660 = vmatpush1.bf16.msra.mxu0 %v5878_v43  ;;  %4703 = vmatpush1.bf16.msra.mxu1 %v5879_v45 }
 0xcf6   : > { %v4415_v62 = vpop.xlane.xlu0 %4414 }
 0xcf7   : > { %v4418_v16 = vmul.f32 0.0078125, %v4415_v62 }
 0xcf9   : > { %v7413_v4 = vsub.f32 %v4404_v12, %v4418_v16 }
 0xcfa   : > { %v4417_v49 = vpop.xlane.xlu0 %4416 }
 0xcfb   : > { %v4419_v60 = vmul.f32 0.0078125, %v4417_v49  ;;  %v4422_v41 = vmul.f32 %v7413_v4, %v7413_v4 }
 0xcfd   : > { %v7417_v58 = vsub.f32 %v4405_v13, %v4419_v60  ;;  %4424 = vadd.xlane.f32.xlu1 %v4422_v41 }
 0xcff   : > { %v4423_v35 = vmul.f32 %v7417_v58, %v7417_v58 }
 0xd01   : > { %4426 = vadd.xlane.f32.xlu1 %v4423_v35 }
 0xd86   : > { %v4425_v24 = vpop.xlane.xlu1 %4424 }
 0xd87   : > { %v4428_v39 = vmul.f32 0.0078125, %v4425_v24 }
 0xd89   : > { %v4430_v7 = vadd.f32 1e-05, %v4428_v39 }
 0xd8a   : > { %v4427_v56 = vpop.xlane.xlu1 %4426 }
 0xd8b   : > { %5880 = vrsqrt.f32 %v4430_v7  ;;  %v4429_v29 = vmul.f32 0.0078125, %v4427_v56 }
 0xd8d   : > { %v4431_v33 = vadd.f32 1e-05, %v4429_v29 }
 0xd8f   : > { %5882 = vrsqrt.f32 %v4431_v33 }
 0xd98   : > { %v5881_v46 = vpop.eup %5880 }
 0xd99   : > { %v4434_v38 = vmul.f32 %v5881_v46, %v7413_v4 }
 0xd9b   : > { %v4442_v3 = vmul.f32 %v5167_v0, %v4434_v38 }
 0xd9c   : > { %v5883_v1 = vpop.eup %5882 }
 0xd9d   : > { %v4435_v2 = vmul.f32 %v5883_v1, %v7417_v58  ;;  %v4450_v6 = vadd.f32 %v5168_v5, %v4442_v3 }
 0xd9f   : > { %v4443_v27 = vmul.f32 %v5167_v0, %v4435_v2 }
 0xda1   : > { %v4451_v54 = vadd.f32 %v5168_v5, %v4443_v27 }
 0xda3   : > { %v4484_v9 = vpack.c.bf16 %v4451_v54, %v4450_v6 }
 0xda5   : > { %4678 = vmatmul.mubr.bf16.vlgmr.msra.gmra.mxu0 %v4484_v9  ;;  %4721 = vmatmul.mubr.bf16.vlgmr.msra.gmra.mxu1 %v4484_v9 }
 0xe65   : > { %v4679_v11 = vpop.f32.mrf.mxu0  ;;  %v4722_v12 = vpop.f32.mrf.mxu1 }
 0xe66   : > { %4731 = vst [vmem:[#allocation19] sm:$0xff] %v4679_v11  ;;  %4733 = vst [vmem:[#allocation19 + $0x10] sm:$0xff] %v4722_v12 }
 0xe67   : > { %v4681_v17 = vpop.f32.mrf.mxu0  ;;  %v4724_v34 = vpop.f32.mrf.mxu1 }
 0xe68   : > { %4732 = vst [vmem:[#allocation19 + $0x8] sm:$0xff] %v4681_v17  ;;  %4734 = vst [vmem:[#allocation19 + $0x18] sm:$0xff] %v4724_v34 }
 0xe69   : > { %v4683_v52 = vpop.f32.mrf.mxu0  ;;  %v4726_v13 = vpop.f32.mrf.mxu1 }
 0xe6a   : > { %4735 = vst [vmem:[#allocation19 + $0x20] sm:$0xff] %v4683_v52  ;;  %4737 = vst [vmem:[#allocation19 + $0x30] sm:$0xff] %v4726_v13 }
 0xe6b   : > { %v4685_v14 = vpop.f32.mrf.mxu0  ;;  %v4728_v15 = vpop.f32.mrf.mxu1 }
 0xe6c   : > { %4736 = vst [vmem:[#allocation19 + $0x28] sm:$0xff] %v4685_v14  ;;  %4738 = vst [vmem:[#allocation19 + $0x38] sm:$0xff] %v4728_v15 }
 0xe6d PF: > { %p5580_p13 = scmp.eq.s32.totalorder %s6361_s0, 1  ;;  %s6245_s26 = smov [#allocation19]  }
 0xe6e   : > { %s4745_s9 = sshll.u32 %s6245_s26, 4  ;;  %s4746_s9 = int_to_ptr.vmem [resolvable:$true] %s4745_s9 }
 0xe6f   : > { %s6132_s18 = scalar_lea.vmem %s4746_s9, 1024  ;;  %p6139_p7 = scmp.lt.s32.totalorder %s4746_s9, %s4746_s9 }
 0xe70   : > { %p6133_p3 = scmp.ne.s32.totalorder %s4746_s9, %s6132_s18  ;;  %p6140_p5 = scmp.lt.s32.totalorder %s6132_s18, %s6132_s18 }
 0xe72   : > { %p6134_p2 = pnand %p6133_p3, %p5580_p13  ;;  %p6141_p11 = por %p6140_p5, %p6139_p7 }
 0xe74   : > { %p6135_p6 = pneg %p6134_p2 }
 0xe76   : > { %p6142_p4 = pnand %p6141_p11, %p6135_p6 }
 0xe78   : > { %6145 = shalt.err (!%p6142_p4)
}
 0xe79   : > { %s6246_s14 = smov 512   ;;  %s7557_s12 = sld [smem:[#allocation46_spill]] }
 0xe7f   : > { %5543 = dma.vmem_to_hbm [thread:$0]  (%p5580_p13), %s4746_s9, 1024, %s7557_s12, [#allocation6], %s6246_s14, %s6246_s14, %s6241_s22  }
 0xe80   : > { %6197 = dma.done.wait (%p5580_p13), [#allocation6], 1024  }
 0xe81   : > { %6199 = vsyncadd (%p5580_p13), [#allocation6], 4294966272 }
 0xe82 PF: > { %s7558_s30 = sld [smem:[#allocation28_spill]]  ;;  %s7561_s27 = smov %s6206_s28 }
 0xe83   : > { %s7559_s8 = sld [smem:[#allocation27_spill]] }
 0xe84   : > { %s7560_s29 = sld [smem:[#allocation29_spill]] }
 0xe88   : > { %p39_p9 = scmp.ge.s32.totalorder %s7558_s30, 4  }
 0xe89   : > { %s7562_s28 = smov %s7559_s8 }
 0xe8a   :  { %41 = sbr.rel (!%p39_p9) target bundleno = 28 (0x1c), region = 233 }
 0xe8f   :  { %4761 = vsyncpa [#allocation5], 1 }
 0xe90   :  { %4763 = vsyncpa [#allocation5 + $0x1], 1 }
 0xe91   :  { %4764 = vsyncpa [#allocation8], 1 }
 0xe92   :  { %4766 = vsyncpa [#allocation8 + $0x1], 1 }
 0xe93   :  { %4767 = vsyncpa [#allocation11], 1 }
 0xe94   :  { %4769 = vsyncpa [#allocation11 + $0x1], 1 }
 0xe95   :  { %4770 = vsyncpa [#allocation14], 1 }
 0xe96   :  { %4772 = vsyncpa [#allocation14 + $0x1], 1 }
 0xe97   :  { %4773 = vsyncpa [#allocation17], 1 }
 0xe98   :  { %4775 = vsyncpa [#allocation17 + $0x1], 1 }
 0xe99   :  { %4776 = vsyncpa [#allocation6], 1 }
 0xe9a   :  { %4778 = vsyncpa [#allocation6 + $0x1], 1 }

</bundles_post_ra>
